<compile_context>
chip_gen: v7x
topology: tpu7x:2x2x1
jax: 0.10.0
libtpu: 0.0.40
codegen_flags: <defaults>
</compile_context>

<pallas_src>
import functools

import jax
import jax.numpy as jnp
from jax import lax
from jax.experimental import pallas as pl
from jax.experimental.pallas import tpu as pltpu


def _make_resunits_kernel(R, H, W, C, compute_dtype):
    HW = H * W
    KH = KW = 3

    def kernel(x_ref, w1_ref, b1_ref, w2_ref, b2_ref, o_ref, im_ref, cur_ref):
        # ---- per-tap border-validity masks (SAME zero padding) --------------
        # One (1, HW) boolean row each, broadcast over the C sublanes at use.
        pos = lax.broadcasted_iota(jnp.int32, (1, HW), 1)       # lane position
        if W & (W - 1) == 0:                                    # w = pos % W
            w_pos = jnp.bitwise_and(pos, W - 1)                 # (no vector div)
        else:
            w_pos = pos % W

        def tap_mask(dh, dw):
            conds = []
            if dh == -1:
                conds.append(pos >= W)                  # h >= 1
            elif dh == 1:
                conds.append(pos < (H - 1) * W)         # h <= H-2
            if dw == -1:
                conds.append(w_pos >= 1)                # w >= 1
            elif dw == 1:
                conds.append(w_pos <= W - 2)            # w <= W-2
            if not conds:
                return None
            m = conds[0]
            for c in conds[1:]:
                m = jnp.logical_and(m, c)
            return m

        masks = [tap_mask(kh - 1, kw - 1) for kh in range(KH) for kw in range(KW)]

        def build_im2col(a):
            """a: (C, HW) f32 conv input; fills im_ref[(kh*3+kw)*C + ci, p]."""
            for kh in range(KH):
                for kw in range(KW):
                    t = kh * KW + kw
                    s = (kh - 1) * W + (kw - 1)     # flattened spatial offset
                    # tap[ci, p] = a[ci, p + s], zero outside the image.
                    # pltpu.roll matches jnp.roll: out[p] = in[(p - shift) % n],
                    # so shift = (-s) % HW; wrapped lanes are killed by the mask.
                    rolled = a if s == 0 else pltpu.roll(a, (-s) % HW, 1)
                    if masks[t] is not None:
                        rolled = jnp.where(masks[t], rolled, 0.0)
                    # sublane-aligned, lane-dense store (C rows x HW lanes).
                    im_ref[t * C:(t + 1) * C, :] = rolled.astype(compute_dtype)

        def conv(w_ref, b_ref, r):
            # Single MXU contraction, K = 9*C; f32 accumulation; result stays
            # in registers (no VMEM accumulator read-modify-write).
            return jnp.dot(w_ref[r], im_ref[...],
                           preferred_element_type=jnp.float32) + b_ref[r]

        # ---- residual stack --------------------------------------------------
        cur_ref[...] = x_ref[0].astype(jnp.float32)

        for r in range(R):                                # R is small -> unroll
            build_im2col(jnp.maximum(cur_ref[...], 0.0))  # ReLU(x)
            h1 = jnp.maximum(conv(w1_ref, b1_ref, r), 0.0)  # ReLU(conv1 + b1)
            build_im2col(h1)
            cur_ref[...] += conv(w2_ref, b2_ref, r)         # x + (conv2 + b2)

        o_ref[0] = cur_ref[...].astype(o_ref.dtype)

    return kernel


def res_units_forward(x_nchw, params, *, compute_dtype=jnp.bfloat16):
    """ResUnits forward.  x: (B, C, H, W) (PyTorch NCHW) -> (B, C, H, W)."""
    w1, b1, w2, b2 = params            # w: (R, Cout, Cin, 3, 3), b: (R, C)
    R, Co, Ci, KH, KW = w1.shape
    B, C, H, W = x_nchw.shape
    assert Co == Ci == C and KH == KW == 3
    HW = H * W

    # (R, Cout, Cin, 3, 3) -> (R, Cout, 9*Cin): contraction rows ordered
    # (kh, kw, ci) to match the im2col tap layout inside the kernel.
    def flat_w(w):
        return (jnp.transpose(w, (0, 1, 3, 4, 2))
                .reshape(R, C, KH * KW * C).astype(compute_dtype))

    w1f, w2f = flat_w(w1), flat_w(w2)
    b1c = b1.reshape(R, C, 1).astype(jnp.float32)
    b2c = b2.reshape(R, C, 1).astype(jnp.float32)
    x = x_nchw.reshape(B, C, HW)       # free reshape; HW is the lane dim

    kernel = _make_resunits_kernel(R, H, W, C, compute_dtype)
    out = pl.pallas_call(
        kernel,
        out_shape=jax.ShapeDtypeStruct((B, C, HW), x_nchw.dtype),
        grid_spec=pltpu.PrefetchScalarGridSpec(
            num_scalar_prefetch=0,
            grid=(B,),
            in_specs=[
                pl.BlockSpec((1, C, HW), lambda b: (b, 0, 0)),
                # Weights / biases are grid-invariant; double buffers are
                # negligible at this size (see TODO about pl.Buffered(1)).
                pl.BlockSpec((R, C, KH * KW * C), lambda b: (0, 0, 0)),
                pl.BlockSpec((R, C, 1), lambda b: (0, 0, 0)),
                pl.BlockSpec((R, C, KH * KW * C), lambda b: (0, 0, 0)),
                pl.BlockSpec((R, C, 1), lambda b: (0, 0, 0)),
            ],
            out_specs=pl.BlockSpec((1, C, HW), lambda b: (b, 0, 0)),
            scratch_shapes=[
                pltpu.VMEM((KH * KW * C, HW), compute_dtype),  # im2col (K, HW)
                pltpu.VMEM((C, HW), jnp.float32),              # running activation
            ],
        ),
        compiler_params=pltpu.CompilerParams(
            dimension_semantics=("parallel",)),
    )(x, w1f, b1c, w2f, b2c)

    return out.reshape(B, C, H, W)


def init_params(key, nb_filter, repetations):
    """Synthetic params in PyTorch Conv2d layout: w (R, Cout, Cin, 3, 3), b (R, C)."""
    C, R = nb_filter, repetations
    ks = jax.random.split(key, 4)
    scale = (2.0 / (3 * 3 * C)) ** 0.5
    w1 = jax.random.normal(ks[0], (R, C, C, 3, 3), jnp.float32) * scale
    b1 = jax.random.normal(ks[1], (R, C), jnp.float32) * 0.01
    w2 = jax.random.normal(ks[2], (R, C, C, 3, 3), jnp.float32) * scale
    b2 = jax.random.normal(ks[3], (R, C), jnp.float32) * 0.01
    return (w1, b1, w2, b2)


def res_units_reference(x, params):
    """Pure-JAX reference (f32, HIGHEST precision) with identical semantics."""
    w1, b1, w2, b2 = params
    R = w1.shape[0]
    dn = ("NCHW", "OIHW", "NCHW")
    for r in range(R):
        h = jax.nn.relu(x)
        h = lax.conv_general_dilated(h, w1[r], (1, 1), "SAME",
                                     dimension_numbers=dn,
                                     precision=lax.Precision.HIGHEST)
        h = h + b1[r].reshape(1, -1, 1, 1)
        h = jax.nn.relu(h)
        h = lax.conv_general_dilated(h, w2[r], (1, 1), "SAME",
                                     dimension_numbers=dn,
                                     precision=lax.Precision.HIGHEST)
        h = h + b2[r].reshape(1, -1, 1, 1)
        x = x + h
    return x


if __name__ == "__main__":
    key = jax.random.PRNGKey(0)
    pkey, xkey = jax.random.split(key)

    # nb_filter=64, repetations=2, small spatial grid
    B, C, H, W = 2, 64, 16, 16
    R = 2
    params = init_params(pkey, C, R)
    x = jax.random.normal(xkey, (B, C, H, W), jnp.float32)

    ref = res_units_reference(x, params)
    scale = max(1.0, float(jnp.max(jnp.abs(ref))))

    # f32-operand path (dtype-agnostic sanity check of the same kernel).
    fwd_f32 = jax.jit(functools.partial(res_units_forward,
                                        compute_dtype=jnp.float32))
    out_f32 = fwd_f32(x, params)
    jax.block_until_ready(out_f32)
    assert out_f32.shape == (B, C, H, W) and out_f32.dtype == jnp.float32
    err_f32 = float(jnp.max(jnp.abs(out_f32 - ref)))
    assert err_f32 <= 1.5e-2 * scale, f"f32 path max abs err {err_f32} (scale {scale})"

    # bf16 MXU-operand path (default fast path on v5e/v6e/v7x); accumulation
    # stays f32, so only a bf16-rounding-level tolerance is needed.
    fwd_bf16 = jax.jit(functools.partial(res_units_forward,
                                         compute_dtype=jnp.bfloat16))
    out_bf16 = fwd_bf16(x, params)
    jax.block_until_ready(out_bf16)
    assert out_bf16.shape == (B, C, H, W) and out_bf16.dtype == jnp.float32
    err_bf16 = float(jnp.max(jnp.abs(out_bf16 - ref)))
    assert err_bf16 <= 3e-2 * scale, f"bf16 path max abs err {err_bf16} (scale {scale})"

    print("KERNEL_OK")
</pallas_src>

<mosaic_0001>
module attributes {stable_mosaic.version = 11 : i64} {
  func.func @kernel(%arg0: i32, %arg1: memref<1x64x256xf32, #tpu.memory_space<vmem>>, %arg2: memref<2x64x576xf32, #tpu.memory_space<vmem>>, %arg3: memref<2x64x1xf32, #tpu.memory_space<vmem>>, %arg4: memref<2x64x576xf32, #tpu.memory_space<vmem>>, %arg5: memref<2x64x1xf32, #tpu.memory_space<vmem>>, %arg6: memref<1x64x256xf32, #tpu.memory_space<vmem>>, %arg7: memref<576x256xf32, #tpu.memory_space<vmem>>, %arg8: memref<64x256xf32, #tpu.memory_space<vmem>>) attributes {dimension_semantics = [#tpu.dimension_semantics<parallel>], iteration_bounds = array<i64: 2>, scalar_prefetch = 0 : i64, scratch_operands = 2 : i64, tpu.core_type = #tpu.core_type<tc>, window_params = [{transform_indices = @transform_0, window_bounds = array<i64: 1, 64, 256>}, {pipeline_mode = #tpu.pipeline_mode<synchronous>, transform_indices = @transform_1, window_bounds = array<i64: 2, 64, 576>}, {pipeline_mode = #tpu.pipeline_mode<synchronous>, transform_indices = @transform_2, window_bounds = array<i64: 2, 64, 1>}, {pipeline_mode = #tpu.pipeline_mode<synchronous>, transform_indices = @transform_3, window_bounds = array<i64: 2, 64, 576>}, {pipeline_mode = #tpu.pipeline_mode<synchronous>, transform_indices = @transform_4, window_bounds = array<i64: 2, 64, 1>}, {transform_indices = @transform_5, window_bounds = array<i64: 1, 64, 256>}]} {
    %0 = tpu.iota {dimensions = array<i32: 1>} : vector<1x256xi32>
    %c15_i32 = arith.constant 15 : i32
    %1 = vector.broadcast %c15_i32 : i32 to vector<1x256xi32>
    %2 = arith.andi %0, %1 : vector<1x256xi32>
    %c16_i32 = arith.constant 16 : i32
    %3 = vector.broadcast %c16_i32 : i32 to vector<1x256xi32>
    %4 = arith.cmpi sge, %0, %3 : vector<1x256xi32>
    %c1_i32 = arith.constant 1 : i32
    %5 = vector.broadcast %c1_i32 : i32 to vector<1x256xi32>
    %6 = arith.cmpi sge, %2, %5 : vector<1x256xi32>
    %7 = arith.andi %4, %6 : vector<1x256xi1>
    %c16_i32_0 = arith.constant 16 : i32
    %8 = vector.broadcast %c16_i32_0 : i32 to vector<1x256xi32>
    %9 = arith.cmpi sge, %0, %8 : vector<1x256xi32>
    %c16_i32_1 = arith.constant 16 : i32
    %10 = vector.broadcast %c16_i32_1 : i32 to vector<1x256xi32>
    %11 = arith.cmpi sge, %0, %10 : vector<1x256xi32>
    %c14_i32 = arith.constant 14 : i32
    %12 = vector.broadcast %c14_i32 : i32 to vector<1x256xi32>
    %13 = arith.cmpi sle, %2, %12 : vector<1x256xi32>
    %14 = arith.andi %11, %13 : vector<1x256xi1>
    %c1_i32_2 = arith.constant 1 : i32
    %15 = vector.broadcast %c1_i32_2 : i32 to vector<1x256xi32>
    %16 = arith.cmpi sge, %2, %15 : vector<1x256xi32>
    %c14_i32_3 = arith.constant 14 : i32
    %17 = vector.broadcast %c14_i32_3 : i32 to vector<1x256xi32>
    %18 = arith.cmpi sle, %2, %17 : vector<1x256xi32>
    %c240_i32 = arith.constant 240 : i32
    %19 = vector.broadcast %c240_i32 : i32 to vector<1x256xi32>
    %20 = arith.cmpi slt, %0, %19 : vector<1x256xi32>
    %c1_i32_4 = arith.constant 1 : i32
    %21 = vector.broadcast %c1_i32_4 : i32 to vector<1x256xi32>
    %22 = arith.cmpi sge, %2, %21 : vector<1x256xi32>
    %23 = arith.andi %20, %22 : vector<1x256xi1>
    %c240_i32_5 = arith.constant 240 : i32
    %24 = vector.broadcast %c240_i32_5 : i32 to vector<1x256xi32>
    %25 = arith.cmpi slt, %0, %24 : vector<1x256xi32>
    %c240_i32_6 = arith.constant 240 : i32
    %26 = vector.broadcast %c240_i32_6 : i32 to vector<1x256xi32>
    %27 = arith.cmpi slt, %0, %26 : vector<1x256xi32>
    %c14_i32_7 = arith.constant 14 : i32
    %28 = vector.broadcast %c14_i32_7 : i32 to vector<1x256xi32>
    %29 = arith.cmpi sle, %2, %28 : vector<1x256xi32>
    %30 = arith.andi %27, %29 : vector<1x256xi1>
    %c0 = arith.constant 0 : index
    %c0_8 = arith.constant 0 : index
    %c0_9 = arith.constant 0 : index
    %31 = vector.load %arg1[%c0, %c0_8, %c0_9] : memref<1x64x256xf32, #tpu.memory_space<vmem>>, vector<1x64x256xf32>
    %32 = vector.shape_cast %31 : vector<1x64x256xf32> to vector<64x256xf32>
    %c0_10 = arith.constant 0 : index
    %c0_11 = arith.constant 0 : index
    %33 = vector.load %arg8[%c0_10, %c0_11] : memref<64x256xf32, #tpu.memory_space<vmem>>, vector<64x256xf32>
    tpu.vector_store %arg8[%c0_10, %c0_11], %32 {strides = array<i32>} : memref<64x256xf32, #tpu.memory_space<vmem>>, vector<64x256xf32>,
    %c0_12 = arith.constant 0 : index
    %c0_13 = arith.constant 0 : index
    %34 = vector.load %arg8[%c0_12, %c0_13] : memref<64x256xf32, #tpu.memory_space<vmem>>, vector<64x256xf32>
    %cst = arith.constant 0.000000e+00 : f32
    %35 = vector.broadcast %cst : f32 to vector<64x256xf32>
    %36 = arith.maximumf %34, %35 : vector<64x256xf32>
    %c17_i32 = arith.constant 17 : i32
    %37 = tpu.dynamic_rotate %36 by %c17_i32 dim 1 : vector<64x256xf32>, i32 -> vector<64x256xf32>
    %cst_14 = arith.constant 0.000000e+00 : f32
    %38 = vector.shape_cast %7 : vector<1x256xi1> to vector<1x256xi1>
    %39 = vector.broadcast %38 : vector<1x256xi1> to vector<64x256xi1>
    %40 = vector.broadcast %cst_14 : f32 to vector<64x256xf32>
    %41 = arith.select %39, %37, %40 : vector<64x256xi1>, vector<64x256xf32>
    %c0_15 = arith.constant 0 : index
    %c0_16 = arith.constant 0 : index
    %42 = vector.load %arg7[%c0_15, %c0_16] : memref<576x256xf32, #tpu.memory_space<vmem>>, vector<64x256xf32>
    tpu.vector_store %arg7[%c0_15, %c0_16], %41 {strides = array<i32>} : memref<576x256xf32, #tpu.memory_space<vmem>>, vector<64x256xf32>,
    %c16_i32_17 = arith.constant 16 : i32
    %43 = tpu.dynamic_rotate %36 by %c16_i32_17 dim 1 : vector<64x256xf32>, i32 -> vector<64x256xf32>
    %cst_18 = arith.constant 0.000000e+00 : f32
    %44 = vector.shape_cast %9 : vector<1x256xi1> to vector<1x256xi1>
    %45 = vector.broadcast %44 : vector<1x256xi1> to vector<64x256xi1>
    %46 = vector.broadcast %cst_18 : f32 to vector<64x256xf32>
    %47 = arith.select %45, %43, %46 : vector<64x256xi1>, vector<64x256xf32>
    %c64 = arith.constant 64 : index
    %c0_19 = arith.constant 0 : index
    %48 = vector.load %arg7[%c64, %c0_19] : memref<576x256xf32, #tpu.memory_space<vmem>>, vector<64x256xf32>
    tpu.vector_store %arg7[%c64, %c0_19], %47 {strides = array<i32>} : memref<576x256xf32, #tpu.memory_space<vmem>>, vector<64x256xf32>,
    %c15_i32_20 = arith.constant 15 : i32
    %49 = tpu.dynamic_rotate %36 by %c15_i32_20 dim 1 : vector<64x256xf32>, i32 -> vector<64x256xf32>
    %cst_21 = arith.constant 0.000000e+00 : f32
    %50 = vector.shape_cast %14 : vector<1x256xi1> to vector<1x256xi1>
    %51 = vector.broadcast %50 : vector<1x256xi1> to vector<64x256xi1>
    %52 = vector.broadcast %cst_21 : f32 to vector<64x256xf32>
    %53 = arith.select %51, %49, %52 : vector<64x256xi1>, vector<64x256xf32>
    %c128 = arith.constant 128 : index
    %c0_22 = arith.constant 0 : index
    %54 = vector.load %arg7[%c128, %c0_22] : memref<576x256xf32, #tpu.memory_space<vmem>>, vector<64x256xf32>
    tpu.vector_store %arg7[%c128, %c0_22], %53 {strides = array<i32>} : memref<576x256xf32, #tpu.memory_space<vmem>>, vector<64x256xf32>,
    %c1_i32_23 = arith.constant 1 : i32
    %55 = tpu.dynamic_rotate %36 by %c1_i32_23 dim 1 : vector<64x256xf32>, i32 -> vector<64x256xf32>
    %cst_24 = arith.constant 0.000000e+00 : f32
    %56 = vector.shape_cast %16 : vector<1x256xi1> to vector<1x256xi1>
    %57 = vector.broadcast %56 : vector<1x256xi1> to vector<64x256xi1>
    %58 = vector.broadcast %cst_24 : f32 to vector<64x256xf32>
    %59 = arith.select %57, %55, %58 : vector<64x256xi1>, vector<64x256xf32>
    %c192 = arith.constant 192 : index
    %c0_25 = arith.constant 0 : index
    %60 = vector.load %arg7[%c192, %c0_25] : memref<576x256xf32, #tpu.memory_space<vmem>>, vector<64x256xf32>
    tpu.vector_store %arg7[%c192, %c0_25], %59 {strides = array<i32>} : memref<576x256xf32, #tpu.memory_space<vmem>>, vector<64x256xf32>,
    %c256 = arith.constant 256 : index
    %c0_26 = arith.constant 0 : index
    %61 = vector.load %arg7[%c256, %c0_26] : memref<576x256xf32, #tpu.memory_space<vmem>>, vector<64x256xf32>
    tpu.vector_store %arg7[%c256, %c0_26], %36 {strides = array<i32>} : memref<576x256xf32, #tpu.memory_space<vmem>>, vector<64x256xf32>,
    %c255_i32 = arith.constant 255 : i32
    %62 = tpu.dynamic_rotate %36 by %c255_i32 dim 1 : vector<64x256xf32>, i32 -> vector<64x256xf32>
    %cst_27 = arith.constant 0.000000e+00 : f32
    %63 = vector.shape_cast %18 : vector<1x256xi1> to vector<1x256xi1>
    %64 = vector.broadcast %63 : vector<1x256xi1> to vector<64x256xi1>
    %65 = vector.broadcast %cst_27 : f32 to vector<64x256xf32>
    %66 = arith.select %64, %62, %65 : vector<64x256xi1>, vector<64x256xf32>
    %c320 = arith.constant 320 : index
    %c0_28 = arith.constant 0 : index
    %67 = vector.load %arg7[%c320, %c0_28] : memref<576x256xf32, #tpu.memory_space<vmem>>, vector<64x256xf32>
    tpu.vector_store %arg7[%c320, %c0_28], %66 {strides = array<i32>} : memref<576x256xf32, #tpu.memory_space<vmem>>, vector<64x256xf32>,
    %c241_i32 = arith.constant 241 : i32
    %68 = tpu.dynamic_rotate %36 by %c241_i32 dim 1 : vector<64x256xf32>, i32 -> vector<64x256xf32>
    %cst_29 = arith.constant 0.000000e+00 : f32
    %69 = vector.shape_cast %23 : vector<1x256xi1> to vector<1x256xi1>
    %70 = vector.broadcast %69 : vector<1x256xi1> to vector<64x256xi1>
    %71 = vector.broadcast %cst_29 : f32 to vector<64x256xf32>
    %72 = arith.select %70, %68, %71 : vector<64x256xi1>, vector<64x256xf32>
    %c384 = arith.constant 384 : index
    %c0_30 = arith.constant 0 : index
    %73 = vector.load %arg7[%c384, %c0_30] : memref<576x256xf32, #tpu.memory_space<vmem>>, vector<64x256xf32>
    tpu.vector_store %arg7[%c384, %c0_30], %72 {strides = array<i32>} : memref<576x256xf32, #tpu.memory_space<vmem>>, vector<64x256xf32>,
    %c240_i32_31 = arith.constant 240 : i32
    %74 = tpu.dynamic_rotate %36 by %c240_i32_31 dim 1 : vector<64x256xf32>, i32 -> vector<64x256xf32>
    %cst_32 = arith.constant 0.000000e+00 : f32
    %75 = vector.shape_cast %25 : vector<1x256xi1> to vector<1x256xi1>
    %76 = vector.broadcast %75 : vector<1x256xi1> to vector<64x256xi1>
    %77 = vector.broadcast %cst_32 : f32 to vector<64x256xf32>
    %78 = arith.select %76, %74, %77 : vector<64x256xi1>, vector<64x256xf32>
    %c448 = arith.constant 448 : index
    %c0_33 = arith.constant 0 : index
    %79 = vector.load %arg7[%c448, %c0_33] : memref<576x256xf32, #tpu.memory_space<vmem>>, vector<64x256xf32>
    tpu.vector_store %arg7[%c448, %c0_33], %78 {strides = array<i32>} : memref<576x256xf32, #tpu.memory_space<vmem>>, vector<64x256xf32>,
    %c239_i32 = arith.constant 239 : i32
    %80 = tpu.dynamic_rotate %36 by %c239_i32 dim 1 : vector<64x256xf32>, i32 -> vector<64x256xf32>
    %cst_34 = arith.constant 0.000000e+00 : f32
    %81 = vector.shape_cast %30 : vector<1x256xi1> to vector<1x256xi1>
    %82 = vector.broadcast %81 : vector<1x256xi1> to vector<64x256xi1>
    %83 = vector.broadcast %cst_34 : f32 to vector<64x256xf32>
    %84 = arith.select %82, %80, %83 : vector<64x256xi1>, vector<64x256xf32>
    %c512 = arith.constant 512 : index
    %c0_35 = arith.constant 0 : index
    %85 = vector.load %arg7[%c512, %c0_35] : memref<576x256xf32, #tpu.memory_space<vmem>>, vector<64x256xf32>
    tpu.vector_store %arg7[%c512, %c0_35], %84 {strides = array<i32>} : memref<576x256xf32, #tpu.memory_space<vmem>>, vector<64x256xf32>,
    %c0_36 = arith.constant 0 : index
    %c0_37 = arith.constant 0 : index
    %c0_38 = arith.constant 0 : index
    %86 = vector.load %arg2[%c0_36, %c0_37, %c0_38] : memref<2x64x576xf32, #tpu.memory_space<vmem>>, vector<1x64x576xf32>
    %87 = vector.shape_cast %86 : vector<1x64x576xf32> to vector<64x576xf32>
    %c0_39 = arith.constant 0 : index
    %c0_40 = arith.constant 0 : index
    %88 = vector.load %arg7[%c0_39, %c0_40] : memref<576x256xf32, #tpu.memory_space<vmem>>, vector<576x256xf32>
    %cst_41 = arith.constant dense<0.000000e+00> : vector<64x256xf32>
    %89 = tpu.matmul %87, %88, %cst_41 {dimension_numbers = #tpu.dot_dimension_numbers<[1], [0], [0], [1], [0, 0, 1, 1], [], []>} : vector<64x576xf32>, vector<576x256xf32>, vector<64x256xf32> -> vector<64x256xf32>
    %c0_42 = arith.constant 0 : index
    %c0_43 = arith.constant 0 : index
    %c0_44 = arith.constant 0 : index
    %90 = vector.load %arg3[%c0_42, %c0_43, %c0_44] : memref<2x64x1xf32, #tpu.memory_space<vmem>>, vector<1x64x1xf32>
    %91 = vector.shape_cast %90 : vector<1x64x1xf32> to vector<64x1xf32>
    %92 = vector.broadcast %91 : vector<64x1xf32> to vector<64x256xf32>
    %93 = arith.addf %89, %92 : vector<64x256xf32>
    %cst_45 = arith.constant 0.000000e+00 : f32
    %94 = vector.broadcast %cst_45 : f32 to vector<64x256xf32>
    %95 = arith.maximumf %93, %94 : vector<64x256xf32>
    %c17_i32_46 = arith.constant 17 : i32
    %96 = tpu.dynamic_rotate %95 by %c17_i32_46 dim 1 : vector<64x256xf32>, i32 -> vector<64x256xf32>
    %cst_47 = arith.constant 0.000000e+00 : f32
    %97 = vector.shape_cast %7 : vector<1x256xi1> to vector<1x256xi1>
    %98 = vector.broadcast %97 : vector<1x256xi1> to vector<64x256xi1>
    %99 = vector.broadcast %cst_47 : f32 to vector<64x256xf32>
    %100 = arith.select %98, %96, %99 : vector<64x256xi1>, vector<64x256xf32>
    %c0_48 = arith.constant 0 : index
    %c0_49 = arith.constant 0 : index
    %101 = vector.load %arg7[%c0_48, %c0_49] : memref<576x256xf32, #tpu.memory_space<vmem>>, vector<64x256xf32>
    tpu.vector_store %arg7[%c0_48, %c0_49], %100 {strides = array<i32>} : memref<576x256xf32, #tpu.memory_space<vmem>>, vector<64x256xf32>,
    %c16_i32_50 = arith.constant 16 : i32
    %102 = tpu.dynamic_rotate %95 by %c16_i32_50 dim 1 : vector<64x256xf32>, i32 -> vector<64x256xf32>
    %cst_51 = arith.constant 0.000000e+00 : f32
    %103 = vector.shape_cast %9 : vector<1x256xi1> to vector<1x256xi1>
    %104 = vector.broadcast %103 : vector<1x256xi1> to vector<64x256xi1>
    %105 = vector.broadcast %cst_51 : f32 to vector<64x256xf32>
    %106 = arith.select %104, %102, %105 : vector<64x256xi1>, vector<64x256xf32>
    %c64_52 = arith.constant 64 : index
    %c0_53 = arith.constant 0 : index
    %107 = vector.load %arg7[%c64_52, %c0_53] : memref<576x256xf32, #tpu.memory_space<vmem>>, vector<64x256xf32>
    tpu.vector_store %arg7[%c64_52, %c0_53], %106 {strides = array<i32>} : memref<576x256xf32, #tpu.memory_space<vmem>>, vector<64x256xf32>,
    %c15_i32_54 = arith.constant 15 : i32
    %108 = tpu.dynamic_rotate %95 by %c15_i32_54 dim 1 : vector<64x256xf32>, i32 -> vector<64x256xf32>
    %cst_55 = arith.constant 0.000000e+00 : f32
    %109 = vector.shape_cast %14 : vector<1x256xi1> to vector<1x256xi1>
    %110 = vector.broadcast %109 : vector<1x256xi1> to vector<64x256xi1>
    %111 = vector.broadcast %cst_55 : f32 to vector<64x256xf32>
    %112 = arith.select %110, %108, %111 : vector<64x256xi1>, vector<64x256xf32>
    %c128_56 = arith.constant 128 : index
    %c0_57 = arith.constant 0 : index
    %113 = vector.load %arg7[%c128_56, %c0_57] : memref<576x256xf32, #tpu.memory_space<vmem>>, vector<64x256xf32>
    tpu.vector_store %arg7[%c128_56, %c0_57], %112 {strides = array<i32>} : memref<576x256xf32, #tpu.memory_space<vmem>>, vector<64x256xf32>,
    %c1_i32_58 = arith.constant 1 : i32
    %114 = tpu.dynamic_rotate %95 by %c1_i32_58 dim 1 : vector<64x256xf32>, i32 -> vector<64x256xf32>
    %cst_59 = arith.constant 0.000000e+00 : f32
    %115 = vector.shape_cast %16 : vector<1x256xi1> to vector<1x256xi1>
    %116 = vector.broadcast %115 : vector<1x256xi1> to vector<64x256xi1>
    %117 = vector.broadcast %cst_59 : f32 to vector<64x256xf32>
    %118 = arith.select %116, %114, %117 : vector<64x256xi1>, vector<64x256xf32>
    %c192_60 = arith.constant 192 : index
    %c0_61 = arith.constant 0 : index
    %119 = vector.load %arg7[%c192_60, %c0_61] : memref<576x256xf32, #tpu.memory_space<vmem>>, vector<64x256xf32>
    tpu.vector_store %arg7[%c192_60, %c0_61], %118 {strides = array<i32>} : memref<576x256xf32, #tpu.memory_space<vmem>>, vector<64x256xf32>,
    %c256_62 = arith.constant 256 : index
    %c0_63 = arith.constant 0 : index
    %120 = vector.load %arg7[%c256_62, %c0_63] : memref<576x256xf32, #tpu.memory_space<vmem>>, vector<64x256xf32>
    tpu.vector_store %arg7[%c256_62, %c0_63], %95 {strides = array<i32>} : memref<576x256xf32, #tpu.memory_space<vmem>>, vector<64x256xf32>,
    %c255_i32_64 = arith.constant 255 : i32
    %121 = tpu.dynamic_rotate %95 by %c255_i32_64 dim 1 : vector<64x256xf32>, i32 -> vector<64x256xf32>
    %cst_65 = arith.constant 0.000000e+00 : f32
    %122 = vector.shape_cast %18 : vector<1x256xi1> to vector<1x256xi1>
    %123 = vector.broadcast %122 : vector<1x256xi1> to vector<64x256xi1>
    %124 = vector.broadcast %cst_65 : f32 to vector<64x256xf32>
    %125 = arith.select %123, %121, %124 : vector<64x256xi1>, vector<64x256xf32>
    %c320_66 = arith.constant 320 : index
    %c0_67 = arith.constant 0 : index
    %126 = vector.load %arg7[%c320_66, %c0_67] : memref<576x256xf32, #tpu.memory_space<vmem>>, vector<64x256xf32>
    tpu.vector_store %arg7[%c320_66, %c0_67], %125 {strides = array<i32>} : memref<576x256xf32, #tpu.memory_space<vmem>>, vector<64x256xf32>,
    %c241_i32_68 = arith.constant 241 : i32
    %127 = tpu.dynamic_rotate %95 by %c241_i32_68 dim 1 : vector<64x256xf32>, i32 -> vector<64x256xf32>
    %cst_69 = arith.constant 0.000000e+00 : f32
    %128 = vector.shape_cast %23 : vector<1x256xi1> to vector<1x256xi1>
    %129 = vector.broadcast %128 : vector<1x256xi1> to vector<64x256xi1>
    %130 = vector.broadcast %cst_69 : f32 to vector<64x256xf32>
    %131 = arith.select %129, %127, %130 : vector<64x256xi1>, vector<64x256xf32>
    %c384_70 = arith.constant 384 : index
    %c0_71 = arith.constant 0 : index
    %132 = vector.load %arg7[%c384_70, %c0_71] : memref<576x256xf32, #tpu.memory_space<vmem>>, vector<64x256xf32>
    tpu.vector_store %arg7[%c384_70, %c0_71], %131 {strides = array<i32>} : memref<576x256xf32, #tpu.memory_space<vmem>>, vector<64x256xf32>,
    %c240_i32_72 = arith.constant 240 : i32
    %133 = tpu.dynamic_rotate %95 by %c240_i32_72 dim 1 : vector<64x256xf32>, i32 -> vector<64x256xf32>
    %cst_73 = arith.constant 0.000000e+00 : f32
    %134 = vector.shape_cast %25 : vector<1x256xi1> to vector<1x256xi1>
    %135 = vector.broadcast %134 : vector<1x256xi1> to vector<64x256xi1>
    %136 = vector.broadcast %cst_73 : f32 to vector<64x256xf32>
    %137 = arith.select %135, %133, %136 : vector<64x256xi1>, vector<64x256xf32>
    %c448_74 = arith.constant 448 : index
    %c0_75 = arith.constant 0 : index
    %138 = vector.load %arg7[%c448_74, %c0_75] : memref<576x256xf32, #tpu.memory_space<vmem>>, vector<64x256xf32>
    tpu.vector_store %arg7[%c448_74, %c0_75], %137 {strides = array<i32>} : memref<576x256xf32, #tpu.memory_space<vmem>>, vector<64x256xf32>,
    %c239_i32_76 = arith.constant 239 : i32
    %139 = tpu.dynamic_rotate %95 by %c239_i32_76 dim 1 : vector<64x256xf32>, i32 -> vector<64x256xf32>
    %cst_77 = arith.constant 0.000000e+00 : f32
    %140 = vector.shape_cast %30 : vector<1x256xi1> to vector<1x256xi1>
    %141 = vector.broadcast %140 : vector<1x256xi1> to vector<64x256xi1>
    %142 = vector.broadcast %cst_77 : f32 to vector<64x256xf32>
    %143 = arith.select %141, %139, %142 : vector<64x256xi1>, vector<64x256xf32>
    %c512_78 = arith.constant 512 : index
    %c0_79 = arith.constant 0 : index
    %144 = vector.load %arg7[%c512_78, %c0_79] : memref<576x256xf32, #tpu.memory_space<vmem>>, vector<64x256xf32>
    tpu.vector_store %arg7[%c512_78, %c0_79], %143 {strides = array<i32>} : memref<576x256xf32, #tpu.memory_space<vmem>>, vector<64x256xf32>,
    %c0_80 = arith.constant 0 : index
    %c0_81 = arith.constant 0 : index
    %145 = vector.load %arg8[%c0_80, %c0_81] : memref<64x256xf32, #tpu.memory_space<vmem>>, vector<64x256xf32>
    %c0_82 = arith.constant 0 : index
    %c0_83 = arith.constant 0 : index
    %c0_84 = arith.constant 0 : index
    %146 = vector.load %arg4[%c0_82, %c0_83, %c0_84] : memref<2x64x576xf32, #tpu.memory_space<vmem>>, vector<1x64x576xf32>
    %147 = vector.shape_cast %146 : vector<1x64x576xf32> to vector<64x576xf32>
    %c0_85 = arith.constant 0 : index
    %c0_86 = arith.constant 0 : index
    %148 = vector.load %arg7[%c0_85, %c0_86] : memref<576x256xf32, #tpu.memory_space<vmem>>, vector<576x256xf32>
    %cst_87 = arith.constant dense<0.000000e+00> : vector<64x256xf32>
    %149 = tpu.matmul %147, %148, %cst_87 {dimension_numbers = #tpu.dot_dimension_numbers<[1], [0], [0], [1], [0, 0, 1, 1], [], []>} : vector<64x576xf32>, vector<576x256xf32>, vector<64x256xf32> -> vector<64x256xf32>
    %c0_88 = arith.constant 0 : index
    %c0_89 = arith.constant 0 : index
    %c0_90 = arith.constant 0 : index
    %150 = vector.load %arg5[%c0_88, %c0_89, %c0_90] : memref<2x64x1xf32, #tpu.memory_space<vmem>>, vector<1x64x1xf32>
    %151 = vector.shape_cast %150 : vector<1x64x1xf32> to vector<64x1xf32>
    %152 = vector.broadcast %151 : vector<64x1xf32> to vector<64x256xf32>
    %153 = arith.addf %149, %152 : vector<64x256xf32>
    %154 = arith.addf %145, %153 : vector<64x256xf32>
    %c0_91 = arith.constant 0 : index
    %c0_92 = arith.constant 0 : index
    %155 = vector.load %arg8[%c0_91, %c0_92] : memref<64x256xf32, #tpu.memory_space<vmem>>, vector<64x256xf32>
    tpu.vector_store %arg8[%c0_91, %c0_92], %154 {strides = array<i32>} : memref<64x256xf32, #tpu.memory_space<vmem>>, vector<64x256xf32>,
    %c0_93 = arith.constant 0 : index
    %c0_94 = arith.constant 0 : index
    %156 = vector.load %arg8[%c0_93, %c0_94] : memref<64x256xf32, #tpu.memory_space<vmem>>, vector<64x256xf32>
    %cst_95 = arith.constant 0.000000e+00 : f32
    %157 = vector.broadcast %cst_95 : f32 to vector<64x256xf32>
    %158 = arith.maximumf %156, %157 : vector<64x256xf32>
    %c17_i32_96 = arith.constant 17 : i32
    %159 = tpu.dynamic_rotate %158 by %c17_i32_96 dim 1 : vector<64x256xf32>, i32 -> vector<64x256xf32>
    %cst_97 = arith.constant 0.000000e+00 : f32
    %160 = vector.shape_cast %7 : vector<1x256xi1> to vector<1x256xi1>
    %161 = vector.broadcast %160 : vector<1x256xi1> to vector<64x256xi1>
    %162 = vector.broadcast %cst_97 : f32 to vector<64x256xf32>
    %163 = arith.select %161, %159, %162 : vector<64x256xi1>, vector<64x256xf32>
    %c0_98 = arith.constant 0 : index
    %c0_99 = arith.constant 0 : index
    %164 = vector.load %arg7[%c0_98, %c0_99] : memref<576x256xf32, #tpu.memory_space<vmem>>, vector<64x256xf32>
    tpu.vector_store %arg7[%c0_98, %c0_99], %163 {strides = array<i32>} : memref<576x256xf32, #tpu.memory_space<vmem>>, vector<64x256xf32>,
    %c16_i32_100 = arith.constant 16 : i32
    %165 = tpu.dynamic_rotate %158 by %c16_i32_100 dim 1 : vector<64x256xf32>, i32 -> vector<64x256xf32>
    %cst_101 = arith.constant 0.000000e+00 : f32
    %166 = vector.shape_cast %9 : vector<1x256xi1> to vector<1x256xi1>
    %167 = vector.broadcast %166 : vector<1x256xi1> to vector<64x256xi1>
    %168 = vector.broadcast %cst_101 : f32 to vector<64x256xf32>
    %169 = arith.select %167, %165, %168 : vector<64x256xi1>, vector<64x256xf32>
    %c64_102 = arith.constant 64 : index
    %c0_103 = arith.constant 0 : index
    %170 = vector.load %arg7[%c64_102, %c0_103] : memref<576x256xf32, #tpu.memory_space<vmem>>, vector<64x256xf32>
    tpu.vector_store %arg7[%c64_102, %c0_103], %169 {strides = array<i32>} : memref<576x256xf32, #tpu.memory_space<vmem>>, vector<64x256xf32>,
    %c15_i32_104 = arith.constant 15 : i32
    %171 = tpu.dynamic_rotate %158 by %c15_i32_104 dim 1 : vector<64x256xf32>, i32 -> vector<64x256xf32>
    %cst_105 = arith.constant 0.000000e+00 : f32
    %172 = vector.shape_cast %14 : vector<1x256xi1> to vector<1x256xi1>
    %173 = vector.broadcast %172 : vector<1x256xi1> to vector<64x256xi1>
    %174 = vector.broadcast %cst_105 : f32 to vector<64x256xf32>
    %175 = arith.select %173, %171, %174 : vector<64x256xi1>, vector<64x256xf32>
    %c128_106 = arith.constant 128 : index
    %c0_107 = arith.constant 0 : index
    %176 = vector.load %arg7[%c128_106, %c0_107] : memref<576x256xf32, #tpu.memory_space<vmem>>, vector<64x256xf32>
    tpu.vector_store %arg7[%c128_106, %c0_107], %175 {strides = array<i32>} : memref<576x256xf32, #tpu.memory_space<vmem>>, vector<64x256xf32>,
    %c1_i32_108 = arith.constant 1 : i32
    %177 = tpu.dynamic_rotate %158 by %c1_i32_108 dim 1 : vector<64x256xf32>, i32 -> vector<64x256xf32>
    %cst_109 = arith.constant 0.000000e+00 : f32
    %178 = vector.shape_cast %16 : vector<1x256xi1> to vector<1x256xi1>
    %179 = vector.broadcast %178 : vector<1x256xi1> to vector<64x256xi1>
    %180 = vector.broadcast %cst_109 : f32 to vector<64x256xf32>
    %181 = arith.select %179, %177, %180 : vector<64x256xi1>, vector<64x256xf32>
    %c192_110 = arith.constant 192 : index
    %c0_111 = arith.constant 0 : index
    %182 = vector.load %arg7[%c192_110, %c0_111] : memref<576x256xf32, #tpu.memory_space<vmem>>, vector<64x256xf32>
    tpu.vector_store %arg7[%c192_110, %c0_111], %181 {strides = array<i32>} : memref<576x256xf32, #tpu.memory_space<vmem>>, vector<64x256xf32>,
    %c256_112 = arith.constant 256 : index
    %c0_113 = arith.constant 0 : index
    %183 = vector.load %arg7[%c256_112, %c0_113] : memref<576x256xf32, #tpu.memory_space<vmem>>, vector<64x256xf32>
    tpu.vector_store %arg7[%c256_112, %c0_113], %158 {strides = array<i32>} : memref<576x256xf32, #tpu.memory_space<vmem>>, vector<64x256xf32>,
    %c255_i32_114 = arith.constant 255 : i32
    %184 = tpu.dynamic_rotate %158 by %c255_i32_114 dim 1 : vector<64x256xf32>, i32 -> vector<64x256xf32>
    %cst_115 = arith.constant 0.000000e+00 : f32
    %185 = vector.shape_cast %18 : vector<1x256xi1> to vector<1x256xi1>
    %186 = vector.broadcast %185 : vector<1x256xi1> to vector<64x256xi1>
    %187 = vector.broadcast %cst_115 : f32 to vector<64x256xf32>
    %188 = arith.select %186, %184, %187 : vector<64x256xi1>, vector<64x256xf32>
    %c320_116 = arith.constant 320 : index
    %c0_117 = arith.constant 0 : index
    %189 = vector.load %arg7[%c320_116, %c0_117] : memref<576x256xf32, #tpu.memory_space<vmem>>, vector<64x256xf32>
    tpu.vector_store %arg7[%c320_116, %c0_117], %188 {strides = array<i32>} : memref<576x256xf32, #tpu.memory_space<vmem>>, vector<64x256xf32>,
    %c241_i32_118 = arith.constant 241 : i32
    %190 = tpu.dynamic_rotate %158 by %c241_i32_118 dim 1 : vector<64x256xf32>, i32 -> vector<64x256xf32>
    %cst_119 = arith.constant 0.000000e+00 : f32
    %191 = vector.shape_cast %23 : vector<1x256xi1> to vector<1x256xi1>
    %192 = vector.broadcast %191 : vector<1x256xi1> to vector<64x256xi1>
    %193 = vector.broadcast %cst_119 : f32 to vector<64x256xf32>
    %194 = arith.select %192, %190, %193 : vector<64x256xi1>, vector<64x256xf32>
    %c384_120 = arith.constant 384 : index
    %c0_121 = arith.constant 0 : index
    %195 = vector.load %arg7[%c384_120, %c0_121] : memref<576x256xf32, #tpu.memory_space<vmem>>, vector<64x256xf32>
    tpu.vector_store %arg7[%c384_120, %c0_121], %194 {strides = array<i32>} : memref<576x256xf32, #tpu.memory_space<vmem>>, vector<64x256xf32>,
    %c240_i32_122 = arith.constant 240 : i32
    %196 = tpu.dynamic_rotate %158 by %c240_i32_122 dim 1 : vector<64x256xf32>, i32 -> vector<64x256xf32>
    %cst_123 = arith.constant 0.000000e+00 : f32
    %197 = vector.shape_cast %25 : vector<1x256xi1> to vector<1x256xi1>
    %198 = vector.broadcast %197 : vector<1x256xi1> to vector<64x256xi1>
    %199 = vector.broadcast %cst_123 : f32 to vector<64x256xf32>
    %200 = arith.select %198, %196, %199 : vector<64x256xi1>, vector<64x256xf32>
    %c448_124 = arith.constant 448 : index
    %c0_125 = arith.constant 0 : index
    %201 = vector.load %arg7[%c448_124, %c0_125] : memref<576x256xf32, #tpu.memory_space<vmem>>, vector<64x256xf32>
    tpu.vector_store %arg7[%c448_124, %c0_125], %200 {strides = array<i32>} : memref<576x256xf32, #tpu.memory_space<vmem>>, vector<64x256xf32>,
    %c239_i32_126 = arith.constant 239 : i32
    %202 = tpu.dynamic_rotate %158 by %c239_i32_126 dim 1 : vector<64x256xf32>, i32 -> vector<64x256xf32>
    %cst_127 = arith.constant 0.000000e+00 : f32
    %203 = vector.shape_cast %30 : vector<1x256xi1> to vector<1x256xi1>
    %204 = vector.broadcast %203 : vector<1x256xi1> to vector<64x256xi1>
    %205 = vector.broadcast %cst_127 : f32 to vector<64x256xf32>
    %206 = arith.select %204, %202, %205 : vector<64x256xi1>, vector<64x256xf32>
    %c512_128 = arith.constant 512 : index
    %c0_129 = arith.constant 0 : index
    %207 = vector.load %arg7[%c512_128, %c0_129] : memref<576x256xf32, #tpu.memory_space<vmem>>, vector<64x256xf32>
    tpu.vector_store %arg7[%c512_128, %c0_129], %206 {strides = array<i32>} : memref<576x256xf32, #tpu.memory_space<vmem>>, vector<64x256xf32>,
    %c1 = arith.constant 1 : index
    %c0_130 = arith.constant 0 : index
    %c0_131 = arith.constant 0 : index
    %208 = vector.load %arg2[%c1, %c0_130, %c0_131] : memref<2x64x576xf32, #tpu.memory_space<vmem>>, vector<1x64x576xf32>
    %209 = vector.shape_cast %208 : vector<1x64x576xf32> to vector<64x576xf32>
    %c0_132 = arith.constant 0 : index
    %c0_133 = arith.constant 0 : index
    %210 = vector.load %arg7[%c0_132, %c0_133] : memref<576x256xf32, #tpu.memory_space<vmem>>, vector<576x256xf32>
    %cst_134 = arith.constant dense<0.000000e+00> : vector<64x256xf32>
    %211 = tpu.matmul %209, %210, %cst_134 {dimension_numbers = #tpu.dot_dimension_numbers<[1], [0], [0], [1], [0, 0, 1, 1], [], []>} : vector<64x576xf32>, vector<576x256xf32>, vector<64x256xf32> -> vector<64x256xf32>
    %c1_135 = arith.constant 1 : index
    %c0_136 = arith.constant 0 : index
    %c0_137 = arith.constant 0 : index
    %212 = vector.load %arg3[%c1_135, %c0_136, %c0_137] : memref<2x64x1xf32, #tpu.memory_space<vmem>>, vector<1x64x1xf32>
    %213 = vector.shape_cast %212 : vector<1x64x1xf32> to vector<64x1xf32>
    %214 = vector.broadcast %213 : vector<64x1xf32> to vector<64x256xf32>
    %215 = arith.addf %211, %214 : vector<64x256xf32>
    %cst_138 = arith.constant 0.000000e+00 : f32
    %216 = vector.broadcast %cst_138 : f32 to vector<64x256xf32>
    %217 = arith.maximumf %215, %216 : vector<64x256xf32>
    %c17_i32_139 = arith.constant 17 : i32
    %218 = tpu.dynamic_rotate %217 by %c17_i32_139 dim 1 : vector<64x256xf32>, i32 -> vector<64x256xf32>
    %cst_140 = arith.constant 0.000000e+00 : f32
    %219 = vector.shape_cast %7 : vector<1x256xi1> to vector<1x256xi1>
    %220 = vector.broadcast %219 : vector<1x256xi1> to vector<64x256xi1>
    %221 = vector.broadcast %cst_140 : f32 to vector<64x256xf32>
    %222 = arith.select %220, %218, %221 : vector<64x256xi1>, vector<64x256xf32>
    %c0_141 = arith.constant 0 : index
    %c0_142 = arith.constant 0 : index
    %223 = vector.load %arg7[%c0_141, %c0_142] : memref<576x256xf32, #tpu.memory_space<vmem>>, vector<64x256xf32>
    tpu.vector_store %arg7[%c0_141, %c0_142], %222 {strides = array<i32>} : memref<576x256xf32, #tpu.memory_space<vmem>>, vector<64x256xf32>,
    %c16_i32_143 = arith.constant 16 : i32
    %224 = tpu.dynamic_rotate %217 by %c16_i32_143 dim 1 : vector<64x256xf32>, i32 -> vector<64x256xf32>
    %cst_144 = arith.constant 0.000000e+00 : f32
    %225 = vector.shape_cast %9 : vector<1x256xi1> to vector<1x256xi1>
    %226 = vector.broadcast %225 : vector<1x256xi1> to vector<64x256xi1>
    %227 = vector.broadcast %cst_144 : f32 to vector<64x256xf32>
    %228 = arith.select %226, %224, %227 : vector<64x256xi1>, vector<64x256xf32>
    %c64_145 = arith.constant 64 : index
    %c0_146 = arith.constant 0 : index
    %229 = vector.load %arg7[%c64_145, %c0_146] : memref<576x256xf32, #tpu.memory_space<vmem>>, vector<64x256xf32>
    tpu.vector_store %arg7[%c64_145, %c0_146], %228 {strides = array<i32>} : memref<576x256xf32, #tpu.memory_space<vmem>>, vector<64x256xf32>,
    %c15_i32_147 = arith.constant 15 : i32
    %230 = tpu.dynamic_rotate %217 by %c15_i32_147 dim 1 : vector<64x256xf32>, i32 -> vector<64x256xf32>
    %cst_148 = arith.constant 0.000000e+00 : f32
    %231 = vector.shape_cast %14 : vector<1x256xi1> to vector<1x256xi1>
    %232 = vector.broadcast %231 : vector<1x256xi1> to vector<64x256xi1>
    %233 = vector.broadcast %cst_148 : f32 to vector<64x256xf32>
    %234 = arith.select %232, %230, %233 : vector<64x256xi1>, vector<64x256xf32>
    %c128_149 = arith.constant 128 : index
    %c0_150 = arith.constant 0 : index
    %235 = vector.load %arg7[%c128_149, %c0_150] : memref<576x256xf32, #tpu.memory_space<vmem>>, vector<64x256xf32>
    tpu.vector_store %arg7[%c128_149, %c0_150], %234 {strides = array<i32>} : memref<576x256xf32, #tpu.memory_space<vmem>>, vector<64x256xf32>,
    %c1_i32_151 = arith.constant 1 : i32
    %236 = tpu.dynamic_rotate %217 by %c1_i32_151 dim 1 : vector<64x256xf32>, i32 -> vector<64x256xf32>
    %cst_152 = arith.constant 0.000000e+00 : f32
    %237 = vector.shape_cast %16 : vector<1x256xi1> to vector<1x256xi1>
    %238 = vector.broadcast %237 : vector<1x256xi1> to vector<64x256xi1>
    %239 = vector.broadcast %cst_152 : f32 to vector<64x256xf32>
    %240 = arith.select %238, %236, %239 : vector<64x256xi1>, vector<64x256xf32>
    %c192_153 = arith.constant 192 : index
    %c0_154 = arith.constant 0 : index
    %241 = vector.load %arg7[%c192_153, %c0_154] : memref<576x256xf32, #tpu.memory_space<vmem>>, vector<64x256xf32>
    tpu.vector_store %arg7[%c192_153, %c0_154], %240 {strides = array<i32>} : memref<576x256xf32, #tpu.memory_space<vmem>>, vector<64x256xf32>,
    %c256_155 = arith.constant 256 : index
    %c0_156 = arith.constant 0 : index
    %242 = vector.load %arg7[%c256_155, %c0_156] : memref<576x256xf32, #tpu.memory_space<vmem>>, vector<64x256xf32>
    tpu.vector_store %arg7[%c256_155, %c0_156], %217 {strides = array<i32>} : memref<576x256xf32, #tpu.memory_space<vmem>>, vector<64x256xf32>,
    %c255_i32_157 = arith.constant 255 : i32
    %243 = tpu.dynamic_rotate %217 by %c255_i32_157 dim 1 : vector<64x256xf32>, i32 -> vector<64x256xf32>
    %cst_158 = arith.constant 0.000000e+00 : f32
    %244 = vector.shape_cast %18 : vector<1x256xi1> to vector<1x256xi1>
    %245 = vector.broadcast %244 : vector<1x256xi1> to vector<64x256xi1>
    %246 = vector.broadcast %cst_158 : f32 to vector<64x256xf32>
    %247 = arith.select %245, %243, %246 : vector<64x256xi1>, vector<64x256xf32>
    %c320_159 = arith.constant 320 : index
    %c0_160 = arith.constant 0 : index
    %248 = vector.load %arg7[%c320_159, %c0_160] : memref<576x256xf32, #tpu.memory_space<vmem>>, vector<64x256xf32>
    tpu.vector_store %arg7[%c320_159, %c0_160], %247 {strides = array<i32>} : memref<576x256xf32, #tpu.memory_space<vmem>>, vector<64x256xf32>,
    %c241_i32_161 = arith.constant 241 : i32
    %249 = tpu.dynamic_rotate %217 by %c241_i32_161 dim 1 : vector<64x256xf32>, i32 -> vector<64x256xf32>
    %cst_162 = arith.constant 0.000000e+00 : f32
    %250 = vector.shape_cast %23 : vector<1x256xi1> to vector<1x256xi1>
    %251 = vector.broadcast %250 : vector<1x256xi1> to vector<64x256xi1>
    %252 = vector.broadcast %cst_162 : f32 to vector<64x256xf32>
    %253 = arith.select %251, %249, %252 : vector<64x256xi1>, vector<64x256xf32>
    %c384_163 = arith.constant 384 : index
    %c0_164 = arith.constant 0 : index
    %254 = vector.load %arg7[%c384_163, %c0_164] : memref<576x256xf32, #tpu.memory_space<vmem>>, vector<64x256xf32>
    tpu.vector_store %arg7[%c384_163, %c0_164], %253 {strides = array<i32>} : memref<576x256xf32, #tpu.memory_space<vmem>>, vector<64x256xf32>,
    %c240_i32_165 = arith.constant 240 : i32
    %255 = tpu.dynamic_rotate %217 by %c240_i32_165 dim 1 : vector<64x256xf32>, i32 -> vector<64x256xf32>
    %cst_166 = arith.constant 0.000000e+00 : f32
    %256 = vector.shape_cast %25 : vector<1x256xi1> to vector<1x256xi1>
    %257 = vector.broadcast %256 : vector<1x256xi1> to vector<64x256xi1>
    %258 = vector.broadcast %cst_166 : f32 to vector<64x256xf32>
    %259 = arith.select %257, %255, %258 : vector<64x256xi1>, vector<64x256xf32>
    %c448_167 = arith.constant 448 : index
    %c0_168 = arith.constant 0 : index
    %260 = vector.load %arg7[%c448_167, %c0_168] : memref<576x256xf32, #tpu.memory_space<vmem>>, vector<64x256xf32>
    tpu.vector_store %arg7[%c448_167, %c0_168], %259 {strides = array<i32>} : memref<576x256xf32, #tpu.memory_space<vmem>>, vector<64x256xf32>,
    %c239_i32_169 = arith.constant 239 : i32
    %261 = tpu.dynamic_rotate %217 by %c239_i32_169 dim 1 : vector<64x256xf32>, i32 -> vector<64x256xf32>
    %cst_170 = arith.constant 0.000000e+00 : f32
    %262 = vector.shape_cast %30 : vector<1x256xi1> to vector<1x256xi1>
    %263 = vector.broadcast %262 : vector<1x256xi1> to vector<64x256xi1>
    %264 = vector.broadcast %cst_170 : f32 to vector<64x256xf32>
    %265 = arith.select %263, %261, %264 : vector<64x256xi1>, vector<64x256xf32>
    %c512_171 = arith.constant 512 : index
    %c0_172 = arith.constant 0 : index
    %266 = vector.load %arg7[%c512_171, %c0_172] : memref<576x256xf32, #tpu.memory_space<vmem>>, vector<64x256xf32>
    tpu.vector_store %arg7[%c512_171, %c0_172], %265 {strides = array<i32>} : memref<576x256xf32, #tpu.memory_space<vmem>>, vector<64x256xf32>,
    %c0_173 = arith.constant 0 : index
    %c0_174 = arith.constant 0 : index
    %267 = vector.load %arg8[%c0_173, %c0_174] : memref<64x256xf32, #tpu.memory_space<vmem>>, vector<64x256xf32>
    %c1_175 = arith.constant 1 : index
    %c0_176 = arith.constant 0 : index
    %c0_177 = arith.constant 0 : index
    %268 = vector.load %arg4[%c1_175, %c0_176, %c0_177] : memref<2x64x576xf32, #tpu.memory_space<vmem>>, vector<1x64x576xf32>
    %269 = vector.shape_cast %268 : vector<1x64x576xf32> to vector<64x576xf32>
    %c0_178 = arith.constant 0 : index
    %c0_179 = arith.constant 0 : index
    %270 = vector.load %arg7[%c0_178, %c0_179] : memref<576x256xf32, #tpu.memory_space<vmem>>, vector<576x256xf32>
    %cst_180 = arith.constant dense<0.000000e+00> : vector<64x256xf32>
    %271 = tpu.matmul %269, %270, %cst_180 {dimension_numbers = #tpu.dot_dimension_numbers<[1], [0], [0], [1], [0, 0, 1, 1], [], []>} : vector<64x576xf32>, vector<576x256xf32>, vector<64x256xf32> -> vector<64x256xf32>
    %c1_181 = arith.constant 1 : index
    %c0_182 = arith.constant 0 : index
    %c0_183 = arith.constant 0 : index
    %272 = vector.load %arg5[%c1_181, %c0_182, %c0_183] : memref<2x64x1xf32, #tpu.memory_space<vmem>>, vector<1x64x1xf32>
    %273 = vector.shape_cast %272 : vector<1x64x1xf32> to vector<64x1xf32>
    %274 = vector.broadcast %273 : vector<64x1xf32> to vector<64x256xf32>
    %275 = arith.addf %271, %274 : vector<64x256xf32>
    %276 = arith.addf %267, %275 : vector<64x256xf32>
    %c0_184 = arith.constant 0 : index
    %c0_185 = arith.constant 0 : index
    %277 = vector.load %arg8[%c0_184, %c0_185] : memref<64x256xf32, #tpu.memory_space<vmem>>, vector<64x256xf32>
    tpu.vector_store %arg8[%c0_184, %c0_185], %276 {strides = array<i32>} : memref<64x256xf32, #tpu.memory_space<vmem>>, vector<64x256xf32>,
    %c0_186 = arith.constant 0 : index
    %c0_187 = arith.constant 0 : index
    %278 = vector.load %arg8[%c0_186, %c0_187] : memref<64x256xf32, #tpu.memory_space<vmem>>, vector<64x256xf32>
    %c0_188 = arith.constant 0 : index
    %c0_189 = arith.constant 0 : index
    %c0_190 = arith.constant 0 : index
    %279 = vector.load %arg6[%c0_188, %c0_189, %c0_190] : memref<1x64x256xf32, #tpu.memory_space<vmem>>, vector<1x64x256xf32>
    %280 = vector.shape_cast %279 : vector<1x64x256xf32> to vector<64x256xf32>
    %281 = vector.shape_cast %278 : vector<64x256xf32> to vector<1x64x256xf32>
    tpu.vector_store %arg6[%c0_188, %c0_189, %c0_190], %281 {strides = array<i32>} : memref<1x64x256xf32, #tpu.memory_space<vmem>>, vector<1x64x256xf32>,
    return
  }
  func.func @transform_0(%arg0: i32) -> (i32, i32, i32) {
    %c0_i32 = arith.constant 0 : i32
    %c0_i32_0 = arith.constant 0 : i32
    %c0_i32_1 = arith.constant 0 : i32
    return %arg0, %c0_i32, %c0_i32_0 : i32, i32, i32
  }
  func.func @transform_1(%arg0: i32) -> (i32, i32, i32) {
    %c0_i32 = arith.constant 0 : i32
    %c0_i32_0 = arith.constant 0 : i32
    %c0_i32_1 = arith.constant 0 : i32
    %c0_i32_2 = arith.constant 0 : i32
    return %c0_i32, %c0_i32_0, %c0_i32_1 : i32, i32, i32
  }
  func.func @transform_2(%arg0: i32) -> (i32, i32, i32) {
    %c0_i32 = arith.constant 0 : i32
    %c0_i32_0 = arith.constant 0 : i32
    %c0_i32_1 = arith.constant 0 : i32
    %c0_i32_2 = arith.constant 0 : i32
    return %c0_i32, %c0_i32_0, %c0_i32_1 : i32, i32, i32
  }
  func.func @transform_3(%arg0: i32) -> (i32, i32, i32) {
    %c0_i32 = arith.constant 0 : i32
    %c0_i32_0 = arith.constant 0 : i32
    %c0_i32_1 = arith.constant 0 : i32
    %c0_i32_2 = arith.constant 0 : i32
    return %c0_i32, %c0_i32_0, %c0_i32_1 : i32, i32, i32
  }
  func.func @transform_4(%arg0: i32) -> (i32, i32, i32) {
    %c0_i32 = arith.constant 0 : i32
    %c0_i32_0 = arith.constant 0 : i32
    %c0_i32_1 = arith.constant 0 : i32
    %c0_i32_2 = arith.constant 0 : i32
    return %c0_i32, %c0_i32_0, %c0_i32_1 : i32, i32, i32
  }
  func.func @transform_5(%arg0: i32) -> (i32, i32, i32) {
    %c0_i32 = arith.constant 0 : i32
    %c0_i32_0 = arith.constant 0 : i32
    %c0_i32_1 = arith.constant 0 : i32
    return %arg0, %c0_i32, %c0_i32_0 : i32, i32, i32
  }
}

</mosaic_0001>

<bundles_post_ra>
// kernel: res_units_forward.1
= control target key start
LH: loop header
LB: loop body
LE: loop exit
PB: predicated region body
PF: predicated region fallthrough
CT: control target
= control target key end

     0   :  { %s8551_s18 = smov 0   ;;  %s11946_s0 = inlined_call_operand.vmem [shape: f32[2,64,256], index: 0, kind: input, shape index: {}]   ;;  %s11947_s1 = inlined_call_operand.vmem [shape: f32[2,64,576], index: 1, kind: input, shape index: {}]   ;;  %s11948_s2 = inlined_call_operand.vmem [shape: f32[2,64,1], index: 2, kind: input, shape index: {}]   ;;  %s11949_s3 = inlined_call_operand.vmem [shape: f32[2,64,576], index: 3, kind: input, shape index: {}]   ;;  %s11950_s4 = inlined_call_operand.vmem [shape: f32[2,64,1], index: 4, kind: input, shape index: {}]   ;;  %s11951_s5 = inlined_call_operand.vmem [shape: f32[2,64,256], index: 5, kind: output, shape index: {}]  }
   0x1 LB: > { %s5606_s19 = sadd.s32 4294967295, %s8509_s18   ;;  %p5610_p0 = scmp.ge.s32.totalorder %s8509_s18, 1  ;;  %s8509_s18 = sphi %s8551_s18, %s15_s18  }
   0x2   : > { %p187_p1 = scmp.lt.s32.totalorder %s8509_s18, 3 }
   0x4   : > { %p188_p2 = pnand %p5610_p0, %p187_p1 }
   0x5   : > { %p215_p3 = scmp.lt.s32.totalorder (!%p188_p2), %s5606_s19, 1  ;;  %s8511_s24 = smov (!%p188_p2), 17   ;;  %v1007_v40 = vld [vmem:[%s11947_s1 + $0x8] sm:$0xff] (!%p188_p2)  ;;  %v225_v44 = vlaneseq (!%p188_p2)  ;;  %v1041_v58 = vld [vmem:[%s11947_s1 + $0x118] sm:$0xff] (!%p188_p2) }
   0x6   : > { %191 = sbr.rel (%p188_p2) target bundleno = 2100 (0x834), region = 40  ;;  %s8512_s25 = smov (!%p188_p2), 16   ;;  %1327 = vmatprep.mubr.f32.mxu0 (!%p188_p2), %v1007_v40 }
   0x7   : > { %s8513_s26 = smov (!%p188_p2), 15   ;;  %s8514_s27 = smov (!%p188_p2), 1   ;;  %v8802_v45 = vand.u32 (!%p188_p2), 127, %v225_v44 }
   0x8   : > { %s8515_s30 = smov (!%p188_p2), 127   ;;  %s8516_s6 = smov (!%p188_p2), 113  }
   0x9   : > { %s8517_s7 = smov (!%p188_p2), 112   ;;  %v8809_v46 = vadd.s32 (!%p188_p2), 128, %v8802_v45  ;;  %s8518_s8 = smov (!%p188_p2), 111   ;;  %v228_v47 = vand.u32 (!%p188_p2), 15, %v8802_v45  ;;  %vm230_vm0 = vcmp.ge.s32.totalorder (!%p188_p2), %v8802_v45, 16  ;;  %vm11957_vm2 = vcmp.lt.s32.totalorder (!%p188_p2), %v8802_v45, 17 }
   0xa   : > { %vm11959_vm7 = vcmp.lt.s32.totalorder (!%p188_p2), %v8802_v45, 16  ;;  %vm8926_vm8 = vmpackc.low (!%p188_p2), %vm230_vm0, %vm230_vm0  ;;  %vm11956_vm9 = vcmp.lt.s32.totalorder (!%p188_p2), %v8802_v45, 15  ;;  %vm11954_vm15 = vcmp.lt.s32.totalorder (!%p188_p2), %v8802_v45, 1 }
   0xb   : > { %v229_v50 = vand.u32 (!%p188_p2), 15, %v8809_v46  ;;  %vm8822_vm1 = vcmp.ge.s32.totalorder (!%p188_p2), %v228_v47, 1  ;;  %vm8959_vm11 = vcmp.le.s32.totalorder (!%p188_p2), %v228_v47, 14 }
   0xc   : > { %vm234_vm4 = vmand (!%p188_p2), %vm230_vm0, %vm8822_vm1 }
   0xd   : > { %s12281_s19 = smov (!%p215_p3, %s5606_s19), 1  ;;  %vm8831_vm3 = vcmp.ge.s32.totalorder %v229_v50, 1  ;;  %vm8862_vm6 = vmpackc.low %vm234_vm4, %vm234_vm4  ;;  %vm8953_vm10 = vcmp.le.s32.totalorder %v229_v50, 14 }
   0xe   : > { %s5745_s20 = sshll.u32 %s12281_s19, 7  ;;  %vm8854_vm5 = vmpackc.low %vm8831_vm3, %vm8831_vm3 }
   0xf   : > { %s8567_s23 = scalar_lea.vmem %s11946_s0, %s5745_s20  ;;  %vm8976_vm12 = vmpackc.low %vm8953_vm10, %vm8953_vm10 }
  0x10   : > { %v8570_v0 = vld [vmem:[%s8567_s23 + $0x20] sm:$0xff]  ;;  %v8573_v1 = vld [vmem:[%s8567_s23 + $0x30] sm:$0xff]  ;;  %v8585_v7 = vld [vmem:[%s8567_s23 + $0x28] sm:$0xff] }
  0x11   : > { %v8576_v2 = vld [vmem:[%s8567_s23] sm:$0xff]  ;;  %v298_v3 = vmax.f32 %v8570_v0, 0.0  ;;  %v300_v4 = vmax.f32 %v8573_v1, 0.0  ;;  %v8581_v5 = vld [vmem:[%s8567_s23 + $0x10] sm:$0xff]  ;;  %v8588_v8 = vld [vmem:[%s8567_s23 + $0x38] sm:$0xff]  ;;  %v299_v10 = vmax.f32 %v8585_v7, 0.0 }
  0x12   : > { %v294_v6 = vmax.f32 %v8576_v2, 0.0  ;;  %v296_v9 = vmax.f32 %v8581_v5, 0.0  ;;  %v301_v11 = vmax.f32 %v8588_v8, 0.0  ;;  %v8594_v12 = vld [vmem:[%s8567_s23 + $0x8] sm:$0xff]  ;;  %v8597_v13 = vld [vmem:[%s8567_s23 + $0x18] sm:$0xff]  ;;  %v8614_v19 = vld [vmem:[%s8567_s23 + $0x40] sm:$0xff] }
  0x13   : > { %v8600_v14 = vld [vmem:[%s8567_s23 + $0x48] sm:$0xff]  ;;  %v8606_v15 = vpack.i.bf16 %v300_v4, %v298_v3  ;;  %v295_v16 = vmax.f32 %v8594_v12, 0.0  ;;  %v297_v17 = vmax.f32 %v8597_v13, 0.0  ;;  %v8611_v18 = vld [vmem:[%s8567_s23 + $0x58] sm:$0xff]  ;;  %v8617_v20 = vld [vmem:[%s8567_s23 + $0x50] sm:$0xff]  ;;  %v302_v26 = vmax.f32 %v8614_v19, 0.0 }
  0x14   : > { %v8623_v21 = vpack.i.bf16 %v296_v9, %v294_v6  ;;  %v8631_v22 = vpack.i.bf16 %v301_v11, %v299_v10  ;;  %v303_v23 = vmax.f32 %v8600_v14, 0.0  ;;  %v305_v24 = vmax.f32 %v8611_v18, 0.0  ;;  %v8642_v28 = vld [vmem:[%s8567_s23 + $0x68] sm:$0xff]  ;;  %v8645_v29 = vld [vmem:[%s8567_s23 + $0x78] sm:$0xff]  ;;  %v8648_v30 = vld [vmem:[%s8567_s23 + $0x60] sm:$0xff] }
  0x15   : > { %7216 = vrot.lane.b32.xlu1 %v8606_v15, %s8511_s24  ;;  %v8637_v25 = vpack.i.bf16 %v297_v17, %v295_v16  ;;  %v304_v27 = vmax.f32 %v8617_v20, 0.0  ;;  %v8651_v31 = vld [vmem:[%s8567_s23 + $0x70] sm:$0xff]  ;;  %v307_v33 = vmax.f32 %v8642_v28, 0.0  ;;  %v309_v34 = vmax.f32 %v8645_v29, 0.0  ;;  %vm238_vm13 = vmand %vm230_vm0, %vm8959_vm11  ;;  %v1017_v18 = vld [vmem:[%s11947_s1 + $0x58] sm:$0xff] }
  0x16   : > { %7206 = vrot.lane.b32.xlu0 %v8623_v21, %s8511_s24  ;;  %v8659_v32 = vpack.i.bf16 %v305_v24, %v303_v23  ;;  %v306_v36 = vmax.f32 %v8648_v30, 0.0  ;;  %v308_v37 = vmax.f32 %v8651_v31, 0.0  ;;  %v8740_v41 = vpack.c.bf16 %v297_v17, %v295_v16  ;;  %vm8996_vm14 = vmpackc.low %vm238_vm13, %vm238_vm13  ;;  %v1197_v28 = vld [vmem:[%s11948_s2 + $0x38] sm:$0xff]  ;;  %v5733_v13 = vld [vmem:[%s11950_s4 + $0x70] sm:$0xff] }
  0x17   : > { %v8669_v35 = vpack.i.bf16 %v304_v27, %v302_v26  ;;  %v8679_v38 = vpack.i.bf16 %v309_v34, %v307_v33  ;;  %v8750_v42 = vpack.c.bf16 %v296_v9, %v294_v6  ;;  %v8756_v43 = vpack.c.bf16 %v301_v11, %v299_v10  ;;  %vm9048_vm0 = vmpackc.low %vm8822_vm1, %vm8822_vm1  ;;  %v5692_v7 = vld [vmem:[%s11949_s3 + $0x168] sm:$0xff] }
  0x18   : > { %v8687_v39 = vpack.i.bf16 %v308_v37, %v306_v36  ;;  %vm11952_vm1 = vcmp.lt.s32.totalorder %v8802_v45, 127  ;;  %v6299_v20 = vpack.c.bf16 %v309_v34, %v307_v33  ;;  %v6301_v34 = vpack.c.bf16 %v308_v37, %v306_v36  ;;  %vm9218_vm4 = vmpackc.low %vm8959_vm11, %vm8959_vm11 }
  0x19   : > { %7221 = vrot.lane.b32.xlu1 %v8631_v22, %s8511_s24  ;;  %vm11953_vm11 = vcmp.lt.s32.totalorder %v8802_v45, 113  ;;  %vm241_vm13 = vcmp.lt.s32.totalorder %v8809_v46, 240 }
  0x1a   : > { %7211 = vrot.lane.b32.xlu0 %v8637_v25, %s8511_s24 }
  0x1d   : > { %7231 = vrot.lane.b32.xlu1 %v8659_v32, %s8511_s24 }
  0x1e   : > { %7226 = vrot.lane.b32.xlu0 %v8669_v35, %s8511_s24 }
  0x21   : > { %7241 = vrot.lane.b32.xlu1 %v8679_v38, %s8511_s24 }
  0x22   : > { %7236 = vrot.lane.b32.xlu0 %v8687_v39, %s8511_s24 }
  0x25   : > { %7251 = vrot.lane.b32.xlu1 %v8637_v25, %s8512_s25 }
  0x26   : > { %7246 = vrot.lane.b32.xlu0 %v8623_v21, %s8512_s25 }
  0x29   : > { %7261 = vrot.lane.b32.xlu1 %v8631_v22, %s8512_s25 }
  0x2a   : > { %7256 = vrot.lane.b32.xlu0 %v8606_v15, %s8512_s25 }
  0x2d   : > { %7271 = vrot.lane.b32.xlu1 %v8659_v32, %s8512_s25 }
  0x2e   : > { %7266 = vrot.lane.b32.xlu0 %v8669_v35, %s8512_s25 }
  0x31   : > { %7281 = vrot.lane.b32.xlu1 %v8679_v38, %s8512_s25 }
  0x32   : > { %7276 = vrot.lane.b32.xlu0 %v8687_v39, %s8512_s25 }
  0x35   : > { %7291 = vrot.lane.b32.xlu1 %v8637_v25, %s8513_s26 }
  0x36   : > { %7286 = vrot.lane.b32.xlu0 %v8623_v21, %s8513_s26 }
  0x39   : > { %7301 = vrot.lane.b32.xlu1 %v8631_v22, %s8513_s26 }
  0x3a   : > { %7296 = vrot.lane.b32.xlu0 %v8606_v15, %s8513_s26 }
  0x3d   : > { %7311 = vrot.lane.b32.xlu1 %v8659_v32, %s8513_s26 }
  0x3e   : > { %7306 = vrot.lane.b32.xlu0 %v8669_v35, %s8513_s26 }
  0x41   : > { %7321 = vrot.lane.b32.xlu1 %v8679_v38, %s8513_s26 }
  0x42   : > { %7316 = vrot.lane.b32.xlu0 %v8687_v39, %s8513_s26 }
  0x45   : > { %7331 = vrot.lane.b32.xlu1 %v8637_v25, %s8514_s27 }
  0x46   : > { %7326 = vrot.lane.b32.xlu0 %v8623_v21, %s8514_s27 }
  0x49   : > { %7341 = vrot.lane.b32.xlu1 %v8631_v22, %s8514_s27 }
  0x4a   : > { %7336 = vrot.lane.b32.xlu0 %v8606_v15, %s8514_s27 }
  0x4d   : > { %7351 = vrot.lane.b32.xlu1 %v8659_v32, %s8514_s27 }
  0x4e   : > { %7346 = vrot.lane.b32.xlu0 %v8669_v35, %s8514_s27 }
  0x51   : > { %7361 = vrot.lane.b32.xlu1 %v8679_v38, %s8514_s27 }
  0x52   : > { %7356 = vrot.lane.b32.xlu0 %v8687_v39, %s8514_s27 }
  0x55   : > { %7371 = vrot.lane.b32.xlu1 %v8637_v25, %s8515_s30 }
  0x56   : > { %7366 = vrot.lane.b32.xlu0 %v8623_v21, %s8515_s30 }
  0x59   : > { %7381 = vrot.lane.b32.xlu1 %v8631_v22, %s8515_s30 }
  0x5a   : > { %7376 = vrot.lane.b32.xlu0 %v8606_v15, %s8515_s30 }
  0x5d   : > { %7391 = vrot.lane.b32.xlu1 %v8659_v32, %s8515_s30 }
  0x5e   : > { %7386 = vrot.lane.b32.xlu0 %v8669_v35, %s8515_s30 }
  0x61   : > { %7401 = vrot.lane.b32.xlu1 %v8679_v38, %s8515_s30 }
  0x62   : > { %7396 = vrot.lane.b32.xlu0 %v8687_v39, %s8515_s30 }
  0x65   : > { %7411 = vrot.lane.b32.xlu1 %v8637_v25, %s8516_s6 }
  0x66   : > { %7406 = vrot.lane.b32.xlu0 %v8623_v21, %s8516_s6 }
  0x69   : > { %7421 = vrot.lane.b32.xlu1 %v8631_v22, %s8516_s6 }
  0x6a   : > { %7416 = vrot.lane.b32.xlu0 %v8606_v15, %s8516_s6 }
  0x6d   : > { %7431 = vrot.lane.b32.xlu1 %v8659_v32, %s8516_s6 }
  0x6e   : > { %7426 = vrot.lane.b32.xlu0 %v8669_v35, %s8516_s6 }
  0x71   : > { %7441 = vrot.lane.b32.xlu1 %v8679_v38, %s8516_s6 }
  0x72   : > { %7436 = vrot.lane.b32.xlu0 %v8687_v39, %s8516_s6 }
  0x75   : > { %7451 = vrot.lane.b32.xlu1 %v8637_v25, %s8517_s7 }
  0x76   : > { %7446 = vrot.lane.b32.xlu0 %v8623_v21, %s8517_s7 }
  0x79   : > { %7461 = vrot.lane.b32.xlu1 %v8631_v22, %s8517_s7 }
  0x7a   : > { %7456 = vrot.lane.b32.xlu0 %v8606_v15, %s8517_s7 }
  0x7d   : > { %7471 = vrot.lane.b32.xlu1 %v8659_v32, %s8517_s7 }
  0x7e   : > { %7466 = vrot.lane.b32.xlu0 %v8669_v35, %s8517_s7 }
  0x81   : > { %7481 = vrot.lane.b32.xlu1 %v8679_v38, %s8517_s7 }
  0x82   : > { %7476 = vrot.lane.b32.xlu0 %v8687_v39, %s8517_s7 }
  0x85   : > { %7491 = vrot.lane.b32.xlu1 %v8637_v25, %s8518_s8 }
  0x86   : > { %7486 = vrot.lane.b32.xlu0 %v8623_v21, %s8518_s8 }
  0x87   : > { %v7217_v48 = vpop.permute.xlu1 %7216 }
  0x88   : > { %v7207_v49 = vpop.permute.xlu0 %7206  ;;  %v7219_v51 = vunpack.i.h.bf16 %v7217_v48  ;;  %v7218_v52 = vunpack.i.l.bf16 %v7217_v48 }
  0x89   : > { %7501 = vrot.lane.b32.xlu1 %v8631_v22, %s8518_s8  ;;  %v7209_v59 = vunpack.i.h.bf16 %v7207_v49  ;;  %v7208_v60 = vunpack.i.l.bf16 %v7207_v49 }
  0x8a   : > { %7496 = vrot.lane.b32.xlu0 %v8606_v15, %s8518_s8 }
  0x8b   : > { %v7222_v54 = vpop.permute.xlu1 %7221 }
  0x8c   : > { %v7224_v55 = vunpack.i.h.bf16 %v7222_v54  ;;  %v7223_v56 = vunpack.i.l.bf16 %v7222_v54  ;;  %v7212_v57 = vpop.permute.xlu0 %7211 }
  0x8d   : > { %v7214_v61 = vunpack.i.h.bf16 %v7212_v57  ;;  %v7213_v62 = vunpack.i.l.bf16 %v7212_v57  ;;  %7511 = vrot.lane.b32.xlu1 %v8659_v32, %s8518_s8 }
  0x8e   : > { %v345_v63 = vsel %vm11957_vm2, %v7218_v52, %v7223_v56  ;;  %v346_v2 = vsel %vm11957_vm2, %v7219_v51, %v7224_v55  ;;  %7506 = vrot.lane.b32.xlu0 %v8669_v35, %s8518_s8  ;;  %v353_v25 = vsel %vm11957_vm2, %v7223_v56, %v7218_v52  ;;  %v354_v32 = vsel %vm11957_vm2, %v7224_v55, %v7219_v51 }
  0x8f   : > { %v343_v5 = vsel %vm11957_vm2, %v7208_v60, %v7213_v62  ;;  %v344_v6 = vsel %vm11957_vm2, %v7209_v59, %v7214_v61  ;;  %v351_v8 = vsel %vm11957_vm2, %v7213_v62, %v7208_v60  ;;  %v352_v9 = vsel %vm11957_vm2, %v7214_v61, %v7209_v59  ;;  %v7232_v10 = vpop.permute.xlu1 %7231 }
  0x90   : > { %v6195_v11 = vpack.c.bf16 %v344_v6, %v343_v5  ;;  %v6198_v12 = vpack.c.bf16 %v352_v9, %v351_v8  ;;  %v7234_v15 = vunpack.i.h.bf16 %v7232_v10  ;;  %v7233_v16 = vunpack.i.l.bf16 %v7232_v10  ;;  %v7227_v17 = vpop.permute.xlu0 %7226 }
  0x91   : > { %v7229_v21 = vunpack.i.h.bf16 %v7227_v17  ;;  %v7228_v22 = vunpack.i.l.bf16 %v7227_v17  ;;  %7521 = vrot.lane.b32.xlu1 %v8679_v38, %s8518_s8  ;;  %v6201_v35 = vpack.c.bf16 %v346_v2, %v345_v63  ;;  %v6204_v55 = vpack.c.bf16 %v354_v32, %v353_v25 }
  0x92   : > { %6197 = vmatprep.subr.msk.bf16.mxu0 %vm8854_vm5, %v6195_v11  ;;  %7516 = vrot.lane.b32.xlu0 %v8687_v39, %s8518_s8 }
  0x93   : > { %6200 = vmatpush1.bf16.msk.msra.mxu0 %vm8862_vm6, %v6198_v12  ;;  %v348_v40 = vsel %vm11957_vm2, %v7229_v21, %v7234_v15  ;;  %v356_v38 = vsel %vm11957_vm2, %v7234_v15, %v7229_v21  ;;  %v347_v44 = vsel %vm11957_vm2, %v7228_v22, %v7233_v16  ;;  %v7242_v48 = vpop.permute.xlu1 %7241  ;;  %v355_v49 = vsel %vm11957_vm2, %v7233_v16, %v7228_v22 }
  0x94   : > { %6203 = vmatprep.subr.msk.bf16.mxu0 %vm8854_vm5, %v6201_v35  ;;  %v7244_v39 = vunpack.i.h.bf16 %v7242_v48  ;;  %v7243_v51 = vunpack.i.l.bf16 %v7242_v48  ;;  %v7237_v52 = vpop.permute.xlu0 %7236  ;;  %v6207_v54 = vpack.c.bf16 %v348_v40, %v347_v44  ;;  %v6210_v62 = vpack.c.bf16 %v356_v38, %v355_v49 }
  0x95   : > { %v7239_v56 = vunpack.i.h.bf16 %v7237_v52  ;;  %v7238_v57 = vunpack.i.l.bf16 %v7237_v52 }
  0x97   : > { %6206 = vmatpush1.bf16.msk.msra.mxu0 %vm8862_vm6, %v6204_v55  ;;  %v350_v59 = vsel %vm11957_vm2, %v7239_v56, %v7244_v39  ;;  %v358_v60 = vsel %vm11957_vm2, %v7244_v39, %v7239_v56  ;;  %v349_v61 = vsel %vm11957_vm2, %v7238_v57, %v7243_v51  ;;  %v7252_v63 = vpop.permute.xlu1 %7251  ;;  %v357_v2 = vsel %vm11957_vm2, %v7243_v51, %v7238_v57 }
  0x98   : > { %6209 = vmatprep.subr.msk.bf16.mxu0 %vm8854_vm5, %v6207_v54  ;;  %v7254_v5 = vunpack.i.h.bf16 %v7252_v63  ;;  %v7253_v6 = vunpack.i.l.bf16 %v7252_v63  ;;  %v7247_v8 = vpop.permute.xlu0 %7246  ;;  %v6213_v9 = vpack.c.bf16 %v350_v59, %v349_v61  ;;  %v6216_v15 = vpack.c.bf16 %v358_v60, %v357_v2 }
  0x99   : > { %v7249_v10 = vunpack.i.h.bf16 %v7247_v8  ;;  %v7248_v11 = vunpack.i.l.bf16 %v7247_v8 }
  0x9b   : > { %6212 = vmatpush1.bf16.msk.msra.mxu0 %vm8862_vm6, %v6210_v62  ;;  %v437_v12 = vsel %vm11959_vm7, %v7254_v5, %v7249_v10  ;;  %v7262_v16 = vpop.permute.xlu1 %7261  ;;  %v428_v17 = vsel %vm11959_vm7, %v7248_v11, %v7253_v6  ;;  %v429_v21 = vsel %vm11959_vm7, %v7249_v10, %v7254_v5  ;;  %v436_v22 = vsel %vm11959_vm7, %v7253_v6, %v7248_v11 }
  0x9c   : > { %6215 = vmatprep.subr.msk.bf16.mxu0 %vm8854_vm5, %v6213_v9  ;;  %v7264_v25 = vunpack.i.h.bf16 %v7262_v16  ;;  %v7263_v32 = vunpack.i.l.bf16 %v7262_v16  ;;  %v7257_v35 = vpop.permute.xlu0 %7256  ;;  %v6219_v40 = vpack.c.bf16 %v429_v21, %v428_v17  ;;  %v6221_v49 = vpack.c.bf16 %v437_v12, %v436_v22 }
  0x9d   : > { %v7259_v38 = vunpack.i.h.bf16 %v7257_v35  ;;  %v7258_v44 = vunpack.i.l.bf16 %v7257_v35 }
  0x9f   : > { %6218 = vmatpush1.bf16.msk.msra.mxu0 %vm8862_vm6, %v6216_v15  ;;  %v439_v48 = vsel %vm11959_vm7, %v7264_v25, %v7259_v38  ;;  %v7272_v39 = vpop.permute.xlu1 %7271  ;;  %v430_v51 = vsel %vm11959_vm7, %v7258_v44, %v7263_v32  ;;  %v431_v52 = vsel %vm11959_vm7, %v7259_v38, %v7264_v25  ;;  %v438_v54 = vsel %vm11959_vm7, %v7263_v32, %v7258_v44 }
  0xa0   : > { %6220 = vmatprep.subr.bf16.mxu0 %v6219_v40  ;;  %v7274_v56 = vunpack.i.h.bf16 %v7272_v39  ;;  %v7273_v57 = vunpack.i.l.bf16 %v7272_v39  ;;  %v7267_v59 = vpop.permute.xlu0 %7266  ;;  %v6224_v60 = vpack.c.bf16 %v431_v52, %v430_v51  ;;  %v6226_v2 = vpack.c.bf16 %v439_v48, %v438_v54  ;;  %v5714_v52 = vld [vmem:[%s11949_s3 + $0x218] sm:$0xff] }
  0xa1   : > { %v7269_v61 = vunpack.i.h.bf16 %v7267_v59  ;;  %v7268_v62 = vunpack.i.l.bf16 %v7267_v59 }
  0xa3   : > { %6223 = vmatpush1.bf16.msk.msra.mxu0 %vm8926_vm8, %v6221_v49  ;;  %v441_v63 = vsel %vm11959_vm7, %v7274_v56, %v7269_v61  ;;  %v7282_v5 = vpop.permute.xlu1 %7281  ;;  %v432_v6 = vsel %vm11959_vm7, %v7268_v62, %v7273_v57  ;;  %v433_v8 = vsel %vm11959_vm7, %v7269_v61, %v7274_v56  ;;  %v440_v9 = vsel %vm11959_vm7, %v7273_v57, %v7268_v62 }
  0xa4   : > { %6225 = vmatprep.subr.bf16.mxu0 %v6224_v60  ;;  %v7284_v10 = vunpack.i.h.bf16 %v7282_v5  ;;  %v7283_v11 = vunpack.i.l.bf16 %v7282_v5  ;;  %v7277_v12 = vpop.permute.xlu0 %7276  ;;  %v6229_v15 = vpack.c.bf16 %v433_v8, %v432_v6  ;;  %v6231_v22 = vpack.c.bf16 %v441_v63, %v440_v9 }
  0xa5   : > { %v7279_v16 = vunpack.i.h.bf16 %v7277_v12  ;;  %v7278_v17 = vunpack.i.l.bf16 %v7277_v12 }
  0xa7   : > { %6228 = vmatpush1.bf16.msk.msra.mxu0 %vm8926_vm8, %v6226_v2  ;;  %v443_v21 = vsel %vm11959_vm7, %v7284_v10, %v7279_v16  ;;  %v7292_v25 = vpop.permute.xlu1 %7291  ;;  %v434_v32 = vsel %vm11959_vm7, %v7278_v17, %v7283_v11  ;;  %v435_v35 = vsel %vm11959_vm7, %v7279_v16, %v7284_v10  ;;  %v442_v40 = vsel %vm11959_vm7, %v7283_v11, %v7278_v17 }
  0xa8   : > { %6230 = vmatprep.subr.bf16.mxu0 %v6229_v15  ;;  %v7294_v38 = vunpack.i.h.bf16 %v7292_v25  ;;  %v7293_v44 = vunpack.i.l.bf16 %v7292_v25  ;;  %v7287_v48 = vpop.permute.xlu0 %7286  ;;  %v6234_v49 = vpack.c.bf16 %v435_v35, %v434_v32  ;;  %v6236_v59 = vpack.c.bf16 %v443_v21, %v442_v40 }
  0xa9   : > { %v7289_v39 = vunpack.i.h.bf16 %v7287_v48  ;;  %v7288_v51 = vunpack.i.l.bf16 %v7287_v48 }
  0xab   : > { %6233 = vmatpush1.bf16.msk.msra.mxu0 %vm8926_vm8, %v6231_v22  ;;  %v514_v56 = vsel %vm11956_vm9, %v7289_v39, %v7294_v38  ;;  %v522_v57 = vsel %vm11956_vm9, %v7294_v38, %v7289_v39  ;;  %v513_v50 = vsel %vm11956_vm9, %v7288_v51, %v7293_v44  ;;  %v7302_v60 = vpop.permute.xlu1 %7301  ;;  %v521_v47 = vsel %vm11956_vm9, %v7293_v44, %v7288_v51 }
  0xac   : > { %6235 = vmatprep.subr.bf16.mxu0 %v6234_v49  ;;  %v7304_v61 = vunpack.i.h.bf16 %v7302_v60  ;;  %v7303_v62 = vunpack.i.l.bf16 %v7302_v60  ;;  %v7297_v63 = vpop.permute.xlu0 %7296  ;;  %v6239_v2 = vpack.c.bf16 %v514_v56, %v513_v50  ;;  %v6242_v12 = vpack.c.bf16 %v522_v57, %v521_v47 }
  0xad   : > { %v7299_v6 = vunpack.i.h.bf16 %v7297_v63  ;;  %v7298_v8 = vunpack.i.l.bf16 %v7297_v63 }
  0xaf   : > { %6238 = vmatpush1.bf16.msk.msra.mxu0 %vm8926_vm8, %v6236_v59  ;;  %v516_v9 = vsel %vm11956_vm9, %v7299_v6, %v7304_v61  ;;  %v524_v10 = vsel %vm11956_vm9, %v7304_v61, %v7299_v6  ;;  %v515_v11 = vsel %vm11956_vm9, %v7298_v8, %v7303_v62  ;;  %v7312_v15 = vpop.permute.xlu1 %7311  ;;  %v523_v16 = vsel %vm11956_vm9, %v7303_v62, %v7298_v8 }
  0xb0   : > { %6241 = vmatprep.subr.msk.bf16.mxu0 %vm8976_vm12, %v6239_v2  ;;  %v7314_v21 = vunpack.i.h.bf16 %v7312_v15  ;;  %v7313_v22 = vunpack.i.l.bf16 %v7312_v15  ;;  %v7307_v25 = vpop.permute.xlu0 %7306  ;;  %v6245_v32 = vpack.c.bf16 %v516_v9, %v515_v11  ;;  %v6248_v49 = vpack.c.bf16 %v524_v10, %v523_v16 }
  0xb1   : > { %v7309_v35 = vunpack.i.h.bf16 %v7307_v25  ;;  %v7308_v40 = vunpack.i.l.bf16 %v7307_v25 }
  0xb3   : > { %6244 = vmatpush1.bf16.msk.msra.mxu0 %vm8996_vm14, %v6242_v12  ;;  %v518_v38 = vsel %vm11956_vm9, %v7309_v35, %v7314_v21  ;;  %v526_v44 = vsel %vm11956_vm9, %v7314_v21, %v7309_v35  ;;  %v517_v48 = vsel %vm11956_vm9, %v7308_v40, %v7313_v22  ;;  %v7322_v39 = vpop.permute.xlu1 %7321  ;;  %v525_v51 = vsel %vm11956_vm9, %v7313_v22, %v7308_v40 }
  0xb4   : > { %6247 = vmatprep.subr.msk.bf16.mxu0 %vm8976_vm12, %v6245_v32  ;;  %v7324_v56 = vunpack.i.h.bf16 %v7322_v39  ;;  %v7323_v57 = vunpack.i.l.bf16 %v7322_v39  ;;  %v7317_v50 = vpop.permute.xlu0 %7316  ;;  %v6251_v59 = vpack.c.bf16 %v518_v38, %v517_v48  ;;  %v6254_v2 = vpack.c.bf16 %v526_v44, %v525_v51 }
  0xb5   : > { %v7319_v60 = vunpack.i.h.bf16 %v7317_v50  ;;  %v7318_v47 = vunpack.i.l.bf16 %v7317_v50 }
  0xb7   : > { %6250 = vmatpush1.bf16.msk.msra.mxu0 %vm8996_vm14, %v6248_v49  ;;  %v520_v61 = vsel %vm11956_vm9, %v7319_v60, %v7324_v56  ;;  %v528_v62 = vsel %vm11956_vm9, %v7324_v56, %v7319_v60  ;;  %v519_v63 = vsel %vm11956_vm9, %v7318_v47, %v7323_v57  ;;  %v7332_v6 = vpop.permute.xlu1 %7331  ;;  %v527_v8 = vsel %vm11956_vm9, %v7323_v57, %v7318_v47 }
  0xb8   : > { %6253 = vmatprep.subr.msk.bf16.mxu0 %vm8976_vm12, %v6251_v59  ;;  %v7334_v9 = vunpack.i.h.bf16 %v7332_v6  ;;  %v7333_v10 = vunpack.i.l.bf16 %v7332_v6  ;;  %v7327_v11 = vpop.permute.xlu0 %7326  ;;  %v6257_v12 = vpack.c.bf16 %v520_v61, %v519_v63  ;;  %v6260_v32 = vpack.c.bf16 %v528_v62, %v527_v8 }
  0xb9   : > { %v7329_v15 = vunpack.i.h.bf16 %v7327_v11  ;;  %v7328_v16 = vunpack.i.l.bf16 %v7327_v11 }
  0xbb   : > { %6256 = vmatpush1.bf16.msk.msra.mxu0 %vm8996_vm14, %v6254_v2  ;;  %v599_v21 = vsel %vm11954_vm15, %v7329_v15, %v7334_v9  ;;  %v607_v22 = vsel %vm11954_vm15, %v7334_v9, %v7329_v15  ;;  %v598_v25 = vsel %vm11954_vm15, %v7328_v16, %v7333_v10  ;;  %v7342_v35 = vpop.permute.xlu1 %7341  ;;  %v606_v40 = vsel %vm11954_vm15, %v7333_v10, %v7328_v16 }
  0xbc   : > { %6259 = vmatprep.subr.msk.bf16.mxu0 %vm8976_vm12, %v6257_v12  ;;  %v7344_v38 = vunpack.i.h.bf16 %v7342_v35  ;;  %v7343_v44 = vunpack.i.l.bf16 %v7342_v35  ;;  %v7337_v48 = vpop.permute.xlu0 %7336  ;;  %v6263_v49 = vpack.c.bf16 %v599_v21, %v598_v25  ;;  %v6266_v59 = vpack.c.bf16 %v607_v22, %v606_v40 }
  0xbd   : > { %v7339_v39 = vunpack.i.h.bf16 %v7337_v48  ;;  %v7338_v51 = vunpack.i.l.bf16 %v7337_v48 }
  0xbf   : > { %6262 = vmatpush1.bf16.msk.msra.mxu0 %vm8996_vm14, %v6260_v32  ;;  %v601_v56 = vsel %vm11954_vm15, %v7339_v39, %v7344_v38  ;;  %v609_v57 = vsel %vm11954_vm15, %v7344_v38, %v7339_v39  ;;  %v600_v50 = vsel %vm11954_vm15, %v7338_v51, %v7343_v44  ;;  %v7352_v60 = vpop.permute.xlu1 %7351  ;;  %v608_v61 = vsel %vm11954_vm15, %v7343_v44, %v7338_v51 }
  0xc0   : > { %6265 = vmatprep.subr.msk.bf16.mxu0 %vm8854_vm5, %v6263_v49  ;;  %v7354_v62 = vunpack.i.h.bf16 %v7352_v60  ;;  %v7353_v63 = vunpack.i.l.bf16 %v7352_v60  ;;  %v7347_v2 = vpop.permute.xlu0 %7346  ;;  %v6269_v6 = vpack.c.bf16 %v601_v56, %v600_v50  ;;  %v6272_v12 = vpack.c.bf16 %v609_v57, %v608_v61  ;;  %v1190_v61 = vld [vmem:[%s11948_s2] sm:$0xff] }
  0xc1   : > { %v7349_v8 = vunpack.i.h.bf16 %v7347_v2  ;;  %v7348_v9 = vunpack.i.l.bf16 %v7347_v2  ;;  %v1191_v2 = vld [vmem:[%s11948_s2 + $0x8] sm:$0xff] }
  0xc3   : > { %6268 = vmatpush1.bf16.msk.msra.mxu0 %vm9048_vm0, %v6266_v59  ;;  %v603_v53 = vsel %vm11954_vm15, %v7349_v8, %v7354_v62  ;;  %v611_v10 = vsel %vm11954_vm15, %v7354_v62, %v7349_v8  ;;  %v602_v11 = vsel %vm11954_vm15, %v7348_v9, %v7353_v63  ;;  %v7362_v15 = vpop.permute.xlu1 %7361  ;;  %v610_v16 = vsel %vm11954_vm15, %v7353_v63, %v7348_v9  ;;  %v1006_v62 = vld [vmem:[%s11947_s1] sm:$0xff]  ;;  %v1012_v9 = vld [vmem:[%s11947_s1 + $0x30] sm:$0xff] }
  0xc4   : > { %6271 = vmatprep.subr.msk.bf16.mxu0 %vm8854_vm5, %v6269_v6  ;;  %v7364_v21 = vunpack.i.h.bf16 %v7362_v15  ;;  %v7363_v22 = vunpack.i.l.bf16 %v7362_v15  ;;  %v7357_v25 = vpop.permute.xlu0 %7356  ;;  %v6275_v32 = vpack.c.bf16 %v603_v53, %v602_v11  ;;  %v6278_v48 = vpack.c.bf16 %v611_v10, %v610_v16  ;;  %v1193_v53 = vld [vmem:[%s11948_s2 + $0x18] sm:$0xff]  ;;  %v1016_v15 = vld [vmem:[%s11947_s1 + $0x50] sm:$0xff]  ;;  %v1194_v16 = vld [vmem:[%s11948_s2 + $0x20] sm:$0xff] }
  0xc5   : > { %v7359_v35 = vunpack.i.h.bf16 %v7357_v25  ;;  %v7358_v40 = vunpack.i.l.bf16 %v7357_v25  ;;  %v8519_v8 = vmov 0   ;;  %v6295_v10 = vpack.c.bf16 %v305_v24, %v303_v23  ;;  %v1195_v23 = vld [vmem:[%s11948_s2 + $0x28] sm:$0xff] }
  0xc6   : > { %7525 = vset.pattern.permute.xlu0 %v8519_v8  ;;  %7526 = vset.pattern.permute.xlu1 %v8519_v8  ;;  %v6297_v24 = vpack.c.bf16 %v304_v27, %v302_v26 }
  0xc7   : > { %6274 = vmatpush1.bf16.msk.msra.mxu0 %vm9048_vm0, %v6272_v12  ;;  %v605_v38 = vsel %vm11954_vm15, %v7359_v35, %v7364_v21  ;;  %v604_v44 = vsel %vm11954_vm15, %v7358_v40, %v7363_v22  ;;  %v9074_v49 = vpop.permute.xlu1 %7371  ;;  %v613_v39 = vsel %vm11954_vm15, %v7364_v21, %v7359_v35  ;;  %v612_v51 = vsel %vm11954_vm15, %v7363_v22, %v7358_v40  ;;  %v1011_v12 = vld [vmem:[%s11947_s1 + $0x28] sm:$0xff]  ;;  %v1022_v35 = vld [vmem:[%s11947_s1 + $0x80] sm:$0xff] }
  0xc8   : > { %6277 = vmatprep.subr.msk.bf16.mxu0 %vm8854_vm5, %v6275_v32  ;;  %v6281_v56 = vpack.c.bf16 %v605_v38, %v604_v44  ;;  %v9082_v57 = vpop.permute.xlu0 %7366  ;;  %v6284_v50 = vpack.c.bf16 %v613_v39, %v612_v51  ;;  %1200 = vperm.xlu0 %7525, %v1190_v61   ;;  %v7374_v0 = vunpack.i.h.bf16 %v9074_v49  ;;  %v7373_v1 = vunpack.i.l.bf16 %v9074_v49  ;;  %v1021_v44 = vld [vmem:[%s11947_s1 + $0x78] sm:$0xff]  ;;  %v1026_v61 = vld [vmem:[%s11947_s1 + $0xa0] sm:$0xff] }
  0xc9   : > { %1205 = vperm.xlu1 %7526, %v1191_v2   ;;  %vm953_vm15 = vcmp.lt.s32.totalorder %v8802_v45, 111 }
  0xcb   : > { %6280 = vmatpush1.bf16.msk.msra.mxu0 %vm9048_vm0, %v6278_v48  ;;  %v9086_v59 = vpop.permute.xlu1 %7381  ;;  %v1196_v48 = vld [vmem:[%s11948_s2 + $0x30] sm:$0xff] }
  0xcc   : > { %6283 = vmatprep.subr.msk.bf16.mxu0 %vm8854_vm5, %v6281_v56  ;;  %v9090_v60 = vpop.permute.xlu0 %7376  ;;  %1215 = vperm.xlu0 %7525, %v1193_v53   ;;  %v7384_v27 = vunpack.i.h.bf16 %v9086_v59  ;;  %v7383_v22 = vunpack.i.l.bf16 %v9086_v59  ;;  %v1027_v56 = vld [vmem:[%s11947_s1 + $0xa8] sm:$0xff] }
  0xcd   : > { %v7379_v25 = vunpack.i.h.bf16 %v9090_v60  ;;  %v7378_v32 = vunpack.i.l.bf16 %v9090_v60 }
  0xcf   : > { %6286 = vmatpush1.bf16.msk.msra.mxu0 %vm9048_vm0, %v6284_v50  ;;  %v9100_v63 = vpop.permute.xlu1 %7391  ;;  %v710_v37 = vsel %vm11952_vm1, %v7384_v27, %v7379_v25  ;;  %v709_v51 = vsel %vm11952_vm1, %v7383_v22, %v7378_v32  ;;  %v702_v50 = vsel %vm11952_vm1, %v7379_v25, %v7384_v27  ;;  %v701_v59 = vsel %vm11952_vm1, %v7378_v32, %v7383_v22  ;;  %v1036_v27 = vld [vmem:[%s11947_s1 + $0xf0] sm:$0xff] }
  0xd0   : > { %6288 = vmatprep.subr.bf16.mxu0 %v8740_v41  ;;  %v9106_v6 = vpop.permute.xlu0 %7386  ;;  %v6293_v41 = vpack.c.bf16 %v300_v4, %v298_v3  ;;  %v7369_v3 = vunpack.i.h.bf16 %v9082_v57  ;;  %v7368_v4 = vunpack.i.l.bf16 %v9082_v57  ;;  %1225 = vperm.xlu0 %7525, %v1195_v23   ;;  %v7394_v49 = vunpack.i.h.bf16 %v9100_v63 }
  0xd1   : > { %v7393_v39 = vunpack.i.l.bf16 %v9100_v63  ;;  %v7389_v30 = vunpack.i.h.bf16 %v9106_v6  ;;  %v7388_v31 = vunpack.i.l.bf16 %v9106_v6  ;;  %v6309_v6 = vpack.c.bf16 %v710_v37, %v709_v51 }
  0xd2   : > { %1328 = vmatmul.mubr.f32.vlgmr.msra.gmra.mrb[0].mxu0 %v1006_v62  ;;  %v708_v21 = vsel %vm11952_vm1, %v7374_v0, %v7369_v3  ;;  %v707_v19 = vsel %vm11952_vm1, %v7373_v1, %v7368_v4  ;;  %v700_v29 = vsel %vm11952_vm1, %v7369_v3, %v7374_v0  ;;  %v699_v33 = vsel %vm11952_vm1, %v7368_v4, %v7373_v1  ;;  %v1031_v3 = vld [vmem:[%s11947_s1 + $0xc8] sm:$0xff] }
  0xd3   : > { %6290 = vmatpush1.bf16.msra.mxu0 %v8750_v42  ;;  %v9123_v11 = vpop.permute.xlu1 %7401  ;;  %v1192_v42 = vld [vmem:[%s11948_s2 + $0x10] sm:$0xff]  ;;  %1333 = vmatprep.mubr.f32.mxu0 %v1012_v9  ;;  %v6303_v40 = vpack.c.bf16 %v708_v21, %v707_v19  ;;  %v6306_v57 = vpack.c.bf16 %v700_v29, %v699_v33  ;;  %v712_v63 = vsel %vm11952_vm1, %v7394_v49, %v7389_v30  ;;  %v1037_v21 = vld [vmem:[%s11947_s1 + $0xf8] sm:$0xff]  ;;  %v5720_v62 = vld [vmem:[%s11949_s3 + $0x248] sm:$0xff] }
  0xd4   : > { %6292 = vmatprep.subr.bf16.mxu0 %v8756_v43  ;;  %v9136_v14 = vpop.permute.xlu0 %7396  ;;  %1210 = vperm.xlu1 %7526, %v1192_v42   ;;  %v711_v2 = vsel %vm11952_vm1, %v7393_v39, %v7388_v31  ;;  %v7404_v54 = vunpack.i.h.bf16 %v9123_v11  ;;  %v7403_v9 = vunpack.i.l.bf16 %v9123_v11  ;;  %v704_v42 = vsel %vm11952_vm1, %v7389_v30, %v7394_v49 }
  0xd5   : > { %1235 = vperm.xlu0 %7525, %v1197_v28   ;;  %v7399_v53 = vunpack.i.h.bf16 %v9136_v14  ;;  %v703_v0 = vsel %vm11952_vm1, %v7388_v31, %v7393_v39  ;;  %v6315_v11 = vpack.c.bf16 %v712_v63, %v711_v2 }
  0xd6   : > { %1334 = vmatmul.mubr.f32.gmra.mrb[2].mxu0 %v1011_v12  ;;  %v6312_v12 = vpack.c.bf16 %v702_v50, %v701_v59 }
  0xd7   : > { %6294 = vmatpush1.bf16.msra.mxu0 %v6293_v41  ;;  %v9149_v43 = vpop.permute.xlu1 %7411  ;;  %1339 = vmatprep.mubr.f32.mxu0 %v1017_v18  ;;  %v7398_v41 = vunpack.i.l.bf16 %v9136_v14  ;;  %v706_v19 = vsel %vm11952_vm1, %v7399_v53, %v7404_v54 }
  0xd8   : > { %6296 = vmatprep.subr.bf16.mxu0 %v6295_v10  ;;  %v9165_v26 = vpop.permute.xlu0 %7406  ;;  %1220 = vperm.xlu1 %7526, %v1194_v16   ;;  %v1032_v10 = vld [vmem:[%s11947_s1 + $0xd0] sm:$0xff]  ;;  %v7414_v4 = vunpack.i.h.bf16 %v9149_v43  ;;  %v7413_v14 = vunpack.i.l.bf16 %v9149_v43  ;;  %v6318_v43 = vpack.c.bf16 %v704_v42, %v703_v0 }
  0xd9   : > { %v7409_v18 = vunpack.i.h.bf16 %v9165_v26  ;;  %v7408_v23 = vunpack.i.l.bf16 %v9165_v26  ;;  %v713_v16 = vsel %vm11952_vm1, %v7403_v9, %v7398_v41 }
  0xda   : > { %1340 = vmatmul.mubr.f32.gmra.mrb[4].mxu0 %v1016_v15  ;;  %v714_v15 = vsel %vm11952_vm1, %v7404_v54, %v7399_v53 }
  0xdb   : > { %6298 = vmatpush1.bf16.msra.mxu0 %v6297_v24  ;;  %v9185_v38 = vpop.permute.xlu1 %7421  ;;  %1345 = vmatprep.mubr.f32.mxu0 %v1022_v35  ;;  %v793_v22 = vsel %vm11953_vm11, %v7414_v4, %v7409_v18  ;;  %v792_v25 = vsel %vm11953_vm11, %v7413_v14, %v7408_v23  ;;  %v6321_v32 = vpack.c.bf16 %v714_v15, %v713_v16 }
  0xdc   : > { %6300 = vmatprep.subr.bf16.mxu0 %v6299_v20  ;;  %v9197_v36 = vpop.permute.xlu0 %7416  ;;  %1230 = vperm.xlu1 %7526, %v1196_v48   ;;  %v705_v20 = vsel %vm11952_vm1, %v7398_v41, %v7403_v9  ;;  %v7424_v28 = vunpack.i.h.bf16 %v9185_v38  ;;  %v7423_v29 = vunpack.i.l.bf16 %v9185_v38  ;;  %vm9295_vm1 = vmand %vm241_vm13, %vm8831_vm3  ;;  %v785_v38 = vsel %vm11953_vm11, %v7409_v18, %v7414_v4 }
  0xdd   : > { %v7419_v33 = vunpack.i.h.bf16 %v9197_v36  ;;  %v6324_v48 = vpack.c.bf16 %v706_v19, %v705_v20  ;;  %v784_v49 = vsel %vm11953_vm11, %v7408_v23, %v7413_v14  ;;  %v6327_v39 = vpack.c.bf16 %v793_v22, %v792_v25  ;;  %vm9325_vm3 = vmpackc.low %vm9295_vm1, %vm9295_vm1 }
  0xde   : > { %1346 = vmatmul.mubr.f32.gmra.mrb[6].mxu0 %v1021_v44  ;;  %vm11955_vm1 = vcmp.lt.s32.totalorder %v8802_v45, 112 }
  0xdf   : > { %6302 = vmatpush1.bf16.msra.mxu0 %v6301_v34  ;;  %v9210_v60 = vpop.permute.xlu1 %7431  ;;  %1351 = vmatprep.mubr.f32.mxu0 %v1027_v56  ;;  %v7418_v34 = vunpack.i.l.bf16 %v9197_v36  ;;  %v787_v63 = vsel %vm11953_vm11, %v7419_v33, %v7424_v28 }
  0xe0   : > { %6305 = vmatprep.subr.msk.bf16.mxu0 %vm8976_vm12, %v6303_v40  ;;  %v9228_v8 = vpop.permute.xlu0 %7426  ;;  %v1042_v40 = vld [vmem:[%s11947_s1 + $0x120] sm:$0xff]  ;;  %v7434_v30 = vunpack.i.h.bf16 %v9210_v60  ;;  %v7433_v31 = vunpack.i.l.bf16 %v9210_v60  ;;  %v1009_v60 = vld [vmem:[%s11947_s1 + $0x18] sm:$0xff] }
  0xe1   : > { %v7429_v36 = vunpack.i.h.bf16 %v9228_v8  ;;  %v7428_v37 = vunpack.i.l.bf16 %v9228_v8  ;;  %v794_v50 = vsel %vm11953_vm11, %v7423_v29, %v7418_v34  ;;  %v786_v2 = vsel %vm11953_vm11, %v7418_v34, %v7423_v29 }
  0xe2   : > { %1352 = vmatmul.mubr.f32.gmra.mrb[8].mxu0 %v1026_v61  ;;  %v6330_v61 = vpack.c.bf16 %v785_v38, %v784_v49  ;;  %v6336_v0 = vpack.c.bf16 %v787_v63, %v786_v2 }
  0xe3   : > { %6308 = vmatpush1.bf16.msk.msra.mxu0 %vm9218_vm4, %v6306_v57  ;;  %v9243_v1 = vpop.permute.xlu1 %7441  ;;  %1357 = vmatprep.mubr.f32.mxu0 %v1032_v10  ;;  %v795_v57 = vsel %vm11953_vm11, %v7424_v28, %v7419_v33  ;;  %v796_v8 = vsel %vm11953_vm11, %v7433_v31, %v7428_v37 }
  0xe4   : > { %6311 = vmatprep.subr.msk.bf16.mxu0 %vm8976_vm12, %v6309_v6  ;;  %v9254_v24 = vpop.permute.xlu0 %7436  ;;  %v797_v6 = vsel %vm11953_vm11, %v7434_v30, %v7429_v36  ;;  %v6333_v54 = vpack.c.bf16 %v795_v57, %v794_v50  ;;  %v7444_v9 = vunpack.i.h.bf16 %v9243_v1  ;;  %v7443_v53 = vunpack.i.l.bf16 %v9243_v1 }
  0xe5   : > { %v7439_v41 = vunpack.i.h.bf16 %v9254_v24  ;;  %v7438_v10 = vunpack.i.l.bf16 %v9254_v24  ;;  %v6339_v4 = vpack.c.bf16 %v797_v6, %v796_v8 }
  0xe6   : > { %1358 = vmatmul.mubr.f32.gmra.mrb[10].mxu0 %v1031_v3  ;;  %v788_v3 = vsel %vm11953_vm11, %v7428_v37, %v7433_v31 }
  0xe7   : > { %6314 = vmatpush1.bf16.msk.msra.mxu0 %vm9218_vm4, %v6312_v12  ;;  %v9271_v26 = vpop.permute.xlu1 %7451  ;;  %1363 = vmatprep.mubr.f32.mxu0 %v1037_v21  ;;  %v799_v24 = vsel %vm11953_vm11, %v7444_v9, %v7439_v41  ;;  %v798_v15 = vsel %vm11953_vm11, %v7443_v53, %v7438_v10  ;;  %v791_v21 = vsel %vm11953_vm11, %v7439_v41, %v7444_v9 }
  0xe8   : > { %6317 = vmatprep.subr.msk.bf16.mxu0 %vm8976_vm12, %v6315_v11  ;;  %v9282_v35 = vpop.permute.xlu0 %7446  ;;  %v789_v11 = vsel %vm11953_vm11, %v7429_v36, %v7434_v30  ;;  %v7454_v1 = vunpack.i.h.bf16 %v9271_v26  ;;  %v7453_v14 = vunpack.i.l.bf16 %v9271_v26  ;;  %v6345_v26 = vpack.c.bf16 %v799_v24, %v798_v15  ;;  %v5689_v36 = vld [vmem:[%s11949_s3 + $0x150] sm:$0xff] }
  0xe9   : > { %v7449_v18 = vunpack.i.h.bf16 %v9282_v35  ;;  %v7448_v23 = vunpack.i.l.bf16 %v9282_v35  ;;  %v6342_v16 = vpack.c.bf16 %v789_v11, %v788_v3 }
  0xea   : > { %1364 = vmatmul.mubr.f32.gmra.mrb[12].mxu0 %v1036_v27 }
  0xeb   : > { %6320 = vmatpush1.bf16.msk.msra.mxu0 %vm9218_vm4, %v6318_v43  ;;  %v9314_v51 = vpop.permute.xlu1 %7461  ;;  %1369 = vmatprep.mubr.f32.mxu0 %v1042_v40  ;;  %v790_v43 = vsel %vm11953_vm11, %v7438_v10, %v7443_v53  ;;  %v878_v19 = vsel %vm11955_vm1, %v7454_v1, %v7449_v18  ;;  %v877_v20 = vsel %vm11955_vm1, %v7453_v14, %v7448_v23  ;;  %vm9396_vm11 = vmpackc.low %vm241_vm13, %vm241_vm13 }
  0xec   : > { %6323 = vmatprep.subr.msk.bf16.mxu0 %vm8976_vm12, %v6321_v32  ;;  %v9316_v56 = vpop.permute.xlu0 %7456  ;;  %v7464_v25 = vunpack.i.h.bf16 %v9314_v51  ;;  %v7463_v32 = vunpack.i.l.bf16 %v9314_v51  ;;  %v6348_v29 = vpack.c.bf16 %v791_v21, %v790_v43  ;;  %v870_v33 = vsel %vm11955_vm1, %v7449_v18, %v7454_v1 }
  0xed   : > { %v7459_v35 = vunpack.i.h.bf16 %v9316_v56  ;;  %v7458_v28 = vunpack.i.l.bf16 %v9316_v56  ;;  %v869_v34 = vsel %vm11955_vm1, %v7448_v23, %v7453_v14  ;;  %v6351_v40 = vpack.c.bf16 %v878_v19, %v877_v20 }
  0xee   : > { %1370 = vmatmul.mubr.f32.gmra.mrb[14].mxu0 %v1041_v58  ;;  %v6354_v51 = vpack.c.bf16 %v870_v33, %v869_v34 }
  0xef   : > { %6326 = vmatpush1.bf16.msk.msra.mxu0 %vm9218_vm4, %v6324_v48  ;;  %1440 = vmatprep.mubr.f32.mxu0 %v1009_v60  ;;  %v7472_v12 = vpop.permute.xlu1 %7471  ;;  %v880_v30 = vsel %vm11955_vm1, %v7464_v25, %v7459_v35  ;;  %v879_v31 = vsel %vm11955_vm1, %v7463_v32, %v7458_v28  ;;  %v872_v37 = vsel %vm11955_vm1, %v7459_v35, %v7464_v25 }
  0xf0   : > { %6329 = vmatprep.subr.msk.bf16.mxu0 %vm9325_vm3, %v6327_v39  ;;  %v7467_v42 = vpop.permute.xlu0 %7466  ;;  %v7474_v44 = vunpack.i.h.bf16 %v7472_v12  ;;  %v7473_v48 = vunpack.i.l.bf16 %v7472_v12  ;;  %v871_v56 = vsel %vm11955_vm1, %v7458_v28, %v7463_v32  ;;  %v6356_v60 = vpack.c.bf16 %v880_v30, %v879_v31 }
  0xf1   : > { %v7469_v38 = vunpack.i.h.bf16 %v7467_v42  ;;  %v7468_v49 = vunpack.i.l.bf16 %v7467_v42  ;;  %v6359_v41 = vpack.c.bf16 %v872_v37, %v871_v56 }
  0xf3   : > { %6332 = vmatpush1.bf16.msk.msra.mxu0 %vm9048_vm0, %v6330_v61  ;;  %v7482_v27 = vpop.permute.xlu1 %7481  ;;  %v882_v57 = vsel %vm11955_vm1, %v7474_v44, %v7469_v38  ;;  %v881_v50 = vsel %vm11955_vm1, %v7473_v48, %v7468_v49  ;;  %v874_v9 = vsel %vm11955_vm1, %v7469_v38, %v7474_v44  ;;  %v873_v53 = vsel %vm11955_vm1, %v7468_v49, %v7473_v48  ;;  %v1008_v38 = vld [vmem:[%s11947_s1 + $0x10] sm:$0xff] }
  0xf4   : > { %6335 = vmatprep.subr.msk.bf16.mxu0 %vm9325_vm3, %v6333_v54  ;;  %v7477_v22 = vpop.permute.xlu0 %7476  ;;  %v7484_v61 = vunpack.i.h.bf16 %v7482_v27  ;;  %v7483_v63 = vunpack.i.l.bf16 %v7482_v27  ;;  %v6361_v10 = vpack.c.bf16 %v882_v57, %v881_v50  ;;  %v6364_v14 = vpack.c.bf16 %v874_v9, %v873_v53  ;;  %v1018_v53 = vld [vmem:[%s11947_s1 + $0x60] sm:$0xff] }
  0xf5   : > { %v7479_v2 = vunpack.i.h.bf16 %v7477_v22  ;;  %v7478_v6 = vunpack.i.l.bf16 %v7477_v22 }
  0xf7   : > { %6338 = vmatpush1.bf16.msk.msra.mxu0 %vm9048_vm0, %v6336_v0  ;;  %v7492_v39 = vpop.permute.xlu1 %7491  ;;  %v884_v3 = vsel %vm11955_vm1, %v7484_v61, %v7479_v2  ;;  %v876_v1 = vsel %vm11955_vm1, %v7479_v2, %v7484_v61  ;;  %v875_v18 = vsel %vm11955_vm1, %v7478_v6, %v7483_v63  ;;  %v1013_v61 = vld [vmem:[%s11947_s1 + $0x38] sm:$0xff] }
  0xf8   : > { %6341 = vmatprep.subr.msk.bf16.mxu0 %vm9325_vm3, %v6339_v4  ;;  %v7487_v58 = vpop.permute.xlu0 %7486  ;;  %v7494_v12 = vunpack.i.h.bf16 %v7492_v39  ;;  %v7493_v42 = vunpack.i.l.bf16 %v7492_v39  ;;  %v883_v4 = vsel %vm11955_vm1, %v7483_v63, %v7478_v6  ;;  %vm245_vm1 = vmand %vm241_vm13, %vm8953_vm10  ;;  %v6369_v25 = vpack.c.bf16 %v876_v1, %v875_v18  ;;  %v1019_v63 = vld [vmem:[%s11947_s1 + $0x68] sm:$0xff]  ;;  %v1028_v1 = vld [vmem:[%s11947_s1 + $0xb0] sm:$0xff] }
  0xf9   : > { %v7489_v0 = vunpack.i.h.bf16 %v7487_v58  ;;  %v7488_v11 = vunpack.i.l.bf16 %v7487_v58  ;;  %v6366_v15 = vpack.c.bf16 %v884_v3, %v883_v4  ;;  %vm9443_vm9 = vmpackc.low %vm245_vm1, %vm245_vm1  ;;  %v1014_v58 = vld [vmem:[%s11947_s1 + $0x40] sm:$0xff]  ;;  %v1029_v4 = vld [vmem:[%s11947_s1 + $0xb8] sm:$0xff]  ;;  %vm11958_vm10 = vcmask 523264  }
  0xfa   : > { %v1033_v18 = vld [vmem:[%s11947_s1 + $0xd8] sm:$0xff]  ;;  %vm11990_vm13 = vcmp.lt.s32.totalorder %v8802_v45, 15 }
  0xfb   : > { %6344 = vmatpush1.bf16.msk.msra.mxu0 %vm9048_vm0, %v6342_v16  ;;  %v7502_v8 = vpop.permute.xlu1 %7501  ;;  %v963_v23 = vsel %vm953_vm15, %v7494_v12, %v7489_v0  ;;  %v962_v24 = vsel %vm953_vm15, %v7493_v42, %v7488_v11  ;;  %v955_v27 = vsel %vm953_vm15, %v7489_v0, %v7494_v12  ;;  %v954_v22 = vsel %vm953_vm15, %v7488_v11, %v7493_v42  ;;  %v1023_v11 = vld [vmem:[%s11947_s1 + $0x88] sm:$0xff]  ;;  %vm11991_vm1 = vmmov %vm11990_vm13 }
  0xfc   : > { %6347 = vmatprep.subr.msk.bf16.mxu0 %vm9325_vm3, %v6345_v26  ;;  %v7497_v54 = vpop.permute.xlu0 %7496  ;;  %v7504_v43 = vunpack.i.h.bf16 %v7502_v8  ;;  %v7503_v19 = vunpack.i.l.bf16 %v7502_v8  ;;  %v6371_v32 = vpack.c.bf16 %v963_v23, %v962_v24  ;;  %v6374_v48 = vpack.c.bf16 %v955_v27, %v954_v22  ;;  %v1039_v23 = vld [vmem:[%s11947_s1 + $0x108] sm:$0xff]  ;;  %v1038_v24 = vld [vmem:[%s11947_s1 + $0x100] sm:$0xff] }
  0xfd   : > { %v7499_v20 = vunpack.i.h.bf16 %v7497_v54  ;;  %v7498_v26 = vunpack.i.l.bf16 %v7497_v54  ;;  %v1030_v27 = vld [vmem:[%s11947_s1 + $0xc0] sm:$0xff]  ;;  %v1035_v22 = vld [vmem:[%s11947_s1 + $0xe8] sm:$0xff] }
  0xff   : > { %6350 = vmatpush1.bf16.msk.msra.mxu0 %vm9048_vm0, %v6348_v29  ;;  %v7512_v16 = vpop.permute.xlu1 %7511  ;;  %v965_v46 = vsel %vm953_vm15, %v7504_v43, %v7499_v20  ;;  %v964_v34 = vsel %vm953_vm15, %v7503_v19, %v7498_v26  ;;  %v957_v49 = vsel %vm953_vm15, %v7499_v20, %v7504_v43  ;;  %v956_v39 = vsel %vm953_vm15, %v7498_v26, %v7503_v19  ;;  %v1010_v43 = vld [vmem:[%s11947_s1 + $0x20] sm:$0xff]  ;;  %v1015_v19 = vld [vmem:[%s11947_s1 + $0x48] sm:$0xff]  ;;  %v1020_v20 = vld [vmem:[%s11947_s1 + $0x70] sm:$0xff] }
 0x100   : > { %6353 = vmatprep.subr.msk.bf16.mxu0 %vm9396_vm11, %v6351_v40  ;;  %v7507_v21 = vpop.permute.xlu0 %7506  ;;  %v7514_v35 = vunpack.i.h.bf16 %v7512_v16  ;;  %v7513_v28 = vunpack.i.l.bf16 %v7512_v16  ;;  %v6377_v30 = vpack.c.bf16 %v965_v46, %v964_v34  ;;  %v1043_v16 = vld [vmem:[%s11947_s1 + $0x128] sm:$0xff]  ;;  %v1025_v26 = vld [vmem:[%s11947_s1 + $0x98] sm:$0xff] }
 0x101   : > { %v7509_v29 = vunpack.i.h.bf16 %v7507_v21  ;;  %v7508_v33 = vunpack.i.l.bf16 %v7507_v21  ;;  %v8520_v21 = vmov 0.0  }
 0x103   : > { %6355 = vmatpush1.bf16.msra.mxu0 %v6354_v51  ;;  %v7522_v40 = vpop.permute.xlu1 %7521  ;;  %v967_v31 = vsel %vm953_vm15, %v7514_v35, %v7509_v29  ;;  %v966_v37 = vsel %vm953_vm15, %v7513_v28, %v7508_v33  ;;  %v959_v2 = vsel %vm953_vm15, %v7509_v29, %v7514_v35  ;;  %v958_v6 = vsel %vm953_vm15, %v7508_v33, %v7513_v28 }
 0x104   : > { %6358 = vmatprep.subr.msk.bf16.mxu0 %vm9396_vm11, %v6356_v60  ;;  %v7517_v44 = vpop.permute.xlu0 %7516  ;;  %v7524_v51 = vunpack.i.h.bf16 %v7522_v40  ;;  %v7523_v56 = vunpack.i.l.bf16 %v7522_v40  ;;  %v6380_v60 = vpack.c.bf16 %v957_v49, %v956_v39  ;;  %v6383_v8 = vpack.c.bf16 %v967_v31, %v966_v37 }
 0x105   : > { %v7519_v57 = vunpack.i.h.bf16 %v7517_v44  ;;  %v7518_v50 = vunpack.i.l.bf16 %v7517_v44 }
 0x107   : > { %6360 = vmatpush1.bf16.msra.mxu0 %v6359_v41  ;;  %v969_v54 = vsel %vm953_vm15, %v7524_v51, %v7519_v57  ;;  %v968_v9 = vsel %vm953_vm15, %v7523_v56, %v7518_v50  ;;  %v6386_v41 = vpack.c.bf16 %v959_v2, %v958_v6  ;;  %v961_v12 = vsel %vm953_vm15, %v7519_v57, %v7524_v51 }
 0x108   : > { %6363 = vmatprep.subr.msk.bf16.mxu0 %vm9396_vm11, %v6361_v10  ;;  %v1024_v10 = vld [vmem:[%s11947_s1 + $0x90] sm:$0xff]  ;;  %v960_v42 = vsel %vm953_vm15, %v7518_v50, %v7523_v56  ;;  %v6389_v0 = vpack.c.bf16 %v969_v54, %v968_v9 }
 0x109   : > { %v6392_v3 = vpack.c.bf16 %v961_v12, %v960_v42 }
 0x10b   : > { %6365 = vmatpush1.bf16.msra.mxu0 %v6364_v14  ;;  %v1034_v14 = vld [vmem:[%s11947_s1 + $0xe0] sm:$0xff] }
 0x10c   : > { %6368 = vmatprep.subr.msk.bf16.mxu0 %vm9396_vm11, %v6366_v15  ;;  %v1044_v15 = vld [vmem:[%s11947_s1 + $0x130] sm:$0xff] }
 0x10f   : > { %6370 = vmatpush1.bf16.msra.mxu0 %v6369_v25  ;;  %v1040_v25 = vld [vmem:[%s11947_s1 + $0x110] sm:$0xff] }
 0x110   : > { %6373 = vmatprep.subr.msk.bf16.mxu0 %vm9443_vm9, %v6371_v32  ;;  %v1045_v32 = vld [vmem:[%s11947_s1 + $0x138] sm:$0xff] }
 0x112   : > { %1441 = vmatmul.mubr.f32.vlgmr.msra.gmra.mrb[0].mxu0 %v1008_v38 }
 0x113   : > { %6376 = vmatpush1.bf16.msk.msra.mxu0 %vm9218_vm4, %v6374_v48  ;;  %1446 = vmatprep.mubr.f32.mxu0 %v1014_v58 }
 0x114   : > { %6379 = vmatprep.subr.msk.bf16.mxu0 %vm9443_vm9, %v6377_v30 }
 0x116   : > { %1447 = vmatmul.mubr.f32.gmra.mrb[2].mxu0 %v1013_v61 }
 0x117   : > { %1452 = vmatprep.mubr.f32.mxu0 %v1019_v63  ;;  %6382 = vmatpush1.bf16.msk.msra.mxu0 %vm9218_vm4, %v6380_v60 }
 0x118   : > { %6385 = vmatprep.subr.msk.bf16.mxu0 %vm9443_vm9, %v6383_v8 }
 0x11a   : > { %1453 = vmatmul.mubr.f32.gmra.mrb[4].mxu0 %v1018_v53 }
 0x11b   : > { %1458 = vmatprep.mubr.f32.mxu0 %v1024_v10  ;;  %6388 = vmatpush1.bf16.msk.msra.mxu0 %vm9218_vm4, %v6386_v41 }
 0x11c   : > { %6391 = vmatprep.subr.msk.bf16.mxu0 %vm9443_vm9, %v6389_v0 }
 0x11e   : > { %1459 = vmatmul.mubr.f32.gmra.mrb[6].mxu0 %v1023_v11 }
 0x11f   : > { %1464 = vmatprep.mubr.f32.mxu0 %v1029_v4  ;;  %6394 = vmatpush1.bf16.msk.msra.mxu0 %vm9218_vm4, %v6392_v3 }
 0x122   : > { %1465 = vmatmul.mubr.f32.gmra.mrb[8].mxu0 %v1028_v1 }
 0x123   : > { %1470 = vmatprep.mubr.f32.mxu0 %v1034_v14 }
 0x126   : > { %1471 = vmatmul.mubr.f32.gmra.mrb[10].mxu0 %v1033_v18 }
 0x127   : > { %1476 = vmatprep.mubr.f32.mxu0 %v1039_v23 }
 0x12a   : > { %1477 = vmatmul.mubr.f32.gmra.mrb[12].mxu0 %v1038_v24 }
 0x12b   : > { %1482 = vmatprep.mubr.f32.mxu0 %v1044_v15 }
 0x12e   : > { %1483 = vmatmul.mubr.f32.gmra.mrb[14].mxu0 %v1043_v16 }
 0x12f   : > { %1553 = vmatprep.mubr.f32.mxu0 %v8520_v21 }
 0x132   : > { %5615 = vmatmul.mubr.msk.f32.vlgmr.msra.gmra.mrb[0].mxu0 %vm11958_vm10, %v1010_v43 }
 0x133   : > { %1559 = vmatprep.mubr.f32.mxu0 %v8520_v21 }
 0x136   : > { %5616 = vmatmul.mubr.msk.f32.gmra.mrb[2].mxu0 %vm11958_vm10, %v1015_v19 }
 0x137   : > { %1565 = vmatprep.mubr.f32.mxu0 %v8520_v21 }
 0x13a   : > { %5617 = vmatmul.mubr.msk.f32.gmra.mrb[4].mxu0 %vm11958_vm10, %v1020_v20 }
 0x13b   : > { %1571 = vmatprep.mubr.f32.mxu0 %v8520_v21 }
 0x13e   : > { %5618 = vmatmul.mubr.msk.f32.gmra.mrb[6].mxu0 %vm11958_vm10, %v1025_v26 }
 0x13f   : > { %1577 = vmatprep.mubr.f32.mxu0 %v8520_v21 }
 0x142   : > { %5619 = vmatmul.mubr.msk.f32.gmra.mrb[8].mxu0 %vm11958_vm10, %v1030_v27 }
 0x143   : > { %1583 = vmatprep.mubr.f32.mxu0 %v8520_v21 }
 0x146   : > { %5620 = vmatmul.mubr.msk.f32.gmra.mrb[10].mxu0 %vm11958_vm10, %v1035_v22 }
 0x147   : > { %1589 = vmatprep.mubr.f32.mxu0 %v8520_v21  ;;  %v1201_v35 = vpop.permute.xlu0 %1200 }
 0x148   : > { %v1206_v33 = vpop.permute.xlu1 %1205 }
 0x14a   : > { %5621 = vmatmul.mubr.msk.f32.gmra.mrb[12].mxu0 %vm11958_vm10, %v1040_v25 }
 0x14b   : > { %1595 = vmatprep.mubr.f32.mxu0 %v8520_v21  ;;  %v1216_v60 = vpop.permute.xlu0 %1215 }
 0x14e   : > { %5622 = vmatmul.mubr.msk.f32.gmra.mrb[14].mxu0 %vm11958_vm10, %v1045_v32  ;;  %vm11993_vm10 = vmmov %vm11991_vm1 }
 0x14f   : > { %v1226_v14 = vpop.permute.xlu0 %1225 }
 0x153   : > { %v1211_v31 = vpop.permute.xlu1 %1210 }
 0x157   : > { %v1221_v3 = vpop.permute.xlu1 %1220 }
 0x205   : > { %v1555_v28 = vpop.f32.mrb[0].mxu0 }
 0x206   : > { %v1557_v29 = vpop.f32.mrb[1].mxu0  ;;  %v6995_v46 = vadd.f32 %v1555_v28, %v1201_v35  ;;  %v1231_v28 = vpop.permute.xlu1 %1230 }
 0x207   : > { %v6996_v34 = vadd.f32 %v1557_v29, %v1201_v35 }
 0x208   : > { %v1602_v49 = vmax.f32 %v6995_v46, 0.0  ;;  %v1236_v46 = vpop.permute.xlu0 %1235 }
 0x209   : > { %v1561_v40 = vpop.f32.mrb[2].mxu0  ;;  %v1603_v58 = vmax.f32 %v6996_v34, 0.0 }
 0x20a   : > { %v6997_v44 = vadd.f32 %v1561_v40, %v1206_v33  ;;  %v1563_v48 = vpop.f32.mrb[3].mxu0 }
 0x20b   : > { %v6998_v38 = vadd.f32 %v1563_v48, %v1206_v33 }
 0x20c   : > { %v1604_v39 = vmax.f32 %v6997_v44, 0.0 }
 0x20d   : > { %v1605_v30 = vmax.f32 %v6998_v38, 0.0  ;;  %v1567_v37 = vpop.f32.mrb[4].mxu0 }
 0x20e   : > { %v1569_v51 = vpop.f32.mrb[5].mxu0  ;;  %v9572_v56 = vpack.i.bf16 %v1604_v39, %v1602_v49  ;;  %v6999_v50 = vadd.f32 %v1567_v37, %v1211_v31  ;;  %v9582_v9 = vpack.c.bf16 %v1604_v39, %v1602_v49 }
 0x20f   : > { %v9574_v57 = vpack.i.bf16 %v1605_v30, %v1603_v58  ;;  %v7000_v61 = vadd.f32 %v1569_v51, %v1211_v31  ;;  %v9580_v54 = vpack.c.bf16 %v1605_v30, %v1603_v58 }
 0x210   : > { %7528 = vrot.lane.b32.xlu1 %v9572_v56, %s8511_s24  ;;  %v1606_v53 = vmax.f32 %v6999_v50, 0.0 }
 0x211   : > { %v1573_v63 = vpop.f32.mrb[6].mxu0  ;;  %7533 = vrot.lane.b32.xlu0 %v9574_v57, %s8511_s24  ;;  %v1607_v10 = vmax.f32 %v7000_v61, 0.0 }
 0x212   : > { %v7001_v2 = vadd.f32 %v1573_v63, %v1216_v60  ;;  %v1575_v6 = vpop.f32.mrb[7].mxu0  ;;  %v2291_v63 = vld [vmem:[%s11949_s3 + $0x8] sm:$0xff] }
 0x213   : > { %v7002_v8 = vadd.f32 %v1575_v6, %v1216_v60  ;;  %2610 = vmatprep.mubr.f32.mxu1 %v2291_v63 }
 0x214   : > { %v1608_v41 = vmax.f32 %v7001_v2, 0.0 }
 0x215   : > { %v1609_v12 = vmax.f32 %v7002_v8, 0.0  ;;  %v1579_v42 = vpop.f32.mrb[8].mxu0 }
 0x216   : > { %v1581_v0 = vpop.f32.mrb[9].mxu0  ;;  %v9584_v11 = vpack.i.bf16 %v1608_v41, %v1606_v53  ;;  %v7003_v1 = vadd.f32 %v1579_v42, %v1221_v3  ;;  %v9594_v19 = vpack.c.bf16 %v1608_v41, %v1606_v53 }
 0x217   : > { %v9586_v4 = vpack.i.bf16 %v1609_v12, %v1607_v10  ;;  %v7004_v18 = vadd.f32 %v1581_v0, %v1221_v3  ;;  %v9592_v43 = vpack.c.bf16 %v1609_v12, %v1607_v10 }
 0x218   : > { %7538 = vrot.lane.b32.xlu1 %v9584_v11, %s8511_s24  ;;  %v1610_v20 = vmax.f32 %v7003_v1, 0.0 }
 0x219   : > { %v1585_v23 = vpop.f32.mrb[10].mxu0  ;;  %7543 = vrot.lane.b32.xlu0 %v9586_v4, %s8511_s24  ;;  %v1611_v27 = vmax.f32 %v7004_v18, 0.0 }
 0x21a   : > { %v7005_v24 = vadd.f32 %v1585_v23, %v1226_v14  ;;  %v1587_v15 = vpop.f32.mrb[11].mxu0 }
 0x21b   : > { %v7006_v16 = vadd.f32 %v1587_v15, %v1226_v14 }
 0x21c   : > { %v1612_v26 = vmax.f32 %v7005_v24, 0.0 }
 0x21d   : > { %v1613_v22 = vmax.f32 %v7006_v16, 0.0  ;;  %v1591_v25 = vpop.f32.mrb[12].mxu0 }
 0x21e   : > { %v1593_v32 = vpop.f32.mrb[13].mxu0  ;;  %v9596_v35 = vpack.i.bf16 %v1612_v26, %v1610_v20  ;;  %v7007_v33 = vadd.f32 %v1591_v25, %v1231_v28  ;;  %v9606_v39 = vpack.c.bf16 %v1612_v26, %v1610_v20 }
 0x21f   : > { %v9598_v29 = vpack.i.bf16 %v1613_v22, %v1611_v27  ;;  %v7008_v34 = vadd.f32 %v1593_v32, %v1231_v28  ;;  %v9604_v49 = vpack.c.bf16 %v1613_v22, %v1611_v27 }
 0x220   : > { %7548 = vrot.lane.b32.xlu1 %v9596_v35, %s8511_s24  ;;  %v1614_v58 = vmax.f32 %v7007_v33, 0.0 }
 0x221   : > { %v1597_v40 = vpop.f32.mrb[14].mxu0  ;;  %7553 = vrot.lane.b32.xlu0 %v9598_v29, %s8511_s24  ;;  %v1615_v31 = vmax.f32 %v7008_v34, 0.0 }
 0x222   : > { %v7009_v44 = vadd.f32 %v1597_v40, %v1236_v46  ;;  %v1599_v48 = vpop.f32.mrb[15].mxu0 }
 0x223   : > { %v7010_v38 = vadd.f32 %v1599_v48, %v1236_v46 }
 0x224   : > { %v1616_v30 = vmax.f32 %v7009_v44, 0.0 }
 0x225   : > { %v1617_v37 = vmax.f32 %v7010_v38, 0.0 }
 0x226   : > { %v9608_v51 = vpack.i.bf16 %v1616_v30, %v1614_v58  ;;  %v9618_v61 = vpack.c.bf16 %v1616_v30, %v1614_v58  ;;  %v2475_v30 = vld [vmem:[%s11950_s4 + $0x8] sm:$0xff] }
 0x227   : > { %v9610_v50 = vpack.i.bf16 %v1617_v37, %v1615_v31  ;;  %v9616_v60 = vpack.c.bf16 %v1617_v37, %v1615_v31 }
 0x228   : > { %7558 = vrot.lane.b32.xlu1 %v9608_v51, %s8511_s24 }
 0x229   : > { %7568 = vrot.lane.b32.xlu0 %v9610_v50, %s8511_s24 }
 0x22c   : > { %7563 = vrot.lane.b32.xlu1 %v9572_v56, %s8512_s25 }
 0x22d   : > { %7573 = vrot.lane.b32.xlu0 %v9574_v57, %s8512_s25 }
 0x230   : > { %7578 = vrot.lane.b32.xlu1 %v9584_v11, %s8512_s25 }
 0x231   : > { %7583 = vrot.lane.b32.xlu0 %v9586_v4, %s8512_s25 }
 0x234   : > { %7588 = vrot.lane.b32.xlu1 %v9596_v35, %s8512_s25 }
 0x235   : > { %7593 = vrot.lane.b32.xlu0 %v9598_v29, %s8512_s25 }
 0x238   : > { %7598 = vrot.lane.b32.xlu1 %v9608_v51, %s8512_s25 }
 0x239   : > { %7608 = vrot.lane.b32.xlu0 %v9610_v50, %s8512_s25 }
 0x23c   : > { %7603 = vrot.lane.b32.xlu1 %v9572_v56, %s8513_s26 }
 0x23d   : > { %7613 = vrot.lane.b32.xlu0 %v9574_v57, %s8513_s26 }
 0x240   : > { %7618 = vrot.lane.b32.xlu1 %v9584_v11, %s8513_s26 }
 0x241   : > { %7623 = vrot.lane.b32.xlu0 %v9586_v4, %s8513_s26 }
 0x244   : > { %7628 = vrot.lane.b32.xlu1 %v9596_v35, %s8513_s26 }
 0x245   : > { %7633 = vrot.lane.b32.xlu0 %v9598_v29, %s8513_s26 }
 0x248   : > { %7638 = vrot.lane.b32.xlu1 %v9608_v51, %s8513_s26 }
 0x249   : > { %7648 = vrot.lane.b32.xlu0 %v9610_v50, %s8513_s26 }
 0x24c   : > { %7643 = vrot.lane.b32.xlu1 %v9572_v56, %s8514_s27 }
 0x24d   : > { %7653 = vrot.lane.b32.xlu0 %v9574_v57, %s8514_s27 }
 0x250   : > { %7658 = vrot.lane.b32.xlu1 %v9584_v11, %s8514_s27 }
 0x251   : > { %7663 = vrot.lane.b32.xlu0 %v9586_v4, %s8514_s27 }
 0x254   : > { %7668 = vrot.lane.b32.xlu1 %v9596_v35, %s8514_s27 }
 0x255   : > { %7673 = vrot.lane.b32.xlu0 %v9598_v29, %s8514_s27 }
 0x258   : > { %7678 = vrot.lane.b32.xlu1 %v9608_v51, %s8514_s27 }
 0x259   : > { %7683 = vrot.lane.b32.xlu0 %v9610_v50, %s8514_s27 }
 0x25c   : > { %7688 = vrot.lane.b32.xlu1 %v9572_v56, %s8515_s30 }
 0x25d   : > { %7693 = vrot.lane.b32.xlu0 %v9574_v57, %s8515_s30 }
 0x260   : > { %7698 = vrot.lane.b32.xlu1 %v9584_v11, %s8515_s30 }
 0x261   : > { %7703 = vrot.lane.b32.xlu0 %v9586_v4, %s8515_s30 }
 0x264   : > { %7708 = vrot.lane.b32.xlu1 %v9596_v35, %s8515_s30 }
 0x265   : > { %7713 = vrot.lane.b32.xlu0 %v9598_v29, %s8515_s30 }
 0x268   : > { %7718 = vrot.lane.b32.xlu1 %v9608_v51, %s8515_s30 }
 0x269   : > { %7728 = vrot.lane.b32.xlu0 %v9610_v50, %s8515_s30 }
 0x26c   : > { %7723 = vrot.lane.b32.xlu1 %v9572_v56, %s8516_s6 }
 0x26d   : > { %7733 = vrot.lane.b32.xlu0 %v9574_v57, %s8516_s6 }
 0x270   : > { %7738 = vrot.lane.b32.xlu1 %v9584_v11, %s8516_s6 }
 0x271   : > { %7743 = vrot.lane.b32.xlu0 %v9586_v4, %s8516_s6 }
 0x274   : > { %7748 = vrot.lane.b32.xlu1 %v9596_v35, %s8516_s6 }
 0x275   : > { %7753 = vrot.lane.b32.xlu0 %v9598_v29, %s8516_s6 }
 0x278   : > { %7758 = vrot.lane.b32.xlu1 %v9608_v51, %s8516_s6 }
 0x279   : > { %7768 = vrot.lane.b32.xlu0 %v9610_v50, %s8516_s6 }
 0x27c   : > { %7763 = vrot.lane.b32.xlu1 %v9572_v56, %s8517_s7 }
 0x27d   : > { %7773 = vrot.lane.b32.xlu0 %v9574_v57, %s8517_s7 }
 0x280   : > { %7778 = vrot.lane.b32.xlu1 %v9584_v11, %s8517_s7 }
 0x281   : > { %7783 = vrot.lane.b32.xlu0 %v9586_v4, %s8517_s7 }
 0x282   : > { %v7529_v2 = vpop.permute.xlu1 %7528 }
 0x283   : > { %v7531_v6 = vunpack.i.h.bf16 %v7529_v2  ;;  %v7530_v8 = vunpack.i.l.bf16 %v7529_v2  ;;  %v7534_v53 = vpop.permute.xlu0 %7533  ;;  %v2476_v2 = vld [vmem:[%s11950_s4 + $0x10] sm:$0xff] }
 0x284   : > { %v7536_v41 = vunpack.i.h.bf16 %v7534_v53  ;;  %v7535_v10 = vunpack.i.l.bf16 %v7534_v53  ;;  %7788 = vrot.lane.b32.xlu1 %v9596_v35, %s8517_s7 }
 0x285   : > { %7793 = vrot.lane.b32.xlu0 %v9598_v29, %s8517_s7 }
 0x286   : > { %v1650_v12 = vsel %vm11957_vm2, %v7530_v8, %v7535_v10  ;;  %v1651_v42 = vsel %vm11957_vm2, %v7531_v6, %v7536_v41  ;;  %v1658_v0 = vsel %vm11957_vm2, %v7535_v10, %v7530_v8  ;;  %v1659_v3 = vsel %vm11957_vm2, %v7536_v41, %v7531_v6 }
 0x287   : > { %v6395_v1 = vpack.c.bf16 %v1651_v42, %v1650_v12  ;;  %v6398_v14 = vpack.c.bf16 %v1659_v3, %v1658_v0  ;;  %v2477_v12 = vld [vmem:[%s11950_s4 + $0x18] sm:$0xff] }
 0x288   : > { %7798 = vrot.lane.b32.xlu1 %v9608_v51, %s8517_s7 }
 0x289   : > { %7803 = vrot.lane.b32.xlu0 %v9610_v50, %s8517_s7  ;;  %6397 = vmatprep.subr.msk.bf16.mxu1 %vm8854_vm5, %v6395_v1 }
 0x28a   : > { %v7539_v18 = vpop.permute.xlu1 %7538  ;;  %6400 = vmatpush1.bf16.msk.msra.mxu1 %vm8862_vm6, %v6398_v14 }
 0x28b   : > { %v7541_v23 = vunpack.i.h.bf16 %v7539_v18  ;;  %v7540_v24 = vunpack.i.l.bf16 %v7539_v18  ;;  %v7544_v15 = vpop.permute.xlu0 %7543 }
 0x28c   : > { %v7546_v16 = vunpack.i.h.bf16 %v7544_v15  ;;  %v7545_v20 = vunpack.i.l.bf16 %v7544_v15  ;;  %7808 = vrot.lane.b32.xlu1 %v9572_v56, %s8518_s8 }
 0x28d   : > { %7813 = vrot.lane.b32.xlu0 %v9574_v57, %s8518_s8 }
 0x28e   : > { %v1652_v26 = vsel %vm11957_vm2, %v7540_v24, %v7545_v20  ;;  %v1653_v27 = vsel %vm11957_vm2, %v7541_v23, %v7546_v16  ;;  %v1660_v22 = vsel %vm11957_vm2, %v7545_v20, %v7540_v24  ;;  %v1661_v25 = vsel %vm11957_vm2, %v7546_v16, %v7541_v23  ;;  %v2478_v24 = vld [vmem:[%s11950_s4 + $0x20] sm:$0xff] }
 0x28f   : > { %v6401_v32 = vpack.c.bf16 %v1653_v27, %v1652_v26  ;;  %v6404_v28 = vpack.c.bf16 %v1661_v25, %v1660_v22  ;;  %v2479_v26 = vld [vmem:[%s11950_s4 + $0x28] sm:$0xff] }
 0x290   : > { %7818 = vrot.lane.b32.xlu1 %v9584_v11, %s8518_s8 }
 0x291   : > { %7823 = vrot.lane.b32.xlu0 %v9586_v4, %s8518_s8  ;;  %6403 = vmatprep.subr.msk.bf16.mxu1 %vm8854_vm5, %v6401_v32 }
 0x292   : > { %v7549_v56 = vpop.permute.xlu1 %7548  ;;  %6406 = vmatpush1.bf16.msk.msra.mxu1 %vm8862_vm6, %v6404_v28 }
 0x293   : > { %v7551_v57 = vunpack.i.h.bf16 %v7549_v56  ;;  %v7550_v33 = vunpack.i.l.bf16 %v7549_v56  ;;  %v7554_v46 = vpop.permute.xlu0 %7553 }
 0x294   : > { %v7556_v34 = vunpack.i.h.bf16 %v7554_v46  ;;  %v7555_v40 = vunpack.i.l.bf16 %v7554_v46  ;;  %7828 = vrot.lane.b32.xlu1 %v9596_v35, %s8518_s8  ;;  %v2474_v35 = vld [vmem:[%s11950_s4] sm:$0xff] }
 0x295   : > { %7833 = vrot.lane.b32.xlu0 %v9598_v29, %s8518_s8 }
 0x296   : > { %v1654_v11 = vsel %vm11957_vm2, %v7550_v33, %v7555_v40  ;;  %v1655_v4 = vsel %vm11957_vm2, %v7551_v57, %v7556_v34  ;;  %v1662_v44 = vsel %vm11957_vm2, %v7555_v40, %v7550_v33  ;;  %v1663_v48 = vsel %vm11957_vm2, %v7556_v34, %v7551_v57  ;;  %v2480_v34 = vld [vmem:[%s11950_s4 + $0x30] sm:$0xff] }
 0x297   : > { %v6407_v38 = vpack.c.bf16 %v1655_v4, %v1654_v11  ;;  %v6410_v58 = vpack.c.bf16 %v1663_v48, %v1662_v44  ;;  %v2481_v44 = vld [vmem:[%s11950_s4 + $0x38] sm:$0xff] }
 0x298   : > { %7838 = vrot.lane.b32.xlu1 %v9608_v51, %s8518_s8 }
 0x299   : > { %7843 = vrot.lane.b32.xlu0 %v9610_v50, %s8518_s8  ;;  %6409 = vmatprep.subr.msk.bf16.mxu1 %vm8854_vm5, %v6407_v38 }
 0x29a   : > { %v7559_v29 = vpop.permute.xlu1 %7558  ;;  %6412 = vmatpush1.bf16.msk.msra.mxu1 %vm8862_vm6, %v6410_v58 }
 0x29b   : > { %v7561_v31 = vunpack.i.h.bf16 %v7559_v29  ;;  %v7560_v37 = vunpack.i.l.bf16 %v7559_v29  ;;  %v7569_v51 = vpop.permute.xlu0 %7568 }
 0x29c   : > { %v7571_v63 = vunpack.i.h.bf16 %v7569_v51  ;;  %v7570_v50 = vunpack.i.l.bf16 %v7569_v51  ;;  %2484 = vperm.xlu1 %7526, %v2474_v35  }
 0x29d   : > { %2489 = vperm.xlu0 %7525, %v2475_v30  }
 0x29e   : > { %v1656_v6 = vsel %vm11957_vm2, %v7560_v37, %v7570_v50  ;;  %v1657_v8 = vsel %vm11957_vm2, %v7561_v31, %v7571_v63  ;;  %v1664_v53 = vsel %vm11957_vm2, %v7570_v50, %v7560_v37  ;;  %v1665_v41 = vsel %vm11957_vm2, %v7571_v63, %v7561_v31  ;;  %v7564_v10 = vpop.permute.xlu1 %7563  ;;  %vm11992_vm2 = vmmov %vm11991_vm1 }
 0x29f   : > { %v7566_v42 = vunpack.i.h.bf16 %v7564_v10  ;;  %v7565_v0 = vunpack.i.l.bf16 %v7564_v10  ;;  %v7574_v3 = vpop.permute.xlu0 %7573  ;;  %v6413_v1 = vpack.c.bf16 %v1657_v8, %v1656_v6  ;;  %v6416_v14 = vpack.c.bf16 %v1665_v41, %v1664_v53 }
 0x2a0   : > { %v7576_v18 = vunpack.i.h.bf16 %v7574_v3  ;;  %v7575_v23 = vunpack.i.l.bf16 %v7574_v3  ;;  %2494 = vperm.xlu1 %7526, %v2476_v2  }
 0x2a1   : > { %2499 = vperm.xlu0 %7525, %v2477_v12   ;;  %6415 = vmatprep.subr.msk.bf16.mxu1 %vm8854_vm5, %v6413_v1 }
 0x2a2   : > { %v1738_v15 = vsel %vm11959_vm7, %v7575_v23, %v7565_v0  ;;  %v1739_v16 = vsel %vm11959_vm7, %v7576_v18, %v7566_v42  ;;  %v7579_v20 = vpop.permute.xlu1 %7578  ;;  %6418 = vmatpush1.bf16.msk.msra.mxu1 %vm8862_vm6, %v6416_v14  ;;  %v1730_v27 = vsel %vm11959_vm7, %v7565_v0, %v7575_v23  ;;  %v1731_v22 = vsel %vm11959_vm7, %v7566_v42, %v7576_v18 }
 0x2a3   : > { %v7581_v25 = vunpack.i.h.bf16 %v7579_v20  ;;  %v7580_v32 = vunpack.i.l.bf16 %v7579_v20  ;;  %v7584_v28 = vpop.permute.xlu0 %7583  ;;  %v6419_v56 = vpack.c.bf16 %v1731_v22, %v1730_v27  ;;  %v6421_v57 = vpack.c.bf16 %v1739_v16, %v1738_v15 }
 0x2a4   : > { %v7586_v33 = vunpack.i.h.bf16 %v7584_v28  ;;  %v7585_v46 = vunpack.i.l.bf16 %v7584_v28  ;;  %2504 = vperm.xlu1 %7526, %v2478_v24  }
 0x2a5   : > { %2509 = vperm.xlu0 %7525, %v2479_v26   ;;  %6420 = vmatprep.subr.bf16.mxu1 %v6419_v56 }
 0x2a6   : > { %v1740_v40 = vsel %vm11959_vm7, %v7585_v46, %v7580_v32  ;;  %v1741_v11 = vsel %vm11959_vm7, %v7586_v33, %v7581_v25  ;;  %v7589_v4 = vpop.permute.xlu1 %7588  ;;  %6423 = vmatpush1.bf16.msk.msra.mxu1 %vm8926_vm8, %v6421_v57  ;;  %v1732_v48 = vsel %vm11959_vm7, %v7580_v32, %v7585_v46  ;;  %v1733_v38 = vsel %vm11959_vm7, %v7581_v25, %v7586_v33 }
 0x2a7   : > { %v7591_v58 = vunpack.i.h.bf16 %v7589_v4  ;;  %v7590_v35 = vunpack.i.l.bf16 %v7589_v4  ;;  %v7594_v29 = vpop.permute.xlu0 %7593  ;;  %v6424_v30 = vpack.c.bf16 %v1733_v38, %v1732_v48  ;;  %v6426_v31 = vpack.c.bf16 %v1741_v11, %v1740_v40 }
 0x2a8   : > { %v7596_v37 = vunpack.i.h.bf16 %v7594_v29  ;;  %v7595_v51 = vunpack.i.l.bf16 %v7594_v29  ;;  %2514 = vperm.xlu1 %7526, %v2480_v34  }
 0x2a9   : > { %2519 = vperm.xlu0 %7525, %v2481_v44   ;;  %6425 = vmatprep.subr.bf16.mxu1 %v6424_v30 }
 0x2aa   : > { %v1742_v63 = vsel %vm11959_vm7, %v7595_v51, %v7590_v35  ;;  %v1743_v50 = vsel %vm11959_vm7, %v7596_v37, %v7591_v58  ;;  %v7599_v2 = vpop.permute.xlu1 %7598  ;;  %6428 = vmatpush1.bf16.msk.msra.mxu1 %vm8926_vm8, %v6426_v31  ;;  %v1734_v6 = vsel %vm11959_vm7, %v7590_v35, %v7595_v51  ;;  %v1735_v8 = vsel %vm11959_vm7, %v7591_v58, %v7596_v37 }
 0x2ab   : > { %v7601_v53 = vunpack.i.h.bf16 %v7599_v2  ;;  %v7600_v41 = vunpack.i.l.bf16 %v7599_v2  ;;  %v7609_v10 = vpop.permute.xlu0 %7608  ;;  %v6429_v12 = vpack.c.bf16 %v1735_v8, %v1734_v6  ;;  %v6431_v42 = vpack.c.bf16 %v1743_v50, %v1742_v63 }
 0x2ac   : > { %v7611_v0 = vunpack.i.h.bf16 %v7609_v10  ;;  %v7610_v3 = vunpack.i.l.bf16 %v7609_v10 }
 0x2ad   : > { %6430 = vmatprep.subr.bf16.mxu1 %v6429_v12 }
 0x2ae   : > { %v1744_v1 = vsel %vm11959_vm7, %v7610_v3, %v7600_v41  ;;  %v1745_v14 = vsel %vm11959_vm7, %v7611_v0, %v7601_v53  ;;  %v7604_v18 = vpop.permute.xlu1 %7603  ;;  %6433 = vmatpush1.bf16.msk.msra.mxu1 %vm8926_vm8, %v6431_v42  ;;  %v1736_v23 = vsel %vm11959_vm7, %v7600_v41, %v7610_v3  ;;  %v1737_v24 = vsel %vm11959_vm7, %v7601_v53, %v7611_v0 }
 0x2af   : > { %v7606_v15 = vunpack.i.h.bf16 %v7604_v18  ;;  %v7605_v16 = vunpack.i.l.bf16 %v7604_v18  ;;  %v7614_v20 = vpop.permute.xlu0 %7613  ;;  %v6434_v26 = vpack.c.bf16 %v1737_v24, %v1736_v23  ;;  %v6436_v27 = vpack.c.bf16 %v1745_v14, %v1744_v1 }
 0x2b0   : > { %v7616_v22 = vunpack.i.h.bf16 %v7614_v20  ;;  %v7615_v25 = vunpack.i.l.bf16 %v7614_v20 }
 0x2b1   : > { %6435 = vmatprep.subr.bf16.mxu1 %v6434_v26 }
 0x2b2   : > { %v1810_v32 = vsel %vm11990_vm13, %v7605_v16, %v7615_v25  ;;  %v1811_v28 = vsel %vm11991_vm1, %v7606_v15, %v7616_v22  ;;  %v1818_v56 = vsel %vm11992_vm2, %v7615_v25, %v7605_v16  ;;  %v1819_v57 = vsel %vm11993_vm10, %v7616_v22, %v7606_v15  ;;  %v7619_v33 = vpop.permute.xlu1 %7618  ;;  %6438 = vmatpush1.bf16.msk.msra.mxu1 %vm8926_vm8, %v6436_v27  ;;  %vm11994_vm13 = vmmov %vm11991_vm1 }
 0x2b3   : > { %v7621_v46 = vunpack.i.h.bf16 %v7619_v33  ;;  %v7620_v34 = vunpack.i.l.bf16 %v7619_v33  ;;  %v7624_v40 = vpop.permute.xlu0 %7623  ;;  %v6439_v11 = vpack.c.bf16 %v1811_v28, %v1810_v32  ;;  %v6442_v4 = vpack.c.bf16 %v1819_v57, %v1818_v56  ;;  %vm11995_vm2 = vmmov %vm11991_vm1 }
 0x2b4   : > { %v7626_v44 = vunpack.i.h.bf16 %v7624_v40  ;;  %v7625_v48 = vunpack.i.l.bf16 %v7624_v40  ;;  %vm11996_vm10 = vmmov %vm11991_vm1 }
 0x2b5   : > { %6441 = vmatprep.subr.msk.bf16.mxu1 %vm8976_vm12, %v6439_v11 }
 0x2b6   : > { %v1812_v38 = vsel %vm11994_vm13, %v7620_v34, %v7625_v48  ;;  %v1813_v58 = vsel %vm11995_vm2, %v7621_v46, %v7626_v44  ;;  %v1820_v35 = vsel %vm11996_vm10, %v7625_v48, %v7620_v34  ;;  %v1821_v29 = vsel %vm11991_vm1, %v7626_v44, %v7621_v46  ;;  %v7629_v30 = vpop.permute.xlu1 %7628  ;;  %6444 = vmatpush1.bf16.msk.msra.mxu1 %vm8996_vm14, %v6442_v4  ;;  %vm11997_vm13 = vmmov %vm11991_vm1 }
 0x2b7   : > { %v7631_v31 = vunpack.i.h.bf16 %v7629_v30  ;;  %v7630_v37 = vunpack.i.l.bf16 %v7629_v30  ;;  %v7634_v51 = vpop.permute.xlu0 %7633  ;;  %v6445_v63 = vpack.c.bf16 %v1813_v58, %v1812_v38  ;;  %v6448_v50 = vpack.c.bf16 %v1821_v29, %v1820_v35  ;;  %vm11998_vm2 = vmmov %vm11991_vm1 }
 0x2b8   : > { %v7636_v2 = vunpack.i.h.bf16 %v7634_v51  ;;  %v7635_v6 = vunpack.i.l.bf16 %v7634_v51  ;;  %vm11999_vm10 = vmmov %vm11991_vm1 }
 0x2b9   : > { %6447 = vmatprep.subr.msk.bf16.mxu1 %vm8976_vm12, %v6445_v63 }
 0x2ba   : > { %v1814_v8 = vsel %vm11997_vm13, %v7630_v37, %v7635_v6  ;;  %v1815_v53 = vsel %vm11998_vm2, %v7631_v31, %v7636_v2  ;;  %v1822_v41 = vsel %vm11999_vm10, %v7635_v6, %v7630_v37  ;;  %v1823_v10 = vsel %vm11991_vm1, %v7636_v2, %v7631_v31  ;;  %v7639_v12 = vpop.permute.xlu1 %7638  ;;  %6450 = vmatpush1.bf16.msk.msra.mxu1 %vm8996_vm14, %v6448_v50  ;;  %vm12000_vm13 = vmmov %vm11991_vm1 }
 0x2bb   : > { %v7641_v42 = vunpack.i.h.bf16 %v7639_v12  ;;  %v7640_v0 = vunpack.i.l.bf16 %v7639_v12  ;;  %v7649_v3 = vpop.permute.xlu0 %7648  ;;  %v6451_v1 = vpack.c.bf16 %v1815_v53, %v1814_v8  ;;  %v6454_v14 = vpack.c.bf16 %v1823_v10, %v1822_v41  ;;  %vm12001_vm2 = vmmov %vm11991_vm1 }
 0x2bc   : > { %v7651_v18 = vunpack.i.h.bf16 %v7649_v3  ;;  %v7650_v23 = vunpack.i.l.bf16 %v7649_v3  ;;  %vm12002_vm10 = vmmov %vm11991_vm1 }
 0x2bd   : > { %6453 = vmatprep.subr.msk.bf16.mxu1 %vm8976_vm12, %v6451_v1 }
 0x2be   : > { %v1816_v24 = vsel %vm12000_vm13, %v7640_v0, %v7650_v23  ;;  %v1817_v15 = vsel %vm12001_vm2, %v7641_v42, %v7651_v18  ;;  %v1824_v16 = vsel %vm12002_vm10, %v7650_v23, %v7640_v0  ;;  %v1825_v20 = vsel %vm11991_vm1, %v7651_v18, %v7641_v42  ;;  %v7644_v26 = vpop.permute.xlu1 %7643  ;;  %6456 = vmatpush1.bf16.msk.msra.mxu1 %vm8996_vm14, %v6454_v14 }
 0x2bf   : > { %v7646_v27 = vunpack.i.h.bf16 %v7644_v26  ;;  %v7645_v22 = vunpack.i.l.bf16 %v7644_v26  ;;  %v7654_v25 = vpop.permute.xlu0 %7653  ;;  %v6457_v32 = vpack.c.bf16 %v1817_v15, %v1816_v24  ;;  %v6460_v28 = vpack.c.bf16 %v1825_v20, %v1824_v16 }
 0x2c0   : > { %v7656_v56 = vunpack.i.h.bf16 %v7654_v25  ;;  %v7655_v57 = vunpack.i.l.bf16 %v7654_v25  ;;  %vm12003_vm13 = vcmp.lt.s32.totalorder %v8802_v45, 1 }
 0x2c1   : > { %6459 = vmatprep.subr.msk.bf16.mxu1 %vm8976_vm12, %v6457_v32  ;;  %vm12004_vm2 = vmmov %vm12003_vm13 }
 0x2c2   : > { %v1890_v33 = vsel %vm12003_vm13, %v7645_v22, %v7655_v57  ;;  %v1891_v46 = vsel %vm12004_vm2, %v7646_v27, %v7656_v56  ;;  %vm12005_vm10 = vmmov %vm12004_vm2  ;;  %v7659_v11 = vpop.permute.xlu1 %7658  ;;  %6462 = vmatpush1.bf16.msk.msra.mxu1 %vm8996_vm14, %v6460_v28 }
 0x2c3   : > { %v1898_v34 = vsel %vm12005_vm10, %v7655_v57, %v7645_v22  ;;  %vm12006_vm1 = vmmov %vm12004_vm2  ;;  %v7661_v4 = vunpack.i.h.bf16 %v7659_v11  ;;  %v7660_v44 = vunpack.i.l.bf16 %v7659_v11  ;;  %v7664_v48 = vpop.permute.xlu0 %7663  ;;  %v6463_v38 = vpack.c.bf16 %v1891_v46, %v1890_v33  ;;  %v2290_v46 = vld [vmem:[%s11949_s3] sm:$0xff] }
 0x2c4   : > { %v1899_v40 = vsel %vm12006_vm1, %v7656_v56, %v7646_v27  ;;  %v7666_v35 = vunpack.i.h.bf16 %v7664_v48  ;;  %v7665_v29 = vunpack.i.l.bf16 %v7664_v48  ;;  %vm12007_vm13 = vmmov %vm12006_vm1 }
 0x2c5   : > { %v6466_v58 = vpack.c.bf16 %v1899_v40, %v1898_v34  ;;  %6465 = vmatprep.subr.msk.bf16.mxu1 %vm8854_vm5, %v6463_v38  ;;  %vm12008_vm2 = vmmov %vm12006_vm1  ;;  %v2296_v40 = vld [vmem:[%s11949_s3 + $0x30] sm:$0xff] }
 0x2c6   : > { %v1892_v30 = vsel %vm12007_vm13, %v7660_v44, %v7665_v29  ;;  %v1893_v31 = vsel %vm12008_vm2, %v7661_v4, %v7666_v35  ;;  %vm12009_vm10 = vmmov %vm12006_vm1  ;;  %v1901_v51 = vsel %vm12006_vm1, %v7666_v35, %v7661_v4  ;;  %v7669_v63 = vpop.permute.xlu1 %7668  ;;  %v2295_v4 = vld [vmem:[%s11949_s3 + $0x28] sm:$0xff] }
 0x2c7   : > { %v1900_v37 = vsel %vm12009_vm10, %v7665_v29, %v7660_v44  ;;  %6468 = vmatpush1.bf16.msk.msra.mxu1 %vm9048_vm0, %v6466_v58  ;;  %v7671_v50 = vunpack.i.h.bf16 %v7669_v63  ;;  %v7670_v2 = vunpack.i.l.bf16 %v7669_v63  ;;  %v7674_v6 = vpop.permute.xlu0 %7673  ;;  %v6469_v8 = vpack.c.bf16 %v1893_v31, %v1892_v30  ;;  %vm12010_vm13 = vmmov %vm12006_vm1 }
 0x2c8   : > { %v6472_v53 = vpack.c.bf16 %v1901_v51, %v1900_v37  ;;  %v7676_v41 = vunpack.i.h.bf16 %v7674_v6  ;;  %v7675_v10 = vunpack.i.l.bf16 %v7674_v6  ;;  %vm12011_vm2 = vmmov %vm12006_vm1 }
 0x2c9   : > { %6471 = vmatprep.subr.msk.bf16.mxu1 %vm8854_vm5, %v6469_v8  ;;  %vm12012_vm10 = vmmov %vm12006_vm1 }
 0x2ca   : > { %v1894_v12 = vsel %vm12010_vm13, %v7670_v2, %v7675_v10  ;;  %v1895_v42 = vsel %vm12011_vm2, %v7671_v50, %v7676_v41  ;;  %v1902_v0 = vsel %vm12012_vm10, %v7675_v10, %v7670_v2  ;;  %v1903_v3 = vsel %vm12006_vm1, %v7676_v41, %v7671_v50  ;;  %v7679_v1 = vpop.permute.xlu1 %7678  ;;  %vm12013_vm13 = vmmov %vm12006_vm1 }
 0x2cb   : > { %6474 = vmatpush1.bf16.msk.msra.mxu1 %vm9048_vm0, %v6472_v53  ;;  %v7681_v14 = vunpack.i.h.bf16 %v7679_v1  ;;  %v7680_v18 = vunpack.i.l.bf16 %v7679_v1  ;;  %v7684_v23 = vpop.permute.xlu0 %7683  ;;  %v6475_v24 = vpack.c.bf16 %v1895_v42, %v1894_v12  ;;  %v6478_v15 = vpack.c.bf16 %v1903_v3, %v1902_v0  ;;  %vm12014_vm2 = vmmov %vm12006_vm1 }
 0x2cc   : > { %v7686_v16 = vunpack.i.h.bf16 %v7684_v23  ;;  %v7685_v20 = vunpack.i.l.bf16 %v7684_v23  ;;  %vm12015_vm10 = vmmov %vm12006_vm1 }
 0x2cd   : > { %6477 = vmatprep.subr.msk.bf16.mxu1 %vm8854_vm5, %v6475_v24 }
 0x2ce   : > { %v1896_v26 = vsel %vm12013_vm13, %v7680_v18, %v7685_v20  ;;  %v1897_v27 = vsel %vm12014_vm2, %v7681_v14, %v7686_v16  ;;  %v1904_v22 = vsel %vm12015_vm10, %v7685_v20, %v7680_v18  ;;  %v1905_v25 = vsel %vm12006_vm1, %v7686_v16, %v7681_v14  ;;  %v7689_v32 = vpop.permute.xlu1 %7688  ;;  %v2310_v14 = vld [vmem:[%s11949_s3 + $0xa0] sm:$0xff] }
 0x2cf   : > { %6480 = vmatpush1.bf16.msk.msra.mxu1 %vm9048_vm0, %v6478_v15  ;;  %v7694_v28 = vpop.permute.xlu0 %7693  ;;  %v6481_v56 = vpack.c.bf16 %v1897_v27, %v1896_v26  ;;  %v6484_v57 = vpack.c.bf16 %v1905_v25, %v1904_v22  ;;  %v7691_v48 = vunpack.i.h.bf16 %v7689_v32  ;;  %v7690_v38 = vunpack.i.l.bf16 %v7689_v32  ;;  %v2316_v15 = vld [vmem:[%s11949_s3 + $0xd0] sm:$0xff] }
 0x2d0   : > { %v7696_v58 = vunpack.i.h.bf16 %v7694_v28  ;;  %v7695_v35 = vunpack.i.l.bf16 %v7694_v28  ;;  %vm12016_vm13 = vcmp.lt.s32.totalorder %v8802_v45, 127 }
 0x2d1   : > { %6483 = vmatprep.subr.msk.bf16.mxu1 %vm8854_vm5, %v6481_v56  ;;  %vm12017_vm2 = vmmov %vm12016_vm13  ;;  %v2315_v56 = vld [vmem:[%s11949_s3 + $0xc8] sm:$0xff] }
 0x2d2   : > { %v7699_v33 = vpop.permute.xlu1 %7698  ;;  %v1994_v31 = vsel %vm12016_vm13, %v7695_v35, %v7690_v38  ;;  %v1995_v37 = vsel %vm12017_vm2, %v7696_v58, %v7691_v48  ;;  %vm12018_vm10 = vmmov %vm12017_vm2 }
 0x2d3   : > { %6486 = vmatpush1.bf16.msk.msra.mxu1 %vm9048_vm0, %v6484_v57  ;;  %v7704_v34 = vpop.permute.xlu0 %7703  ;;  %v7700_v51 = vunpack.i.l.bf16 %v7699_v33  ;;  %v1986_v8 = vsel %vm12018_vm10, %v7690_v38, %v7695_v35  ;;  %vm12019_vm1 = vmmov %vm12017_vm2  ;;  %v6503_v41 = vpack.c.bf16 %v1995_v37, %v1994_v31  ;;  %v2326_v31 = vld [vmem:[%s11949_s3 + $0x120] sm:$0xff] }
 0x2d4   : > { %6488 = vmatprep.subr.bf16.mxu1 %v9580_v54  ;;  %v2301_v54 = vld [vmem:[%s11949_s3 + $0x58] sm:$0xff]  ;;  %v7706_v63 = vunpack.i.h.bf16 %v7704_v34  ;;  %v7705_v50 = vunpack.i.l.bf16 %v7704_v34  ;;  %v1987_v53 = vsel %vm12019_vm1, %v7691_v48, %v7696_v58  ;;  %vm12020_vm13 = vmmov %vm12019_vm1 }
 0x2d5   : > { %vm12021_vm2 = vmmov %vm12019_vm1  ;;  %v6506_v23 = vpack.c.bf16 %v1987_v53, %v1986_v8  ;;  %v2325_v53 = vld [vmem:[%s11949_s3 + $0x118] sm:$0xff] }
 0x2d6   : > { %2611 = vmatmul.mubr.f32.vlgmr.msra.gmra.mrb[0].mxu1 %v2290_v46  ;;  %v9950_v11 = vpop.permute.xlu1 %7708  ;;  %v1996_v0 = vsel %vm12020_vm13, %v7705_v50, %v7700_v51  ;;  %vm12022_vm10 = vmmov %vm12019_vm1 }
 0x2d7   : > { %6490 = vmatpush1.bf16.msra.mxu1 %v9582_v9  ;;  %v9956_v44 = vpop.permute.xlu0 %7713  ;;  %2616 = vmatprep.mubr.f32.mxu1 %v2296_v40  ;;  %v2300_v9 = vld [vmem:[%s11949_s3 + $0x50] sm:$0xff]  ;;  %v7711_v10 = vunpack.i.h.bf16 %v9950_v11  ;;  %v7710_v12 = vunpack.i.l.bf16 %v9950_v11  ;;  %v1988_v24 = vsel %vm12022_vm10, %v7700_v51, %v7705_v50  ;;  %vm12023_vm13 = vmmov %vm12019_vm1  ;;  %v2321_v11 = vld [vmem:[%s11949_s3 + $0xf8] sm:$0xff] }
 0x2d8   : > { %6492 = vmatprep.subr.bf16.mxu1 %v9592_v43  ;;  %v2306_v43 = vld [vmem:[%s11949_s3 + $0x80] sm:$0xff]  ;;  %v7716_v42 = vunpack.i.h.bf16 %v9956_v44  ;;  %vm12025_vm10 = vmmov %vm12019_vm1 }
 0x2da   : > { %2617 = vmatmul.mubr.f32.gmra.mrb[2].mxu1 %v2295_v4  ;;  %v9962_v29 = vpop.permute.xlu1 %7718  ;;  %v1991_v34 = vsel %vm12019_vm1, %v7711_v10, %v7716_v42 }
 0x2db   : > { %6494 = vmatpush1.bf16.msra.mxu1 %v9594_v19  ;;  %v9968_v30 = vpop.permute.xlu0 %7728  ;;  %2622 = vmatprep.mubr.f32.mxu1 %v2301_v54  ;;  %v7701_v19 = vunpack.i.h.bf16 %v7699_v33  ;;  %v7721_v27 = vunpack.i.h.bf16 %v9962_v29  ;;  %v7720_v22 = vunpack.i.l.bf16 %v9962_v29  ;;  %v2320_v29 = vld [vmem:[%s11949_s3 + $0xf0] sm:$0xff] }
 0x2dc   : > { %6496 = vmatprep.subr.bf16.mxu1 %v9604_v49  ;;  %v2305_v49 = vld [vmem:[%s11949_s3 + $0x78] sm:$0xff]  ;;  %v7731_v25 = vunpack.i.h.bf16 %v9968_v30  ;;  %v7730_v32 = vunpack.i.l.bf16 %v9968_v30 }
 0x2dd   : > { %v1997_v3 = vsel %vm12021_vm2, %v7706_v63, %v7701_v19  ;;  %vm12024_vm2 = vmmov %vm12019_vm1 }
 0x2de   : > { %2623 = vmatmul.mubr.f32.gmra.mrb[4].mxu1 %v2300_v9  ;;  %v9978_v2 = vpop.permute.xlu1 %7723  ;;  %v1999_v20 = vsel %vm12024_vm2, %v7716_v42, %v7711_v10  ;;  %v6509_v26 = vpack.c.bf16 %v1997_v3, %v1996_v0  ;;  %vm12027_vm2 = vmmov %vm12019_vm1  ;;  %v1993_v37 = vsel %vm12019_vm1, %v7721_v27, %v7731_v25 }
 0x2df   : > { %6498 = vmatpush1.bf16.msra.mxu1 %v9606_v39  ;;  %v9984_v6 = vpop.permute.xlu0 %7733  ;;  %2628 = vmatprep.mubr.f32.mxu1 %v2306_v43  ;;  %v2311_v39 = vld [vmem:[%s11949_s3 + $0xa8] sm:$0xff]  ;;  %v7726_v4 = vunpack.i.h.bf16 %v9978_v2  ;;  %v2001_v58 = vsel %vm12027_vm2, %v7731_v25, %v7721_v27 }
 0x2e0   : > { %6500 = vmatprep.subr.bf16.mxu1 %v9616_v60  ;;  %v7715_v60 = vunpack.i.l.bf16 %v9956_v44  ;;  %v7725_v44 = vunpack.i.l.bf16 %v9978_v2  ;;  %v7736_v54 = vunpack.i.h.bf16 %v9984_v6  ;;  %v7735_v48 = vunpack.i.l.bf16 %v9984_v6 }
 0x2e2   : > { %2629 = vmatmul.mubr.f32.gmra.mrb[6].mxu1 %v2305_v49  ;;  %v10002_v1 = vpop.permute.xlu1 %7738  ;;  %v1998_v16 = vsel %vm12023_vm13, %v7715_v60, %v7710_v12  ;;  %v1990_v46 = vsel %vm12025_vm10, %v7710_v12, %v7715_v60  ;;  %vm12026_vm13 = vmmov %vm12019_vm1  ;;  %v2293_v60 = vld [vmem:[%s11949_s3 + $0x18] sm:$0xff] }
 0x2e3   : > { %6502 = vmatpush1.bf16.msra.mxu1 %v9618_v61  ;;  %v10008_v18 = vpop.permute.xlu0 %7743  ;;  %2634 = vmatprep.mubr.f32.mxu1 %v2311_v39  ;;  %v1989_v61 = vsel %vm12019_vm1, %v7701_v19, %v7706_v63  ;;  %v6515_v40 = vpack.c.bf16 %v1999_v20, %v1998_v16  ;;  %v2000_v38 = vsel %vm12026_vm13, %v7730_v32, %v7720_v22  ;;  %vm12028_vm10 = vmmov %vm12019_vm1  ;;  %vm12029_vm13 = vcmp.lt.s32.totalorder %v8802_v45, 113 }
 0x2e4   : > { %6505 = vmatprep.subr.msk.bf16.mxu1 %vm8976_vm12, %v6503_v41  ;;  %v6512_v33 = vpack.c.bf16 %v1989_v61, %v1988_v24  ;;  %v6518_v30 = vpack.c.bf16 %v1991_v34, %v1990_v46  ;;  %v1992_v43 = vsel %vm12028_vm10, %v7720_v22, %v7730_v32  ;;  %v2074_v19 = vsel %vm12029_vm13, %v7735_v48, %v7725_v44  ;;  %vm12030_vm2 = vmmov %vm12029_vm13 }
 0x2e5   : > { %v2075_v51 = vsel %vm12030_vm2, %v7736_v54, %v7726_v4  ;;  %v6521_v63 = vpack.c.bf16 %v2001_v58, %v2000_v38  ;;  %v7741_v50 = vunpack.i.h.bf16 %v10002_v1  ;;  %v7740_v2 = vunpack.i.l.bf16 %v10002_v1  ;;  %vm12031_vm10 = vmmov %vm12030_vm2 }
 0x2e6   : > { %2635 = vmatmul.mubr.f32.gmra.mrb[8].mxu1 %v2310_v14  ;;  %v10027_v28 = vpop.permute.xlu1 %7748  ;;  %v7746_v49 = vunpack.i.h.bf16 %v10008_v18  ;;  %v7745_v6 = vunpack.i.l.bf16 %v10008_v18  ;;  %v6524_v39 = vpack.c.bf16 %v1993_v37, %v1992_v43  ;;  %v2066_v10 = vsel %vm12031_vm10, %v7725_v44, %v7735_v48  ;;  %vm12032_vm1 = vmmov %vm12030_vm2 }
 0x2e7   : > { %6508 = vmatpush1.bf16.msk.msra.mxu1 %vm9218_vm4, %v6506_v23  ;;  %v10034_v57 = vpop.permute.xlu0 %7753  ;;  %2640 = vmatprep.mubr.f32.mxu1 %v2316_v15  ;;  %v2067_v12 = vsel %vm12032_vm1, %v7726_v4, %v7736_v54  ;;  %v6527_v42 = vpack.c.bf16 %v2075_v51, %v2074_v19  ;;  %v7751_v0 = vunpack.i.h.bf16 %v10027_v28  ;;  %v7750_v3 = vunpack.i.l.bf16 %v10027_v28  ;;  %vm12033_vm13 = vmmov %vm12032_vm1 }
 0x2e8   : > { %6511 = vmatprep.subr.msk.bf16.mxu1 %vm8976_vm12, %v6509_v26  ;;  %v7756_v1 = vunpack.i.h.bf16 %v10034_v57  ;;  %v7755_v14 = vunpack.i.l.bf16 %v10034_v57  ;;  %v2076_v18 = vsel %vm12033_vm13, %v7745_v6, %v7740_v2  ;;  %vm12034_vm2 = vmmov %vm12032_vm1  ;;  %v6530_v61 = vpack.c.bf16 %v2067_v12, %v2066_v10 }
 0x2e9   : > { %v2077_v23 = vsel %vm12034_vm2, %v7746_v49, %v7741_v50  ;;  %vm12035_vm10 = vmmov %vm12032_vm1  ;;  %v2069_v20 = vsel %vm12032_vm1, %v7741_v50, %v7746_v49 }
 0x2ea   : > { %2641 = vmatmul.mubr.f32.gmra.mrb[10].mxu1 %v2315_v56  ;;  %v10053_v35 = vpop.permute.xlu1 %7758  ;;  %v2068_v16 = vsel %vm12035_vm10, %v7740_v2, %v7745_v6  ;;  %vm12036_vm13 = vmmov %vm12032_vm1  ;;  %v6533_v22 = vpack.c.bf16 %v2077_v23, %v2076_v18 }
 0x2eb   : > { %6514 = vmatpush1.bf16.msk.msra.mxu1 %vm9218_vm4, %v6512_v33  ;;  %v10060_v9 = vpop.permute.xlu0 %7768  ;;  %2646 = vmatprep.mubr.f32.mxu1 %v2321_v11  ;;  %v2078_v26 = vsel %vm12036_vm13, %v7755_v14, %v7750_v3  ;;  %vm12037_vm2 = vmmov %vm12032_vm1  ;;  %v7761_v25 = vunpack.i.h.bf16 %v10053_v35  ;;  %v7760_v32 = vunpack.i.l.bf16 %v10053_v35  ;;  %v6536_v46 = vpack.c.bf16 %v2069_v20, %v2068_v16 }
 0x2ec   : > { %6517 = vmatprep.subr.msk.bf16.mxu1 %vm8976_vm12, %v6515_v40  ;;  %v2079_v27 = vsel %vm12037_vm2, %v7756_v1, %v7751_v0  ;;  %v7771_v28 = vunpack.i.h.bf16 %v10060_v9  ;;  %v7770_v56 = vunpack.i.l.bf16 %v10060_v9  ;;  %vm12038_vm10 = vmmov %vm12032_vm1  ;;  %v2071_v40 = vsel %vm12032_vm1, %v7751_v0, %v7756_v1 }
 0x2ed   : > { %v2070_v34 = vsel %vm12038_vm10, %v7750_v3, %v7755_v14  ;;  %v6539_v11 = vpack.c.bf16 %v2079_v27, %v2078_v26  ;;  %vm12039_vm13 = vmmov %vm12032_vm1 }
 0x2ee   : > { %2647 = vmatmul.mubr.f32.gmra.mrb[12].mxu1 %v2320_v29  ;;  %v10079_v8 = vpop.permute.xlu1 %7763  ;;  %v2080_v38 = vsel %vm12039_vm13, %v7770_v56, %v7760_v32  ;;  %vm12040_vm2 = vmmov %vm12032_vm1  ;;  %v6542_v9 = vpack.c.bf16 %v2071_v40, %v2070_v34  ;;  %v2073_v43 = vsel %vm12032_vm1, %v7761_v25, %v7771_v28  ;;  %vm12042_vm13 = vcmp.lt.s32.totalorder %v8802_v45, 112 }
 0x2ef   : > { %6520 = vmatpush1.bf16.msk.msra.mxu1 %vm9218_vm4, %v6518_v30  ;;  %v10086_v41 = vpop.permute.xlu0 %7773  ;;  %2652 = vmatprep.mubr.f32.mxu1 %v2326_v31  ;;  %v7766_v4 = vunpack.i.h.bf16 %v10079_v8  ;;  %v7765_v44 = vunpack.i.l.bf16 %v10079_v8  ;;  %v2081_v58 = vsel %vm12040_vm2, %v7771_v28, %v7761_v25  ;;  %vm12041_vm10 = vmmov %vm12032_vm1 }
 0x2f0   : > { %6523 = vmatprep.subr.msk.bf16.mxu1 %vm8976_vm12, %v6521_v63  ;;  %v7776_v54 = vunpack.i.h.bf16 %v10086_v41  ;;  %v7775_v48 = vunpack.i.l.bf16 %v10086_v41  ;;  %v2072_v30 = vsel %vm12041_vm10, %v7760_v32, %v7770_v56  ;;  %vm12043_vm2 = vmmov %vm12042_vm13  ;;  %v6545_v19 = vpack.c.bf16 %v2081_v58, %v2080_v38 }
 0x2f1   : > { %v6548_v49 = vpack.c.bf16 %v2073_v43, %v2072_v30  ;;  %vm12044_vm10 = vmmov %vm12043_vm2 }
 0x2f2   : > { %2653 = vmatmul.mubr.f32.gmra.mrb[14].mxu1 %v2325_v53  ;;  %v10105_v24 = vpop.permute.xlu1 %7778  ;;  %v2154_v31 = vsel %vm12042_vm13, %v7775_v48, %v7765_v44  ;;  %v2155_v37 = vsel %vm12043_vm2, %v7776_v54, %v7766_v4  ;;  %v2146_v6 = vsel %vm12044_vm10, %v7765_v44, %v7775_v48  ;;  %vm12045_vm1 = vmmov %vm12043_vm2 }
 0x2f3   : > { %6526 = vmatpush1.bf16.msk.msra.mxu1 %vm9218_vm4, %v6524_v39  ;;  %v7784_v15 = vpop.permute.xlu0 %7783  ;;  %2723 = vmatprep.mubr.f32.mxu1 %v2293_v60  ;;  %v7781_v51 = vunpack.i.h.bf16 %v10105_v24  ;;  %v7780_v63 = vunpack.i.l.bf16 %v10105_v24  ;;  %v2147_v8 = vsel %vm12045_vm1, %v7766_v4, %v7776_v54  ;;  %v6551_v53 = vpack.c.bf16 %v2155_v37, %v2154_v31  ;;  %vm12046_vm13 = vmmov %vm12045_vm1 }
 0x2f4   : > { %6529 = vmatprep.subr.msk.bf16.mxu1 %vm9325_vm3, %v6527_v42  ;;  %v7786_v50 = vunpack.i.h.bf16 %v7784_v15  ;;  %v7785_v2 = vunpack.i.l.bf16 %v7784_v15  ;;  %vm12047_vm2 = vmmov %vm12045_vm1  ;;  %v6554_v14 = vpack.c.bf16 %v2147_v8, %v2146_v6 }
 0x2f5   : > { %vm12048_vm10 = vmmov %vm12045_vm1 }
 0x2f6   : > { %v7789_v57 = vpop.permute.xlu1 %7788  ;;  %v2156_v0 = vsel %vm12046_vm13, %v7785_v2, %v7780_v63  ;;  %v2157_v3 = vsel %vm12047_vm2, %v7786_v50, %v7781_v51  ;;  %v2148_v1 = vsel %vm12048_vm10, %v7780_v63, %v7785_v2  ;;  %v2149_v18 = vsel %vm12045_vm1, %v7781_v51, %v7786_v50  ;;  %vm12049_vm7 = vmmov %vm12045_vm1 }
 0x2f7   : > { %6532 = vmatpush1.bf16.msk.msra.mxu1 %vm9048_vm0, %v6530_v61  ;;  %v7794_v33 = vpop.permute.xlu0 %7793  ;;  %v7791_v41 = vunpack.i.h.bf16 %v7789_v57  ;;  %v7790_v39 = vunpack.i.l.bf16 %v7789_v57  ;;  %vm12050_vm13 = vmmov %vm12045_vm1  ;;  %v6556_v15 = vpack.c.bf16 %v2157_v3, %v2156_v0  ;;  %v6559_v28 = vpack.c.bf16 %v2149_v18, %v2148_v1 }
 0x2f8   : > { %6535 = vmatprep.subr.msk.bf16.mxu1 %vm9325_vm3, %v6533_v22  ;;  %v7796_v10 = vunpack.i.h.bf16 %v7794_v33  ;;  %v7795_v12 = vunpack.i.l.bf16 %v7794_v33  ;;  %vm12051_vm2 = vmmov %vm12045_vm1 }
 0x2f9   : > { %vm12052_vm10 = vmmov %vm12045_vm1 }
 0x2fa   : > { %v7799_v35 = vpop.permute.xlu1 %7798  ;;  %v2158_v23 = vsel %vm12049_vm7, %v7795_v12, %v7790_v39  ;;  %v2159_v24 = vsel %vm12050_vm13, %v7796_v10, %v7791_v41  ;;  %v2150_v25 = vsel %vm12051_vm2, %v7790_v39, %v7795_v12  ;;  %v2151_v32 = vsel %vm12052_vm10, %v7791_v41, %v7796_v10  ;;  %vm12053_vm7 = vmmov %vm12045_vm1  ;;  %v2292_v41 = vld [vmem:[%s11949_s3 + $0x10] sm:$0xff]  ;;  %v2298_v12 = vld [vmem:[%s11949_s3 + $0x40] sm:$0xff] }
 0x2fb   : > { %6538 = vmatpush1.bf16.msk.msra.mxu1 %vm9048_vm0, %v6536_v46  ;;  %v7804_v29 = vpop.permute.xlu0 %7803  ;;  %v7801_v61 = vunpack.i.h.bf16 %v7799_v35  ;;  %v7800_v16 = vunpack.i.l.bf16 %v7799_v35  ;;  %v6561_v56 = vpack.c.bf16 %v2159_v24, %v2158_v23  ;;  %vm12054_vm13 = vmmov %vm12045_vm1  ;;  %v6564_v44 = vpack.c.bf16 %v2151_v32, %v2150_v25 }
 0x2fc   : > { %6541 = vmatprep.subr.msk.bf16.mxu1 %vm9325_vm3, %v6539_v11  ;;  %v7806_v20 = vunpack.i.h.bf16 %v7804_v29  ;;  %v7805_v26 = vunpack.i.l.bf16 %v7804_v29  ;;  %vm12055_vm2 = vmmov %vm12045_vm1  ;;  %vm12056_vm10 = vcmask 523264  }
 0x2fe   : > { %v7809_v42 = vpop.permute.xlu1 %7808  ;;  %v2160_v40 = vsel %vm12053_vm7, %v7805_v26, %v7800_v16  ;;  %v2161_v11 = vsel %vm12045_vm1, %v7806_v20, %v7801_v61  ;;  %v2152_v4 = vsel %vm12054_vm13, %v7800_v16, %v7805_v26  ;;  %v2153_v54 = vsel %vm12055_vm2, %v7801_v61, %v7806_v20  ;;  %v2297_v61 = vld [vmem:[%s11949_s3 + $0x38] sm:$0xff]  ;;  %v2303_v16 = vld [vmem:[%s11949_s3 + $0x68] sm:$0xff]  ;;  %vm12057_vm7 = vmmov %vm12056_vm10 }
 0x2ff   : > { %6544 = vmatpush1.bf16.msk.msra.mxu1 %vm9048_vm0, %v6542_v9  ;;  %v7814_v60 = vpop.permute.xlu0 %7813  ;;  %v7811_v57 = vunpack.i.h.bf16 %v7809_v42  ;;  %v7810_v33 = vunpack.i.l.bf16 %v7809_v42  ;;  %v6566_v29 = vpack.c.bf16 %v2161_v11, %v2160_v40  ;;  %v6569_v51 = vpack.c.bf16 %v2153_v54, %v2152_v4  ;;  %v2307_v40 = vld [vmem:[%s11949_s3 + $0x88] sm:$0xff]  ;;  %v2313_v11 = vld [vmem:[%s11949_s3 + $0xb8] sm:$0xff]  ;;  %v2318_v54 = vld [vmem:[%s11949_s3 + $0xe0] sm:$0xff] }
 0x300   : > { %6547 = vmatprep.subr.msk.bf16.mxu1 %vm9325_vm3, %v6545_v19  ;;  %v7816_v46 = vunpack.i.h.bf16 %v7814_v60  ;;  %v7815_v34 = vunpack.i.l.bf16 %v7814_v60  ;;  %vm12058_vm1 = vmmov %vm12057_vm7 }
 0x301   : > { %vm12059_vm13 = vmmov %vm12058_vm1 }
 0x302   : > { %v7819_v27 = vpop.permute.xlu1 %7818  ;;  %v2234_v48 = vsel %vm953_vm15, %v7815_v34, %v7810_v33  ;;  %v2235_v38 = vsel %vm953_vm15, %v7816_v46, %v7811_v57  ;;  %v2226_v37 = vsel %vm953_vm15, %v7810_v33, %v7815_v34  ;;  %v2227_v19 = vsel %vm953_vm15, %v7811_v57, %v7816_v46  ;;  %vm12060_vm2 = vmmov %vm12058_vm1 }
 0x303   : > { %6550 = vmatpush1.bf16.msk.msra.mxu1 %vm9048_vm0, %v6548_v49  ;;  %v7824_v22 = vpop.permute.xlu0 %7823  ;;  %v7821_v9 = vunpack.i.h.bf16 %v7819_v27  ;;  %v7820_v30 = vunpack.i.l.bf16 %v7819_v27  ;;  %v6571_v63 = vpack.c.bf16 %v2235_v38, %v2234_v48  ;;  %v6574_v42 = vpack.c.bf16 %v2227_v19, %v2226_v37  ;;  %v2317_v48 = vld [vmem:[%s11949_s3 + $0xd8] sm:$0xff]  ;;  %v2323_v38 = vld [vmem:[%s11949_s3 + $0x108] sm:$0xff]  ;;  %v2314_v37 = vld [vmem:[%s11949_s3 + $0xc0] sm:$0xff] }
 0x304   : > { %6553 = vmatprep.subr.msk.bf16.mxu1 %vm9396_vm11, %v6551_v53  ;;  %v7826_v43 = vunpack.i.h.bf16 %v7824_v22  ;;  %v7825_v31 = vunpack.i.l.bf16 %v7824_v22  ;;  %v2319_v19 = vld [vmem:[%s11949_s3 + $0xe8] sm:$0xff] }
 0x306   : > { %v7829_v58 = vpop.permute.xlu1 %7828  ;;  %v2236_v8 = vsel %vm953_vm15, %v7825_v31, %v7820_v30  ;;  %v2237_v53 = vsel %vm953_vm15, %v7826_v43, %v7821_v9  ;;  %v2228_v60 = vsel %vm953_vm15, %v7820_v30, %v7825_v31  ;;  %v2229_v0 = vsel %vm953_vm15, %v7821_v9, %v7826_v43  ;;  %v2294_v9 = vld [vmem:[%s11949_s3 + $0x20] sm:$0xff]  ;;  %v2299_v30 = vld [vmem:[%s11949_s3 + $0x48] sm:$0xff]  ;;  %v2304_v43 = vld [vmem:[%s11949_s3 + $0x70] sm:$0xff] }
 0x307   : > { %6555 = vmatpush1.bf16.msra.mxu1 %v6554_v14  ;;  %v7834_v35 = vpop.permute.xlu0 %7833  ;;  %v7831_v50 = vunpack.i.h.bf16 %v7829_v58  ;;  %v7830_v2 = vunpack.i.l.bf16 %v7829_v58  ;;  %v6577_v14 = vpack.c.bf16 %v2237_v53, %v2236_v8  ;;  %v6580_v20 = vpack.c.bf16 %v2229_v0, %v2228_v60  ;;  %v2322_v58 = vld [vmem:[%s11949_s3 + $0x100] sm:$0xff]  ;;  %v2309_v31 = vld [vmem:[%s11949_s3 + $0x98] sm:$0xff]  ;;  %v8488_v60 = vld [vmem:[%s8567_s23 + $0x8] sm:$0xff] }
 0x308   : > { %6558 = vmatprep.subr.msk.bf16.mxu1 %vm9396_vm11, %v6556_v15  ;;  %v7836_v49 = vunpack.i.h.bf16 %v7834_v35  ;;  %v7835_v6 = vunpack.i.l.bf16 %v7834_v35  ;;  %v2328_v35 = vld [vmem:[%s11949_s3 + $0x130] sm:$0xff] }
 0x30a   : > { %v7839_v39 = vpop.permute.xlu1 %7838  ;;  %v2238_v3 = vsel %vm953_vm15, %v7835_v6, %v7830_v2  ;;  %v2239_v1 = vsel %vm953_vm15, %v7836_v49, %v7831_v50  ;;  %v2230_v26 = vsel %vm953_vm15, %v7830_v2, %v7835_v6  ;;  %v2231_v27 = vsel %vm953_vm15, %v7831_v50, %v7836_v49 }
 0x30b   : > { %6560 = vmatpush1.bf16.msra.mxu1 %v6559_v28  ;;  %v7844_v10 = vpop.permute.xlu0 %7843  ;;  %v7841_v18 = vunpack.i.h.bf16 %v7839_v39  ;;  %v7840_v23 = vunpack.i.l.bf16 %v7839_v39  ;;  %v6583_v22 = vpack.c.bf16 %v2239_v1, %v2238_v3  ;;  %v2302_v28 = vld [vmem:[%s11949_s3 + $0x60] sm:$0xff]  ;;  %v6586_v57 = vpack.c.bf16 %v2231_v27, %v2230_v26  ;;  %v8489_v1 = vld [vmem:[%s8567_s23 + $0x10] sm:$0xff] }
 0x30c   : > { %6563 = vmatprep.subr.msk.bf16.mxu1 %vm9396_vm11, %v6561_v56  ;;  %v7846_v24 = vunpack.i.h.bf16 %v7844_v10  ;;  %v7845_v15 = vunpack.i.l.bf16 %v7844_v10  ;;  %v2308_v56 = vld [vmem:[%s11949_s3 + $0x90] sm:$0xff]  ;;  %v8487_v39 = vld [vmem:[%s8567_s23] sm:$0xff] }
 0x30e   : > { %v2240_v25 = vsel %vm953_vm15, %v7845_v15, %v7840_v23  ;;  %v2241_v32 = vsel %vm953_vm15, %v7846_v24, %v7841_v18  ;;  %v2232_v33 = vsel %vm953_vm15, %v7840_v23, %v7845_v15  ;;  %v2233_v46 = vsel %vm953_vm15, %v7841_v18, %v7846_v24  ;;  %v8490_v23 = vld [vmem:[%s8567_s23 + $0x18] sm:$0xff] }
 0x30f   : > { %6565 = vmatpush1.bf16.msra.mxu1 %v6564_v44  ;;  %v6589_v34 = vpack.c.bf16 %v2241_v32, %v2240_v25  ;;  %v6592_v4 = vpack.c.bf16 %v2233_v46, %v2232_v33  ;;  %v2312_v44 = vld [vmem:[%s11949_s3 + $0xb0] sm:$0xff]  ;;  %v8491_v32 = vld [vmem:[%s8567_s23 + $0x20] sm:$0xff] }
 0x310   : > { %6568 = vmatprep.subr.msk.bf16.mxu1 %vm9396_vm11, %v6566_v29  ;;  %v2327_v29 = vld [vmem:[%s11949_s3 + $0x128] sm:$0xff] }
 0x313   : > { %6570 = vmatpush1.bf16.msra.mxu1 %v6569_v51  ;;  %v2324_v51 = vld [vmem:[%s11949_s3 + $0x110] sm:$0xff] }
 0x314   : > { %6573 = vmatprep.subr.msk.bf16.mxu1 %vm9443_vm9, %v6571_v63  ;;  %v2329_v63 = vld [vmem:[%s11949_s3 + $0x138] sm:$0xff] }
 0x316   : > { %2724 = vmatmul.mubr.f32.vlgmr.msra.gmra.mrb[0].mxu1 %v2292_v41 }
 0x317   : > { %6576 = vmatpush1.bf16.msk.msra.mxu1 %vm9218_vm4, %v6574_v42  ;;  %2729 = vmatprep.mubr.f32.mxu1 %v2298_v12 }
 0x318   : > { %6579 = vmatprep.subr.msk.bf16.mxu1 %vm9443_vm9, %v6577_v14 }
 0x31a   : > { %2730 = vmatmul.mubr.f32.gmra.mrb[2].mxu1 %v2297_v61 }
 0x31b   : > { %6582 = vmatpush1.bf16.msk.msra.mxu1 %vm9218_vm4, %v6580_v20  ;;  %2735 = vmatprep.mubr.f32.mxu1 %v2303_v16  ;;  %v2485_v50 = vpop.permute.xlu1 %2484 }
 0x31c   : > { %6585 = vmatprep.subr.msk.bf16.mxu1 %vm9443_vm9, %v6583_v22  ;;  %v2490_v53 = vpop.permute.xlu0 %2489 }
 0x31e   : > { %2736 = vmatmul.mubr.f32.gmra.mrb[4].mxu1 %v2302_v28 }
 0x31f   : > { %6588 = vmatpush1.bf16.msk.msra.mxu1 %vm9218_vm4, %v6586_v57  ;;  %2741 = vmatprep.mubr.f32.mxu1 %v2308_v56  ;;  %v2495_v18 = vpop.permute.xlu1 %2494 }
 0x320   : > { %6591 = vmatprep.subr.msk.bf16.mxu1 %vm9443_vm9, %v6589_v34  ;;  %v2500_v57 = vpop.permute.xlu0 %2499  ;;  %v8492_v34 = vld [vmem:[%s8567_s23 + $0x28] sm:$0xff] }
 0x322   : > { %2742 = vmatmul.mubr.f32.gmra.mrb[6].mxu1 %v2307_v40 }
 0x323   : > { %6594 = vmatpush1.bf16.msk.msra.mxu1 %vm9218_vm4, %v6592_v4  ;;  %2747 = vmatprep.mubr.f32.mxu1 %v2313_v11 }
 0x326   : > { %2748 = vmatmul.mubr.f32.gmra.mrb[8].mxu1 %v2312_v44 }
 0x327   : > { %2753 = vmatprep.mubr.f32.mxu1 %v2318_v54 }
 0x32a   : > { %2754 = vmatmul.mubr.f32.gmra.mrb[10].mxu1 %v2317_v48  ;;  %v8493_v48 = vld [vmem:[%s8567_s23 + $0x30] sm:$0xff] }
 0x32b   : > { %2759 = vmatprep.mubr.f32.mxu1 %v2323_v38 }
 0x32e   : > { %2760 = vmatmul.mubr.f32.gmra.mrb[12].mxu1 %v2322_v58  ;;  %v2505_v58 = vpop.permute.xlu1 %2504 }
 0x32f   : > { %2765 = vmatprep.mubr.f32.mxu1 %v2328_v35  ;;  %v8494_v35 = vld [vmem:[%s8567_s23 + $0x38] sm:$0xff] }
 0x332   : > { %2766 = vmatmul.mubr.f32.gmra.mrb[14].mxu1 %v2327_v29 }
 0x333   : > { %2836 = vmatprep.mubr.f32.mxu1 %v8520_v21 }
 0x336   : > { %5623 = vmatmul.mubr.msk.f32.vlgmr.msra.gmra.mrb[0].mxu1 %vm12056_vm10, %v2294_v9  ;;  %vm12061_vm10 = vmmov %vm12058_vm1 }
 0x337   : > { %2842 = vmatprep.mubr.f32.mxu1 %v8520_v21 }
 0x33a   : > { %5624 = vmatmul.mubr.msk.f32.gmra.mrb[2].mxu1 %vm12057_vm7, %v2299_v30  ;;  %vm12062_vm7 = vmmov %vm12058_vm1 }
 0x33b   : > { %2848 = vmatprep.mubr.f32.mxu1 %v8520_v21 }
 0x33e   : > { %5625 = vmatmul.mubr.msk.f32.gmra.mrb[4].mxu1 %vm12058_vm1, %v2304_v43 }
 0x33f   : > { %2854 = vmatprep.mubr.f32.mxu1 %v8520_v21 }
 0x342   : > { %5626 = vmatmul.mubr.msk.f32.gmra.mrb[6].mxu1 %vm12059_vm13, %v2309_v31  ;;  %vm12063_vm13 = vcmp.lt.s32.totalorder %v8802_v45, 17 }
 0x343   : > { %2860 = vmatprep.mubr.f32.mxu1 %v8520_v21 }
 0x346   : > { %5627 = vmatmul.mubr.msk.f32.gmra.mrb[8].mxu1 %vm12060_vm2, %v2314_v37  ;;  %vm12064_vm2 = vmmov %vm12063_vm13 }
 0x347   : > { %2866 = vmatprep.mubr.f32.mxu1 %v8520_v21 }
 0x34a   : > { %5628 = vmatmul.mubr.msk.f32.gmra.mrb[10].mxu1 %vm12061_vm10, %v2319_v19  ;;  %vm12065_vm10 = vmmov %vm12064_vm2 }
 0x34b   : > { %2872 = vmatprep.mubr.f32.mxu1 %v8520_v21 }
 0x34e   : > { %5629 = vmatmul.mubr.msk.f32.gmra.mrb[12].mxu1 %vm12062_vm7, %v2324_v51  ;;  %vm12066_vm7 = vmmov %vm12064_vm2 }
 0x34f   : > { %2878 = vmatprep.mubr.f32.mxu1 %v8520_v21 }
 0x352   : > { %5630 = vmatmul.mubr.msk.f32.gmra.mrb[14].mxu1 %vm12058_vm1, %v2329_v63  ;;  %vm12067_vm1 = vmmov %vm12064_vm2 }
 0x409   : > { %v2838_v2 = vpop.f32.mrb[0].mxu1 }
 0x40a   : > { %v7011_v49 = vadd.f32 %v2838_v2, %v2485_v50  ;;  %v2840_v6 = vpop.f32.mrb[1].mxu1  ;;  %v8495_v2 = vld [vmem:[%s8567_s23 + $0x40] sm:$0xff] }
 0x40b   : > { %v7012_v8 = vadd.f32 %v2840_v6, %v2485_v50 }
 0x40c   : > { %v10329_v10 = vadd.f32 %v8487_v39, %v7011_v49  ;;  %v8496_v39 = vld [vmem:[%s8567_s23 + $0x48] sm:$0xff] }
 0x40d   : > { %v2844_v41 = vpop.f32.mrb[2].mxu1  ;;  %v10332_v0 = vadd.f32 %v8488_v60, %v7012_v8  ;;  %v2510_v8 = vpop.permute.xlu0 %2509 }
 0x40e   : > { %v7013_v12 = vadd.f32 %v2844_v41, %v2490_v53  ;;  %v2846_v42 = vpop.f32.mrb[3].mxu1  ;;  %v2933_v61 = vmax.f32 %v10329_v10, 0.0 }
 0x40f   : > { %v7014_v3 = vadd.f32 %v2846_v42, %v2490_v53  ;;  %v2934_v27 = vmax.f32 %v10332_v0, 0.0 }
 0x410   : > { %v10335_v14 = vadd.f32 %v8489_v1, %v7013_v12 }
 0x411   : > { %v10338_v24 = vadd.f32 %v8490_v23, %v7014_v3  ;;  %v2850_v15 = vpop.f32.mrb[4].mxu1 }
 0x412   : > { %v2935_v16 = vmax.f32 %v10335_v14, 0.0  ;;  %v7015_v20 = vadd.f32 %v2850_v15, %v2495_v18  ;;  %v2852_v26 = vpop.f32.mrb[5].mxu1  ;;  %v2515_v15 = vpop.permute.xlu1 %2514 }
 0x413   : > { %v2936_v22 = vmax.f32 %v10338_v24, 0.0  ;;  %v7016_v25 = vadd.f32 %v2852_v26, %v2495_v18  ;;  %v8497_v18 = vld [vmem:[%s8567_s23 + $0x50] sm:$0xff] }
 0x414   : > { %v10345_v28 = vadd.f32 %v8491_v32, %v7015_v20  ;;  %v10347_v56 = vpack.i.bf16 %v2935_v16, %v2933_v61  ;;  %v10368_v19 = vpack.c.bf16 %v2935_v16, %v2933_v61  ;;  %v8498_v61 = vld [vmem:[%s8567_s23 + $0x58] sm:$0xff] }
 0x415   : > { %v2856_v33 = vpop.f32.mrb[6].mxu1  ;;  %v10349_v46 = vpack.i.bf16 %v2936_v22, %v2934_v27  ;;  %v10352_v40 = vadd.f32 %v8492_v34, %v7016_v25  ;;  %v10366_v37 = vpack.c.bf16 %v2936_v22, %v2934_v27 }
 0x416   : > { %v7017_v11 = vadd.f32 %v2856_v33, %v2500_v57  ;;  %v2858_v4 = vpop.f32.mrb[7].mxu1  ;;  %7848 = vrot.lane.b32.xlu1 %v10347_v56, %s8511_s24  ;;  %v2937_v44 = vmax.f32 %v10345_v28, 0.0 }
 0x417   : > { %v7018_v54 = vadd.f32 %v2858_v4, %v2500_v57  ;;  %7853 = vrot.lane.b32.xlu0 %v10349_v46, %s8511_s24  ;;  %v2938_v51 = vmax.f32 %v10352_v40, 0.0  ;;  %v2520_v4 = vpop.permute.xlu0 %2519 }
 0x418   : > { %v10360_v38 = vadd.f32 %v8493_v48, %v7017_v11 }
 0x419   : > { %v10363_v29 = vadd.f32 %v8494_v35, %v7018_v54  ;;  %v2862_v9 = vpop.f32.mrb[8].mxu1 }
 0x41a   : > { %v2939_v30 = vmax.f32 %v10360_v38, 0.0  ;;  %v7019_v43 = vadd.f32 %v2862_v9, %v2505_v58  ;;  %v2864_v31 = vpop.f32.mrb[9].mxu1 }
 0x41b   : > { %v2940_v63 = vmax.f32 %v10363_v29, 0.0  ;;  %v7020_v50 = vadd.f32 %v2864_v31, %v2505_v58  ;;  %v8499_v58 = vld [vmem:[%s8567_s23 + $0x60] sm:$0xff] }
 0x41c   : > { %v10373_v49 = vadd.f32 %v8495_v2, %v7019_v43  ;;  %v10375_v6 = vpack.i.bf16 %v2939_v30, %v2937_v44  ;;  %v10396_v32 = vpack.c.bf16 %v2939_v30, %v2937_v44  ;;  %v8500_v44 = vld [vmem:[%s8567_s23 + $0x68] sm:$0xff] }
 0x41d   : > { %v2868_v53 = vpop.f32.mrb[10].mxu1  ;;  %v10377_v41 = vpack.i.bf16 %v2940_v63, %v2938_v51  ;;  %v10380_v12 = vadd.f32 %v8496_v39, %v7020_v50  ;;  %v10394_v25 = vpack.c.bf16 %v2940_v63, %v2938_v51  ;;  %v8501_v51 = vld [vmem:[%s8567_s23 + $0x70] sm:$0xff]  ;;  %v8502_v50 = vld [vmem:[%s8567_s23 + $0x78] sm:$0xff]  ;;  %s11909_s23 = scalar_lea.vmem %s11951_s5, %s5745_s20 }
 0x41e   : > { %v7021_v42 = vadd.f32 %v2868_v53, %v2510_v8  ;;  %v2870_v60 = vpop.f32.mrb[11].mxu1  ;;  %7858 = vrot.lane.b32.xlu1 %v10375_v6, %s8511_s24  ;;  %v2941_v3 = vmax.f32 %v10373_v49, 0.0 }
 0x41f   : > { %v7022_v1 = vadd.f32 %v2870_v60, %v2510_v8  ;;  %7863 = vrot.lane.b32.xlu0 %v10377_v41, %s8511_s24  ;;  %v2942_v57 = vmax.f32 %v10380_v12, 0.0 }
 0x420   : > { %v10388_v23 = vadd.f32 %v8497_v18, %v7021_v42 }
 0x421   : > { %v10391_v16 = vadd.f32 %v8498_v61, %v7022_v1  ;;  %v2874_v20 = vpop.f32.mrb[12].mxu1 }
 0x422   : > { %v2943_v26 = vmax.f32 %v10388_v23, 0.0  ;;  %v7023_v27 = vadd.f32 %v2874_v20, %v2515_v15  ;;  %v2876_v22 = vpop.f32.mrb[13].mxu1 }
 0x423   : > { %v2944_v33 = vmax.f32 %v10391_v16, 0.0  ;;  %v7024_v34 = vadd.f32 %v2876_v22, %v2515_v15 }
 0x424   : > { %v10400_v11 = vpack.i.bf16 %v2943_v26, %v2941_v3  ;;  %v10405_v35 = vadd.f32 %v8499_v58, %v7023_v27  ;;  %v10424_v42 = vpack.c.bf16 %v2943_v26, %v2941_v3  ;;  %v5632_v3 = vld [vmem:[%s11947_s1 + $0x148] sm:$0xff] }
 0x425   : > { %v2880_v54 = vpop.f32.mrb[14].mxu1  ;;  %v10402_v48 = vpack.i.bf16 %v2944_v33, %v2942_v57  ;;  %v10410_v30 = vadd.f32 %v8500_v44, %v7024_v34  ;;  %v10422_v39 = vpack.c.bf16 %v2944_v33, %v2942_v57  ;;  %3927 = vmatprep.mubr.f32.mxu0 %v5632_v3 }
 0x426   : > { %v7025_v9 = vadd.f32 %v2880_v54, %v2520_v4  ;;  %v2882_v43 = vpop.f32.mrb[15].mxu1  ;;  %7868 = vrot.lane.b32.xlu1 %v10400_v11, %s8511_s24  ;;  %v2945_v8 = vmax.f32 %v10405_v35, 0.0 }
 0x427   : > { %v7026_v31 = vadd.f32 %v2882_v43, %v2520_v4  ;;  %7873 = vrot.lane.b32.xlu0 %v10402_v48, %s8511_s24  ;;  %v2946_v60 = vmax.f32 %v10410_v30, 0.0 }
 0x428   : > { %v10415_v63 = vadd.f32 %v8501_v51, %v7025_v9 }
 0x429   : > { %v10418_v2 = vadd.f32 %v8502_v50, %v7026_v31 }
 0x42a   : > { %v2947_v53 = vmax.f32 %v10415_v63, 0.0 }
 0x42b   : > { %v2948_v1 = vmax.f32 %v10418_v2, 0.0 }
 0x42c   : > { %v10428_v18 = vpack.i.bf16 %v2947_v53, %v2945_v8  ;;  %v10438_v20 = vpack.c.bf16 %v2947_v53, %v2945_v8 }
 0x42d   : > { %v10430_v15 = vpack.i.bf16 %v2948_v1, %v2946_v60  ;;  %v10436_v61 = vpack.c.bf16 %v2948_v1, %v2946_v60 }
 0x42e   : > { %7878 = vrot.lane.b32.xlu1 %v10428_v18, %s8511_s24 }
 0x42f   : > { %7888 = vrot.lane.b32.xlu0 %v10430_v15, %s8511_s24 }
 0x432   : > { %7883 = vrot.lane.b32.xlu1 %v10347_v56, %s8512_s25 }
 0x433   : > { %7893 = vrot.lane.b32.xlu0 %v10349_v46, %s8512_s25 }
 0x436   : > { %7898 = vrot.lane.b32.xlu1 %v10375_v6, %s8512_s25 }
 0x437   : > { %7903 = vrot.lane.b32.xlu0 %v10377_v41, %s8512_s25 }
 0x43a   : > { %7908 = vrot.lane.b32.xlu1 %v10400_v11, %s8512_s25 }
 0x43b   : > { %7913 = vrot.lane.b32.xlu0 %v10402_v48, %s8512_s25 }
 0x43e   : > { %7918 = vrot.lane.b32.xlu1 %v10428_v18, %s8512_s25 }
 0x43f   : > { %7928 = vrot.lane.b32.xlu0 %v10430_v15, %s8512_s25 }
 0x442   : > { %7923 = vrot.lane.b32.xlu1 %v10347_v56, %s8513_s26 }
 0x443   : > { %7933 = vrot.lane.b32.xlu0 %v10349_v46, %s8513_s26 }
 0x446   : > { %7938 = vrot.lane.b32.xlu1 %v10375_v6, %s8513_s26 }
 0x447   : > { %7943 = vrot.lane.b32.xlu0 %v10377_v41, %s8513_s26 }
 0x44a   : > { %7948 = vrot.lane.b32.xlu1 %v10400_v11, %s8513_s26 }
 0x44b   : > { %7953 = vrot.lane.b32.xlu0 %v10402_v48, %s8513_s26 }
 0x44e   : > { %7958 = vrot.lane.b32.xlu1 %v10428_v18, %s8513_s26 }
 0x44f   : > { %7968 = vrot.lane.b32.xlu0 %v10430_v15, %s8513_s26 }
 0x452   : > { %7963 = vrot.lane.b32.xlu1 %v10347_v56, %s8514_s27 }
 0x453   : > { %7973 = vrot.lane.b32.xlu0 %v10349_v46, %s8514_s27 }
 0x456   : > { %7978 = vrot.lane.b32.xlu1 %v10375_v6, %s8514_s27 }
 0x457   : > { %7983 = vrot.lane.b32.xlu0 %v10377_v41, %s8514_s27 }
 0x45a   : > { %7988 = vrot.lane.b32.xlu1 %v10400_v11, %s8514_s27 }
 0x45b   : > { %7993 = vrot.lane.b32.xlu0 %v10402_v48, %s8514_s27 }
 0x45e   : > { %7998 = vrot.lane.b32.xlu1 %v10428_v18, %s8514_s27 }
 0x45f   : > { %8003 = vrot.lane.b32.xlu0 %v10430_v15, %s8514_s27 }
 0x462   : > { %8008 = vrot.lane.b32.xlu1 %v10347_v56, %s8515_s30 }
 0x463   : > { %8013 = vrot.lane.b32.xlu0 %v10349_v46, %s8515_s30 }
 0x466   : > { %8018 = vrot.lane.b32.xlu1 %v10375_v6, %s8515_s30 }
 0x467   : > { %8023 = vrot.lane.b32.xlu0 %v10377_v41, %s8515_s30 }
 0x46a   : > { %8028 = vrot.lane.b32.xlu1 %v10400_v11, %s8515_s30 }
 0x46b   : > { %8033 = vrot.lane.b32.xlu0 %v10402_v48, %s8515_s30 }
 0x46e   : > { %8038 = vrot.lane.b32.xlu1 %v10428_v18, %s8515_s30 }
 0x46f   : > { %8048 = vrot.lane.b32.xlu0 %v10430_v15, %s8515_s30 }
 0x472   : > { %8043 = vrot.lane.b32.xlu1 %v10347_v56, %s8516_s6 }
 0x473   : > { %8053 = vrot.lane.b32.xlu0 %v10349_v46, %s8516_s6 }
 0x476   : > { %8058 = vrot.lane.b32.xlu1 %v10375_v6, %s8516_s6 }
 0x477   : > { %8063 = vrot.lane.b32.xlu0 %v10377_v41, %s8516_s6 }
 0x47a   : > { %8068 = vrot.lane.b32.xlu1 %v10400_v11, %s8516_s6 }
 0x47b   : > { %8073 = vrot.lane.b32.xlu0 %v10402_v48, %s8516_s6 }
 0x47e   : > { %8078 = vrot.lane.b32.xlu1 %v10428_v18, %s8516_s6 }
 0x47f   : > { %8088 = vrot.lane.b32.xlu0 %v10430_v15, %s8516_s6 }
 0x482   : > { %8083 = vrot.lane.b32.xlu1 %v10347_v56, %s8517_s7 }
 0x483   : > { %8093 = vrot.lane.b32.xlu0 %v10349_v46, %s8517_s7 }
 0x486   : > { %8098 = vrot.lane.b32.xlu1 %v10375_v6, %s8517_s7 }
 0x487   : > { %8103 = vrot.lane.b32.xlu0 %v10377_v41, %s8517_s7 }
 0x488   : > { %v7849_v26 = vpop.permute.xlu1 %7848 }
 0x489   : > { %v7851_v27 = vunpack.i.h.bf16 %v7849_v26  ;;  %v7850_v22 = vunpack.i.l.bf16 %v7849_v26  ;;  %v7854_v57 = vpop.permute.xlu0 %7853 }
 0x48a   : > { %v7856_v33 = vunpack.i.h.bf16 %v7854_v57  ;;  %v7855_v34 = vunpack.i.l.bf16 %v7854_v57  ;;  %8108 = vrot.lane.b32.xlu1 %v10400_v11, %s8517_s7 }
 0x48b   : > { %8113 = vrot.lane.b32.xlu0 %v10402_v48, %s8517_s7 }
 0x48c   : > { %v2981_v4 = vsel %vm12063_vm13, %v7850_v22, %v7855_v34  ;;  %v2982_v54 = vsel %vm12064_vm2, %v7851_v27, %v7856_v33  ;;  %v2989_v58 = vsel %vm12065_vm10, %v7855_v34, %v7850_v22  ;;  %v2990_v9 = vsel %vm12066_vm7, %v7856_v33, %v7851_v27  ;;  %vm12068_vm13 = vmmov %vm12067_vm1 }
 0x48d   : > { %v6598_v43 = vpack.c.bf16 %v2990_v9, %v2989_v58  ;;  %v6595_v44 = vpack.c.bf16 %v2982_v54, %v2981_v4  ;;  %vm12069_vm2 = vmmov %vm12067_vm1 }
 0x48e   : > { %8118 = vrot.lane.b32.xlu1 %v10428_v18, %s8517_s7  ;;  %vm12070_vm10 = vmmov %vm12067_vm1 }
 0x48f   : > { %8123 = vrot.lane.b32.xlu0 %v10430_v15, %s8517_s7  ;;  %6597 = vmatprep.subr.msk.bf16.mxu0 %vm8854_vm5, %v6595_v44  ;;  %vm12071_vm7 = vmmov %vm12067_vm1 }
 0x490   : > { %v7859_v31 = vpop.permute.xlu1 %7858  ;;  %6600 = vmatpush1.bf16.msk.msra.mxu0 %vm8862_vm6, %v6598_v43 }
 0x491   : > { %v7861_v51 = vunpack.i.h.bf16 %v7859_v31  ;;  %v7860_v50 = vunpack.i.l.bf16 %v7859_v31  ;;  %v7864_v8 = vpop.permute.xlu0 %7863  ;;  %v5672_v31 = vld [vmem:[%s11948_s2 + $0x48] sm:$0xff] }
 0x492   : > { %v7866_v53 = vunpack.i.h.bf16 %v7864_v8  ;;  %v7865_v60 = vunpack.i.l.bf16 %v7864_v8  ;;  %8128 = vrot.lane.b32.xlu1 %v10347_v56, %s8518_s8 }
 0x493   : > { %8133 = vrot.lane.b32.xlu0 %v10349_v46, %s8518_s8 }
 0x494   : > { %v2983_v1 = vsel %vm12067_vm1, %v7860_v50, %v7865_v60  ;;  %v2984_v3 = vsel %vm12068_vm13, %v7861_v51, %v7866_v53  ;;  %v2991_v26 = vsel %vm12069_vm2, %v7865_v60, %v7860_v50  ;;  %v2992_v27 = vsel %vm12070_vm10, %v7866_v53, %v7861_v51  ;;  %vm12072_vm13 = vmmov %vm12067_vm1  ;;  %v5673_v53 = vld [vmem:[%s11948_s2 + $0x50] sm:$0xff] }
 0x495   : > { %v6604_v22 = vpack.c.bf16 %v2992_v27, %v2991_v26  ;;  %v6601_v57 = vpack.c.bf16 %v2984_v3, %v2983_v1  ;;  %vm12073_vm2 = vmmov %vm12067_vm1 }
 0x496   : > { %8138 = vrot.lane.b32.xlu1 %v10375_v6, %s8518_s8  ;;  %vm12074_vm10 = vmmov %vm12067_vm1 }
 0x497   : > { %8143 = vrot.lane.b32.xlu0 %v10377_v41, %s8518_s8  ;;  %6603 = vmatprep.subr.msk.bf16.mxu0 %vm8854_vm5, %v6601_v57 }
 0x498   : > { %v7869_v56 = vpop.permute.xlu1 %7868  ;;  %6606 = vmatpush1.bf16.msk.msra.mxu0 %vm8862_vm6, %v6604_v22  ;;  %v5674_v22 = vld [vmem:[%s11948_s2 + $0x58] sm:$0xff] }
 0x499   : > { %v7871_v46 = vunpack.i.h.bf16 %v7869_v56  ;;  %v7870_v33 = vunpack.i.l.bf16 %v7869_v56  ;;  %v7874_v34 = vpop.permute.xlu0 %7873 }
 0x49a   : > { %v7876_v4 = vunpack.i.h.bf16 %v7874_v34  ;;  %v7875_v54 = vunpack.i.l.bf16 %v7874_v34  ;;  %8148 = vrot.lane.b32.xlu1 %v10400_v11, %s8518_s8  ;;  %v5671_v11 = vld [vmem:[%s11948_s2 + $0x40] sm:$0xff] }
 0x49b   : > { %8153 = vrot.lane.b32.xlu0 %v10402_v48, %s8518_s8 }
 0x49c   : > { %v2985_v6 = vsel %vm12071_vm7, %v7870_v33, %v7875_v54  ;;  %v2986_v41 = vsel %vm12067_vm1, %v7871_v46, %v7876_v4  ;;  %v2993_v58 = vsel %vm12072_vm13, %v7875_v54, %v7870_v33  ;;  %v2994_v9 = vsel %vm12073_vm2, %v7876_v4, %v7871_v46  ;;  %vm12075_vm7 = vmmov %vm12067_vm1 }
 0x49d   : > { %v6610_v43 = vpack.c.bf16 %v2994_v9, %v2993_v58  ;;  %v6607_v44 = vpack.c.bf16 %v2986_v41, %v2985_v6  ;;  %vm12076_vm13 = vmmov %vm12067_vm1  ;;  %v5675_v6 = vld [vmem:[%s11948_s2 + $0x60] sm:$0xff]  ;;  %vm12077_vm2 = vcmp.lt.s32.totalorder %v8802_v45, 16 }
 0x49e   : > { %8158 = vrot.lane.b32.xlu1 %v10428_v18, %s8518_s8 }
 0x49f   : > { %8163 = vrot.lane.b32.xlu0 %v10430_v15, %s8518_s8  ;;  %6609 = vmatprep.subr.msk.bf16.mxu0 %vm8854_vm5, %v6607_v44 }
 0x4a0   : > { %v7879_v48 = vpop.permute.xlu1 %7878  ;;  %6612 = vmatpush1.bf16.msk.msra.mxu0 %vm8862_vm6, %v6610_v43  ;;  %v5676_v43 = vld [vmem:[%s11948_s2 + $0x68] sm:$0xff] }
 0x4a1   : > { %v7881_v51 = vunpack.i.h.bf16 %v7879_v48  ;;  %v7880_v18 = vunpack.i.l.bf16 %v7879_v48  ;;  %v7889_v50 = vpop.permute.xlu0 %7888 }
 0x4a2   : > { %v7891_v8 = vunpack.i.h.bf16 %v7889_v50  ;;  %v7890_v15 = vunpack.i.l.bf16 %v7889_v50  ;;  %3801 = vperm.xlu1 %7526, %v5671_v11  }
 0x4a3   : > { %3806 = vperm.xlu0 %7525, %v5672_v31  }
 0x4a4   : > { %v2987_v60 = vsel %vm12074_vm10, %v7880_v18, %v7890_v15  ;;  %v2988_v1 = vsel %vm12075_vm7, %v7881_v51, %v7891_v8  ;;  %v2995_v3 = vsel %vm12067_vm1, %v7890_v15, %v7880_v18  ;;  %v2996_v26 = vsel %vm12076_vm13, %v7891_v8, %v7881_v51  ;;  %v7884_v27 = vpop.permute.xlu1 %7883  ;;  %vm12078_vm10 = vmmov %vm12077_vm2 }
 0x4a5   : > { %v6616_v57 = vpack.c.bf16 %v2996_v26, %v2995_v3  ;;  %v7886_v56 = vunpack.i.h.bf16 %v7884_v27  ;;  %v7885_v46 = vunpack.i.l.bf16 %v7884_v27  ;;  %v7894_v33 = vpop.permute.xlu0 %7893  ;;  %v6613_v34 = vpack.c.bf16 %v2988_v1, %v2987_v60  ;;  %vm12079_vm7 = vmmov %vm12077_vm2  ;;  %v5678_v26 = vld [vmem:[%s11948_s2 + $0x78] sm:$0xff] }
 0x4a6   : > { %v7896_v4 = vunpack.i.h.bf16 %v7894_v33  ;;  %v7895_v54 = vunpack.i.l.bf16 %v7894_v33  ;;  %3811 = vperm.xlu1 %7526, %v5673_v53   ;;  %vm12080_vm1 = vmmov %vm12077_vm2  ;;  %v5677_v53 = vld [vmem:[%s11948_s2 + $0x70] sm:$0xff] }
 0x4a7   : > { %3816 = vperm.xlu0 %7525, %v5674_v22   ;;  %6615 = vmatprep.subr.msk.bf16.mxu0 %vm8854_vm5, %v6613_v34  ;;  %vm12081_vm13 = vmmov %vm12080_vm1 }
 0x4a8   : > { %v3069_v41 = vsel %vm12077_vm2, %v7895_v54, %v7885_v46  ;;  %v3070_v58 = vsel %vm12078_vm10, %v7896_v4, %v7886_v56  ;;  %v7899_v9 = vpop.permute.xlu1 %7898  ;;  %6618 = vmatpush1.bf16.msk.msra.mxu0 %vm8862_vm6, %v6616_v57  ;;  %v3061_v44 = vsel %vm12079_vm7, %v7885_v46, %v7895_v54  ;;  %v3062_v11 = vsel %vm12080_vm1, %v7886_v56, %v7896_v4  ;;  %vm12082_vm2 = vmmov %vm12080_vm1 }
 0x4a9   : > { %v6621_v48 = vpack.c.bf16 %v3070_v58, %v3069_v41  ;;  %v7901_v31 = vunpack.i.h.bf16 %v7899_v9  ;;  %v7900_v51 = vunpack.i.l.bf16 %v7899_v9  ;;  %v7904_v18 = vpop.permute.xlu0 %7903  ;;  %v6619_v50 = vpack.c.bf16 %v3062_v11, %v3061_v44  ;;  %vm12083_vm10 = vmmov %vm12080_vm1 }
 0x4aa   : > { %v7906_v8 = vunpack.i.h.bf16 %v7904_v18  ;;  %v7905_v15 = vunpack.i.l.bf16 %v7904_v18  ;;  %3821 = vperm.xlu1 %7526, %v5675_v6   ;;  %vm12084_vm7 = vmmov %vm12080_vm1 }
 0x4ab   : > { %3826 = vperm.xlu0 %7525, %v5676_v43   ;;  %6620 = vmatprep.subr.bf16.mxu0 %v6619_v50 }
 0x4ac   : > { %v3071_v60 = vsel %vm12081_vm13, %v7905_v15, %v7900_v51  ;;  %v3072_v1 = vsel %vm12082_vm2, %v7906_v8, %v7901_v31  ;;  %v7909_v3 = vpop.permute.xlu1 %7908  ;;  %6623 = vmatpush1.bf16.msk.msra.mxu0 %vm8926_vm8, %v6621_v48  ;;  %v3063_v27 = vsel %vm12083_vm10, %v7900_v51, %v7905_v15  ;;  %v3064_v22 = vsel %vm12084_vm7, %v7901_v31, %v7906_v8  ;;  %vm12085_vm13 = vmmov %vm12080_vm1 }
 0x4ad   : > { %v6626_v57 = vpack.c.bf16 %v3072_v1, %v3071_v60  ;;  %v7911_v56 = vunpack.i.h.bf16 %v7909_v3  ;;  %v7910_v46 = vunpack.i.l.bf16 %v7909_v3  ;;  %v7914_v33 = vpop.permute.xlu0 %7913  ;;  %v6624_v34 = vpack.c.bf16 %v3064_v22, %v3063_v27  ;;  %vm12086_vm2 = vmmov %vm12080_vm1 }
 0x4ae   : > { %v7916_v4 = vunpack.i.h.bf16 %v7914_v33  ;;  %v7915_v54 = vunpack.i.l.bf16 %v7914_v33  ;;  %3831 = vperm.xlu1 %7526, %v5677_v53   ;;  %vm12087_vm10 = vmmov %vm12080_vm1 }
 0x4af   : > { %3836 = vperm.xlu0 %7525, %v5678_v26   ;;  %6625 = vmatprep.subr.bf16.mxu0 %v6624_v34  ;;  %vm12088_vm7 = vmmov %vm12080_vm1 }
 0x4b0   : > { %v3073_v6 = vsel %vm12080_vm1, %v7915_v54, %v7910_v46  ;;  %v3074_v41 = vsel %vm12085_vm13, %v7916_v4, %v7911_v56  ;;  %v7919_v58 = vpop.permute.xlu1 %7918  ;;  %6628 = vmatpush1.bf16.msk.msra.mxu0 %vm8926_vm8, %v6626_v57  ;;  %v3065_v9 = vsel %vm12086_vm2, %v7910_v46, %v7915_v54  ;;  %v3066_v43 = vsel %vm12087_vm10, %v7911_v56, %v7916_v4  ;;  %vm12089_vm13 = vmmov %vm12080_vm1 }
 0x4b1   : > { %v6631_v44 = vpack.c.bf16 %v3074_v41, %v3073_v6  ;;  %v7921_v11 = vunpack.i.h.bf16 %v7919_v58  ;;  %v7920_v48 = vunpack.i.l.bf16 %v7919_v58  ;;  %v7929_v31 = vpop.permute.xlu0 %7928  ;;  %v6629_v51 = vpack.c.bf16 %v3066_v43, %v3065_v9  ;;  %vm12090_vm2 = vmmov %vm12080_vm1 }
 0x4b2   : > { %v7931_v18 = vunpack.i.h.bf16 %v7929_v31  ;;  %v7930_v50 = vunpack.i.l.bf16 %v7929_v31  ;;  %vm12091_vm10 = vcmp.lt.s32.totalorder %v8802_v45, 15 }
 0x4b3   : > { %6630 = vmatprep.subr.bf16.mxu0 %v6629_v51 }
 0x4b4   : > { %v3075_v8 = vsel %vm12088_vm7, %v7930_v50, %v7920_v48  ;;  %v3076_v15 = vsel %vm12080_vm1, %v7931_v18, %v7921_v11  ;;  %v7924_v53 = vpop.permute.xlu1 %7923  ;;  %6633 = vmatpush1.bf16.msk.msra.mxu0 %vm8926_vm8, %v6631_v44  ;;  %v3067_v60 = vsel %vm12089_vm13, %v7920_v48, %v7930_v50  ;;  %v3068_v1 = vsel %vm12090_vm2, %v7921_v11, %v7931_v18  ;;  %vm12092_vm7 = vmmov %vm12091_vm10 }
 0x4b5   : > { %v6636_v3 = vpack.c.bf16 %v3076_v15, %v3075_v8  ;;  %v7926_v26 = vunpack.i.h.bf16 %v7924_v53  ;;  %v7925_v27 = vunpack.i.l.bf16 %v7924_v53  ;;  %v7934_v22 = vpop.permute.xlu0 %7933  ;;  %v6634_v57 = vpack.c.bf16 %v3068_v1, %v3067_v60  ;;  %vm12093_vm1 = vmmov %vm12092_vm7 }
 0x4b6   : > { %v7936_v56 = vunpack.i.h.bf16 %v7934_v22  ;;  %v7935_v46 = vunpack.i.l.bf16 %v7934_v22  ;;  %vm12094_vm13 = vmmov %vm12093_vm1 }
 0x4b7   : > { %6635 = vmatprep.subr.bf16.mxu0 %v6634_v57  ;;  %vm12095_vm2 = vmmov %vm12093_vm1 }
 0x4b8   : > { %v3141_v33 = vsel %vm12091_vm10, %v7925_v27, %v7935_v46  ;;  %v3142_v34 = vsel %vm12092_vm7, %v7926_v26, %v7936_v56  ;;  %v3149_v4 = vsel %vm12093_vm1, %v7935_v46, %v7925_v27  ;;  %v3150_v54 = vsel %vm12094_vm13, %v7936_v56, %v7926_v26  ;;  %v7939_v6 = vpop.permute.xlu1 %7938  ;;  %6638 = vmatpush1.bf16.msk.msra.mxu0 %vm8926_vm8, %v6636_v3  ;;  %vm12096_vm10 = vmmov %vm12093_vm1 }
 0x4b9   : > { %v6642_v41 = vpack.c.bf16 %v3150_v54, %v3149_v4  ;;  %v7941_v58 = vunpack.i.h.bf16 %v7939_v6  ;;  %v7940_v9 = vunpack.i.l.bf16 %v7939_v6  ;;  %v7944_v43 = vpop.permute.xlu0 %7943  ;;  %v6639_v44 = vpack.c.bf16 %v3142_v34, %v3141_v33  ;;  %vm12097_vm7 = vmmov %vm12093_vm1 }
 0x4ba   : > { %v7946_v11 = vunpack.i.h.bf16 %v7944_v43  ;;  %v7945_v48 = vunpack.i.l.bf16 %v7944_v43  ;;  %vm12098_vm13 = vmmov %vm12093_vm1 }
 0x4bb   : > { %6641 = vmatprep.subr.msk.bf16.mxu0 %vm8976_vm12, %v6639_v44 }
 0x4bc   : > { %v3143_v31 = vsel %vm12095_vm2, %v7940_v9, %v7945_v48  ;;  %v3144_v51 = vsel %vm12096_vm10, %v7941_v58, %v7946_v11  ;;  %v3151_v18 = vsel %vm12097_vm7, %v7945_v48, %v7940_v9  ;;  %v3152_v50 = vsel %vm12093_vm1, %v7946_v11, %v7941_v58  ;;  %v7949_v8 = vpop.permute.xlu1 %7948  ;;  %6644 = vmatpush1.bf16.msk.msra.mxu0 %vm8996_vm14, %v6642_v41  ;;  %vm12099_vm2 = vmmov %vm12093_vm1 }
 0x4bd   : > { %v6648_v15 = vpack.c.bf16 %v3152_v50, %v3151_v18  ;;  %v7951_v53 = vunpack.i.h.bf16 %v7949_v8  ;;  %v7950_v60 = vunpack.i.l.bf16 %v7949_v8  ;;  %v7954_v1 = vpop.permute.xlu0 %7953  ;;  %v6645_v3 = vpack.c.bf16 %v3144_v51, %v3143_v31  ;;  %vm12100_vm10 = vmmov %vm12093_vm1 }
 0x4be   : > { %v7956_v26 = vunpack.i.h.bf16 %v7954_v1  ;;  %v7955_v27 = vunpack.i.l.bf16 %v7954_v1  ;;  %vm12101_vm7 = vmmov %vm12093_vm1 }
 0x4bf   : > { %6647 = vmatprep.subr.msk.bf16.mxu0 %vm8976_vm12, %v6645_v3 }
 0x4c0   : > { %v3145_v22 = vsel %vm12098_vm13, %v7950_v60, %v7955_v27  ;;  %v3146_v57 = vsel %vm12099_vm2, %v7951_v53, %v7956_v26  ;;  %v3153_v56 = vsel %vm12100_vm10, %v7955_v27, %v7950_v60  ;;  %v3154_v46 = vsel %vm12101_vm7, %v7956_v26, %v7951_v53  ;;  %v7959_v33 = vpop.permute.xlu1 %7958  ;;  %6650 = vmatpush1.bf16.msk.msra.mxu0 %vm8996_vm14, %v6648_v15  ;;  %vm12102_vm13 = vmmov %vm12093_vm1 }
 0x4c1   : > { %v6654_v34 = vpack.c.bf16 %v3154_v46, %v3153_v56  ;;  %v7961_v4 = vunpack.i.h.bf16 %v7959_v33  ;;  %v7960_v54 = vunpack.i.l.bf16 %v7959_v33  ;;  %v7969_v6 = vpop.permute.xlu0 %7968  ;;  %v6651_v41 = vpack.c.bf16 %v3146_v57, %v3145_v22  ;;  %vm12103_vm2 = vmmov %vm12093_vm1 }
 0x4c2   : > { %v7971_v58 = vunpack.i.h.bf16 %v7969_v6  ;;  %v7970_v9 = vunpack.i.l.bf16 %v7969_v6  ;;  %vm12104_vm10 = vmmov %vm12093_vm1  ;;  %vm12105_vm7 = vcmp.lt.s32.totalorder %v8802_v45, 1 }
 0x4c3   : > { %6653 = vmatprep.subr.msk.bf16.mxu0 %vm8976_vm12, %v6651_v41 }
 0x4c4   : > { %v3147_v43 = vsel %vm12093_vm1, %v7960_v54, %v7970_v9  ;;  %v3148_v44 = vsel %vm12102_vm13, %v7961_v4, %v7971_v58  ;;  %v3155_v11 = vsel %vm12103_vm2, %v7970_v9, %v7960_v54  ;;  %v3156_v48 = vsel %vm12104_vm10, %v7971_v58, %v7961_v4  ;;  %v7964_v31 = vpop.permute.xlu1 %7963  ;;  %6656 = vmatpush1.bf16.msk.msra.mxu0 %vm8996_vm14, %v6654_v34  ;;  %vm12106_vm1 = vmmov %vm12105_vm7 }
 0x4c5   : > { %v6660_v51 = vpack.c.bf16 %v3156_v48, %v3155_v11  ;;  %v7966_v18 = vunpack.i.h.bf16 %v7964_v31  ;;  %v7965_v50 = vunpack.i.l.bf16 %v7964_v31  ;;  %v7974_v8 = vpop.permute.xlu0 %7973  ;;  %v6657_v15 = vpack.c.bf16 %v3148_v44, %v3147_v43  ;;  %vm12107_vm13 = vmmov %vm12106_vm1 }
 0x4c6   : > { %v7976_v53 = vunpack.i.h.bf16 %v7974_v8  ;;  %v7975_v60 = vunpack.i.l.bf16 %v7974_v8  ;;  %vm12108_vm2 = vmmov %vm12106_vm1 }
 0x4c7   : > { %6659 = vmatprep.subr.msk.bf16.mxu0 %vm8976_vm12, %v6657_v15  ;;  %vm12109_vm10 = vmmov %vm12106_vm1 }
 0x4c8   : > { %v3221_v1 = vsel %vm12105_vm7, %v7965_v50, %v7975_v60  ;;  %v3222_v3 = vsel %vm12106_vm1, %v7966_v18, %v7976_v53  ;;  %v3229_v26 = vsel %vm12107_vm13, %v7975_v60, %v7965_v50  ;;  %v3230_v27 = vsel %vm12108_vm2, %v7976_v53, %v7966_v18  ;;  %v7979_v22 = vpop.permute.xlu1 %7978  ;;  %6662 = vmatpush1.bf16.msk.msra.mxu0 %vm8996_vm14, %v6660_v51  ;;  %vm12110_vm7 = vmmov %vm12106_vm1 }
 0x4c9   : > { %v6666_v57 = vpack.c.bf16 %v3230_v27, %v3229_v26  ;;  %v7981_v56 = vunpack.i.h.bf16 %v7979_v22  ;;  %v7980_v46 = vunpack.i.l.bf16 %v7979_v22  ;;  %v7984_v33 = vpop.permute.xlu0 %7983  ;;  %v6663_v34 = vpack.c.bf16 %v3222_v3, %v3221_v1  ;;  %vm12111_vm13 = vmmov %vm12106_vm1 }
 0x4ca   : > { %v7986_v4 = vunpack.i.h.bf16 %v7984_v33  ;;  %v7985_v54 = vunpack.i.l.bf16 %v7984_v33  ;;  %vm12112_vm2 = vmmov %vm12106_vm1 }
 0x4cb   : > { %6665 = vmatprep.subr.msk.bf16.mxu0 %vm8854_vm5, %v6663_v34 }
 0x4cc   : > { %v3223_v6 = vsel %vm12109_vm10, %v7980_v46, %v7985_v54  ;;  %v3224_v41 = vsel %vm12110_vm7, %v7981_v56, %v7986_v4  ;;  %v3231_v58 = vsel %vm12106_vm1, %v7985_v54, %v7980_v46  ;;  %v3232_v9 = vsel %vm12111_vm13, %v7986_v4, %v7981_v56  ;;  %v7989_v43 = vpop.permute.xlu1 %7988  ;;  %6668 = vmatpush1.bf16.msk.msra.mxu0 %vm9048_vm0, %v6666_v57  ;;  %vm12113_vm10 = vmmov %vm12106_vm1 }
 0x4cd   : > { %v6672_v44 = vpack.c.bf16 %v3232_v9, %v3231_v58  ;;  %v7991_v11 = vunpack.i.h.bf16 %v7989_v43  ;;  %v7990_v48 = vunpack.i.l.bf16 %v7989_v43  ;;  %v7994_v31 = vpop.permute.xlu0 %7993  ;;  %v6669_v51 = vpack.c.bf16 %v3224_v41, %v3223_v6  ;;  %vm12114_vm7 = vmmov %vm12106_vm1 }
 0x4ce   : > { %v7996_v18 = vunpack.i.h.bf16 %v7994_v31  ;;  %v7995_v50 = vunpack.i.l.bf16 %v7994_v31  ;;  %vm12115_vm13 = vmmov %vm12106_vm1 }
 0x4cf   : > { %6671 = vmatprep.subr.msk.bf16.mxu0 %vm8854_vm5, %v6669_v51  ;;  %v5636_v51 = vld [vmem:[%s11947_s1 + $0x168] sm:$0xff] }
 0x4d0   : > { %v3225_v8 = vsel %vm12112_vm2, %v7990_v48, %v7995_v50  ;;  %v3226_v15 = vsel %vm12113_vm10, %v7991_v11, %v7996_v18  ;;  %v3233_v53 = vsel %vm12114_vm7, %v7995_v50, %v7990_v48  ;;  %v3234_v60 = vsel %vm12106_vm1, %v7996_v18, %v7991_v11  ;;  %v7999_v1 = vpop.permute.xlu1 %7998  ;;  %6674 = vmatpush1.bf16.msk.msra.mxu0 %vm9048_vm0, %v6672_v44  ;;  %vm12116_vm2 = vmmov %vm12106_vm1  ;;  %v5631_v44 = vld [vmem:[%s11947_s1 + $0x140] sm:$0xff]  ;;  %v5637_v48 = vld [vmem:[%s11947_s1 + $0x170] sm:$0xff] }
 0x4d1   : > { %v6678_v3 = vpack.c.bf16 %v3234_v60, %v3233_v53  ;;  %v8001_v26 = vunpack.i.h.bf16 %v7999_v1  ;;  %v8000_v27 = vunpack.i.l.bf16 %v7999_v1  ;;  %v8004_v22 = vpop.permute.xlu0 %8003  ;;  %v6675_v57 = vpack.c.bf16 %v3226_v15, %v3225_v8  ;;  %vm12117_vm10 = vmmov %vm12106_vm1 }
 0x4d2   : > { %v8006_v56 = vunpack.i.h.bf16 %v8004_v22  ;;  %v8005_v46 = vunpack.i.l.bf16 %v8004_v22  ;;  %vm12118_vm7 = vmmov %vm12106_vm1  ;;  %vm12119_vm1 = vcmp.lt.s32.totalorder %v8802_v45, 127 }
 0x4d3   : > { %6677 = vmatprep.subr.msk.bf16.mxu0 %vm8854_vm5, %v6675_v57 }
 0x4d4   : > { %v3227_v33 = vsel %vm12115_vm13, %v8000_v27, %v8005_v46  ;;  %v3228_v34 = vsel %vm12116_vm2, %v8001_v26, %v8006_v56  ;;  %v3235_v4 = vsel %vm12117_vm10, %v8005_v46, %v8000_v27  ;;  %v3236_v54 = vsel %vm12118_vm7, %v8006_v56, %v8001_v26  ;;  %v8009_v6 = vpop.permute.xlu1 %8008  ;;  %6680 = vmatpush1.bf16.msk.msra.mxu0 %vm9048_vm0, %v6678_v3  ;;  %vm12120_vm13 = vmmov %vm12119_vm1 }
 0x4d5   : > { %v6684_v41 = vpack.c.bf16 %v3236_v54, %v3235_v4  ;;  %v8014_v58 = vpop.permute.xlu0 %8013  ;;  %v6681_v9 = vpack.c.bf16 %v3228_v34, %v3227_v33  ;;  %v8011_v50 = vunpack.i.h.bf16 %v8009_v6  ;;  %v8010_v8 = vunpack.i.l.bf16 %v8009_v6  ;;  %vm12121_vm2 = vmmov %vm12119_vm1 }
 0x4d6   : > { %v8016_v15 = vunpack.i.h.bf16 %v8014_v58  ;;  %v8015_v53 = vunpack.i.l.bf16 %v8014_v58  ;;  %vm12122_vm10 = vmmov %vm12119_vm1 }
 0x4d7   : > { %6683 = vmatprep.subr.msk.bf16.mxu0 %vm8854_vm5, %v6681_v9  ;;  %vm12123_vm7 = vmmov %vm12119_vm1 }
 0x4d8   : > { %v8019_v43 = vpop.permute.xlu1 %8018  ;;  %6686 = vmatpush1.bf16.msk.msra.mxu0 %vm9048_vm0, %v6684_v41  ;;  %v3325_v3 = vsel %vm12119_vm1, %v8015_v53, %v8010_v8  ;;  %v3326_v26 = vsel %vm12120_vm13, %v8016_v15, %v8011_v50  ;;  %v3317_v33 = vsel %vm12121_vm2, %v8010_v8, %v8015_v53  ;;  %v3318_v34 = vsel %vm12122_vm10, %v8011_v50, %v8016_v15  ;;  %vm12124_vm13 = vmmov %vm12119_vm1 }
 0x4d9   : > { %v8024_v11 = vpop.permute.xlu0 %8023  ;;  %6688 = vmatprep.subr.bf16.mxu0 %v10366_v37  ;;  %v5642_v37 = vld [vmem:[%s11947_s1 + $0x198] sm:$0xff]  ;;  %v8020_v27 = vunpack.i.l.bf16 %v8019_v43  ;;  %v6703_v4 = vpack.c.bf16 %v3326_v26, %v3325_v3  ;;  %vm12125_vm2 = vmmov %vm12119_vm1  ;;  %v5656_v3 = vld [vmem:[%s11947_s1 + $0x208] sm:$0xff] }
 0x4da   : > { %v8026_v22 = vunpack.i.h.bf16 %v8024_v11  ;;  %v8025_v57 = vunpack.i.l.bf16 %v8024_v11  ;;  %vm12126_vm10 = vmmov %vm12119_vm1 }
 0x4db   : > { %3928 = vmatmul.mubr.f32.vlgmr.msra.gmra.mrb[16].mxu0 %v5631_v44  ;;  %v5651_v44 = vld [vmem:[%s11947_s1 + $0x1e0] sm:$0xff] }
 0x4dc   : > { %v10770_v31 = vpop.permute.xlu1 %8028  ;;  %6690 = vmatpush1.bf16.msra.mxu0 %v10368_v19  ;;  %3933 = vmatprep.mubr.f32.mxu0 %v5637_v48  ;;  %v5641_v19 = vld [vmem:[%s11947_s1 + $0x190] sm:$0xff]  ;;  %v3327_v58 = vsel %vm12123_vm7, %v8025_v57, %v8020_v27  ;;  %v6706_v48 = vpack.c.bf16 %v3318_v34, %v3317_v33  ;;  %vm12127_vm7 = vmmov %vm12119_vm1 }
 0x4dd   : > { %v10776_v18 = vpop.permute.xlu0 %8033  ;;  %6692 = vmatprep.subr.bf16.mxu0 %v10394_v25  ;;  %v5647_v25 = vld [vmem:[%s11947_s1 + $0x1c0] sm:$0xff]  ;;  %v8031_v54 = vunpack.i.h.bf16 %v10770_v31  ;;  %v8030_v6 = vunpack.i.l.bf16 %v10770_v31  ;;  %v3319_v31 = vsel %vm12124_vm13, %v8020_v27, %v8025_v57  ;;  %vm12128_vm13 = vmmov %vm12119_vm1 }
 0x4de   : > { %v8036_v41 = vunpack.i.h.bf16 %v10776_v18 }
 0x4df   : > { %3934 = vmatmul.mubr.f32.gmra.mrb[18].mxu0 %v5636_v51  ;;  %v5657_v51 = vld [vmem:[%s11947_s1 + $0x210] sm:$0xff] }
 0x4e0   : > { %v10782_v60 = vpop.permute.xlu1 %8038  ;;  %6694 = vmatpush1.bf16.msra.mxu0 %v10396_v32  ;;  %3939 = vmatprep.mubr.f32.mxu0 %v5642_v37  ;;  %v8021_v32 = vunpack.i.h.bf16 %v8019_v43  ;;  %v3330_v37 = vsel %vm12127_vm7, %v8036_v41, %v8031_v54  ;;  %vm12131_vm7 = vmmov %vm12119_vm1 }
 0x4e1   : > { %v10788_v1 = vpop.permute.xlu0 %8048  ;;  %6696 = vmatprep.subr.bf16.mxu0 %v10422_v39  ;;  %v5646_v39 = vld [vmem:[%s11947_s1 + $0x1b8] sm:$0xff]  ;;  %v8041_v8 = vunpack.i.h.bf16 %v10782_v60  ;;  %v8040_v15 = vunpack.i.l.bf16 %v10782_v60 }
 0x4e2   : > { %v3328_v9 = vsel %vm12119_vm1, %v8026_v22, %v8021_v32  ;;  %v8051_v53 = vunpack.i.h.bf16 %v10788_v1 }
 0x4e3   : > { %3940 = vmatmul.mubr.f32.gmra.mrb[20].mxu0 %v5641_v19  ;;  %v6709_v50 = vpack.c.bf16 %v3328_v9, %v3327_v58  ;;  %v8050_v19 = vunpack.i.l.bf16 %v10788_v1  ;;  %v3322_v1 = vsel %vm12128_vm13, %v8031_v54, %v8036_v41  ;;  %vm12132_vm13 = vcmp.lt.s32.totalorder %v8802_v45, 113 }
 0x4e4   : > { %v10798_v56 = vpop.permute.xlu1 %8043  ;;  %6698 = vmatpush1.bf16.msra.mxu0 %v10424_v42  ;;  %3945 = vmatprep.mubr.f32.mxu0 %v5647_v25  ;;  %v5652_v42 = vld [vmem:[%s11947_s1 + $0x1e8] sm:$0xff]  ;;  %v3324_v58 = vsel %vm12119_vm1, %v8041_v8, %v8051_v53 }
 0x4e5   : > { %v10804_v46 = vpop.permute.xlu0 %8053  ;;  %6700 = vmatprep.subr.bf16.mxu0 %v10436_v61  ;;  %v8035_v61 = vunpack.i.l.bf16 %v10776_v18  ;;  %v8046_v57 = vunpack.i.h.bf16 %v10798_v56  ;;  %v3323_v41 = vsel %vm12131_vm7, %v8040_v15, %v8050_v19 }
 0x4e6   : > { %v8056_v33 = vunpack.i.h.bf16 %v10804_v46  ;;  %v8055_v34 = vunpack.i.l.bf16 %v10804_v46 }
 0x4e7   : > { %3946 = vmatmul.mubr.f32.gmra.mrb[22].mxu0 %v5646_v39  ;;  %v3329_v18 = vsel %vm12126_vm10, %v8035_v61, %v8030_v6  ;;  %v8045_v39 = vunpack.i.l.bf16 %v10798_v56  ;;  %vm12130_vm10 = vmmov %vm12119_vm1  ;;  %v5661_v56 = vld [vmem:[%s11947_s1 + $0x230] sm:$0xff] }
 0x4e8   : > { %v10822_v43 = vpop.permute.xlu1 %8058  ;;  %6702 = vmatpush1.bf16.msra.mxu0 %v10438_v20  ;;  %3951 = vmatprep.mubr.f32.mxu0 %v5652_v42  ;;  %v3320_v20 = vsel %vm12125_vm2, %v8021_v32, %v8026_v22  ;;  %v3321_v32 = vsel %vm12119_vm1, %v8030_v6, %v8035_v61  ;;  %v6715_v27 = vpack.c.bf16 %v3330_v37, %v3329_v18  ;;  %v5662_v22 = vld [vmem:[%s11947_s1 + $0x238] sm:$0xff]  ;;  %vm12129_vm2 = vmmov %vm12119_vm1  ;;  %v5667_v61 = vld [vmem:[%s11947_s1 + $0x260] sm:$0xff] }
 0x4e9   : > { %v10828_v11 = vpop.permute.xlu0 %8063  ;;  %6705 = vmatprep.subr.msk.bf16.mxu0 %vm8976_vm12, %v6703_v4  ;;  %v6712_v60 = vpack.c.bf16 %v3320_v20, %v3319_v31  ;;  %v3331_v4 = vsel %vm12129_vm2, %v8050_v19, %v8040_v15  ;;  %v3332_v42 = vsel %vm12130_vm10, %v8051_v53, %v8041_v8  ;;  %v6718_v46 = vpack.c.bf16 %v3322_v1, %v3321_v32  ;;  %vm12133_vm2 = vmmov %vm12132_vm13  ;;  %v5634_v19 = vld [vmem:[%s11947_s1 + $0x158] sm:$0xff] }
 0x4ea   : > { %v3405_v9 = vsel %vm12132_vm13, %v8055_v34, %v8045_v39  ;;  %v8061_v31 = vunpack.i.h.bf16 %v10822_v43  ;;  %v8066_v20 = vunpack.i.h.bf16 %v10828_v11  ;;  %v8065_v18 = vunpack.i.l.bf16 %v10828_v11  ;;  %vm12134_vm10 = vmmov %vm12133_vm2 }
 0x4eb   : > { %3952 = vmatmul.mubr.f32.gmra.mrb[24].mxu0 %v5651_v44  ;;  %v3406_v44 = vsel %vm12133_vm2, %v8056_v33, %v8046_v57  ;;  %v3397_v15 = vsel %vm12134_vm10, %v8045_v39, %v8055_v34  ;;  %vm12135_vm7 = vmmov %vm12133_vm2 }
 0x4ec   : > { %v10847_v25 = vpop.permute.xlu1 %8068  ;;  %6708 = vmatpush1.bf16.msk.msra.mxu0 %vm9218_vm4, %v6706_v48  ;;  %3957 = vmatprep.mubr.f32.mxu0 %v5657_v51  ;;  %v6721_v48 = vpack.c.bf16 %v3332_v42, %v3331_v4  ;;  %v8060_v51 = vunpack.i.l.bf16 %v10822_v43  ;;  %v6724_v43 = vpack.c.bf16 %v3324_v58, %v3323_v41  ;;  %v3398_v11 = vsel %vm12135_vm7, %v8046_v57, %v8056_v33  ;;  %vm12136_vm1 = vmmov %vm12133_vm2 }
 0x4ed   : > { %v10854_v26 = vpop.permute.xlu0 %8073  ;;  %6711 = vmatprep.subr.msk.bf16.mxu0 %vm8976_vm12, %v6709_v50  ;;  %v5666_v50 = vld [vmem:[%s11947_s1 + $0x258] sm:$0xff]  ;;  %v6727_v53 = vpack.c.bf16 %v3406_v44, %v3405_v9  ;;  %vm12137_vm13 = vmmov %vm12136_vm1 }
 0x4ee   : > { %v8076_v32 = vunpack.i.h.bf16 %v10854_v26  ;;  %v8075_v1 = vunpack.i.l.bf16 %v10854_v26  ;;  %vm12138_vm2 = vmmov %vm12136_vm1 }
 0x4ef   : > { %3958 = vmatmul.mubr.f32.gmra.mrb[26].mxu0 %v5656_v3  ;;  %v8071_v3 = vunpack.i.h.bf16 %v10847_v25  ;;  %v3399_v26 = vsel %vm12138_vm2, %v8060_v51, %v8065_v18  ;;  %vm12139_vm10 = vmmov %vm12136_vm1 }
 0x4f0   : > { %v10873_v54 = vpop.permute.xlu1 %8078  ;;  %6714 = vmatpush1.bf16.msk.msra.mxu0 %vm9218_vm4, %v6712_v60  ;;  %3963 = vmatprep.mubr.f32.mxu0 %v5662_v22  ;;  %v8070_v60 = vunpack.i.l.bf16 %v10847_v25  ;;  %v3408_v22 = vsel %vm12137_vm13, %v8066_v20, %v8061_v31  ;;  %v6730_v25 = vpack.c.bf16 %v3398_v11, %v3397_v15  ;;  %v3400_v33 = vsel %vm12139_vm10, %v8061_v31, %v8066_v20  ;;  %vm12140_vm7 = vmmov %vm12136_vm1 }
 0x4f1   : > { %v10880_v6 = vpop.permute.xlu0 %8088  ;;  %6717 = vmatprep.subr.msk.bf16.mxu0 %vm8976_vm12, %v6715_v27  ;;  %v3407_v27 = vsel %vm12136_vm1, %v8065_v18, %v8060_v51  ;;  %v3410_v4 = vsel %vm12136_vm1, %v8076_v32, %v8071_v3  ;;  %v6736_v44 = vpack.c.bf16 %v3400_v33, %v3399_v26  ;;  %vm12141_vm13 = vmmov %vm12136_vm1 }
 0x4f2   : > { %v3409_v34 = vsel %vm12140_vm7, %v8075_v1, %v8070_v60  ;;  %v6733_v42 = vpack.c.bf16 %v3408_v22, %v3407_v27  ;;  %v8091_v41 = vunpack.i.h.bf16 %v10880_v6  ;;  %vm12142_vm2 = vmmov %vm12136_vm1 }
 0x4f3   : > { %3964 = vmatmul.mubr.f32.gmra.mrb[28].mxu0 %v5661_v56  ;;  %v8081_v56 = vunpack.i.h.bf16 %v10873_v54  ;;  %v3402_v31 = vsel %vm12142_vm2, %v8071_v3, %v8076_v32  ;;  %vm12143_vm10 = vmmov %vm12136_vm1  ;;  %vm12146_vm2 = vcmp.lt.s32.totalorder %v8802_v45, 112 }
 0x4f4   : > { %v10899_v37 = vpop.permute.xlu1 %8083  ;;  %6720 = vmatpush1.bf16.msk.msra.mxu0 %vm9218_vm4, %v6718_v46  ;;  %3969 = vmatprep.mubr.f32.mxu0 %v5667_v61  ;;  %v8080_v46 = vunpack.i.l.bf16 %v10873_v54  ;;  %v8090_v61 = vunpack.i.l.bf16 %v10880_v6  ;;  %v6739_v54 = vpack.c.bf16 %v3410_v4, %v3409_v34  ;;  %vm12144_vm7 = vmmov %vm12136_vm1 }
 0x4f5   : > { %v10906_v8 = vpop.permute.xlu0 %8093  ;;  %6723 = vmatprep.subr.msk.bf16.mxu0 %vm8976_vm12, %v6721_v48  ;;  %v3401_v48 = vsel %vm12141_vm13, %v8070_v60, %v8075_v1  ;;  %v8086_v51 = vunpack.i.h.bf16 %v10899_v37  ;;  %v8085_v6 = vunpack.i.l.bf16 %v10899_v37  ;;  %vm12145_vm13 = vmmov %vm12136_vm1 }
 0x4f6   : > { %v8096_v20 = vunpack.i.h.bf16 %v10906_v8  ;;  %v8095_v18 = vunpack.i.l.bf16 %v10906_v8  ;;  %v3403_v37 = vsel %vm12136_vm1, %v8080_v46, %v8090_v61  ;;  %v3404_v8 = vsel %vm12145_vm13, %v8081_v56, %v8091_v41  ;;  %vm12149_vm1 = vmmov %vm12146_vm2 }
 0x4f7   : > { %3970 = vmatmul.mubr.f32.gmra.mrb[30].mxu0 %v5666_v50  ;;  %v3411_v50 = vsel %vm12143_vm10, %v8090_v61, %v8080_v46  ;;  %vm12147_vm10 = vmmov %vm12146_vm2 }
 0x4f8   : > { %v10925_v57 = vpop.permute.xlu1 %8098  ;;  %6726 = vmatpush1.bf16.msk.msra.mxu0 %vm9218_vm4, %v6724_v43  ;;  %4040 = vmatprep.mubr.f32.mxu0 %v5634_v19  ;;  %v3412_v43 = vsel %vm12144_vm7, %v8091_v41, %v8081_v56  ;;  %v3485_v3 = vsel %vm12146_vm2, %v8095_v18, %v8085_v6  ;;  %v3486_v60 = vsel %vm12147_vm10, %v8096_v20, %v8086_v51  ;;  %vm12148_vm7 = vmmov %vm12146_vm2 }
 0x4f9   : > { %v8104_v39 = vpop.permute.xlu0 %8103  ;;  %6729 = vmatprep.subr.msk.bf16.mxu0 %vm9325_vm3, %v6727_v53  ;;  %v6742_v53 = vpack.c.bf16 %v3402_v31, %v3401_v48  ;;  %v6745_v19 = vpack.c.bf16 %v3412_v43, %v3411_v50  ;;  %v8101_v32 = vunpack.i.h.bf16 %v10925_v57  ;;  %v8100_v1 = vunpack.i.l.bf16 %v10925_v57  ;;  %vm12150_vm13 = vmmov %vm12149_vm1 }
 0x4fa   : > { %v8106_v27 = vunpack.i.h.bf16 %v8104_v39  ;;  %v8105_v22 = vunpack.i.l.bf16 %v8104_v39  ;;  %v3477_v26 = vsel %vm12148_vm7, %v8085_v6, %v8095_v18  ;;  %v3478_v33 = vsel %vm12149_vm1, %v8086_v51, %v8096_v20  ;;  %vm12151_vm2 = vmmov %vm12149_vm1 }
 0x4fb   : > { %v6751_v34 = vpack.c.bf16 %v3486_v60, %v3485_v3  ;;  %vm12152_vm10 = vmmov %vm12149_vm1 }
 0x4fc   : > { %v8109_v58 = vpop.permute.xlu1 %8108  ;;  %6732 = vmatpush1.bf16.msk.msra.mxu0 %vm9048_vm0, %v6730_v25  ;;  %v6748_v25 = vpack.c.bf16 %v3404_v8, %v3403_v37  ;;  %v3487_v41 = vsel %vm12150_vm13, %v8105_v22, %v8100_v1  ;;  %v3488_v61 = vsel %vm12151_vm2, %v8106_v27, %v8101_v32  ;;  %vm12153_vm7 = vmmov %vm12149_vm1 }
 0x4fd   : > { %v8114_v9 = vpop.permute.xlu0 %8113  ;;  %6735 = vmatprep.subr.msk.bf16.mxu0 %vm9325_vm3, %v6733_v42  ;;  %v8111_v4 = vunpack.i.h.bf16 %v8109_v58  ;;  %v8110_v42 = vunpack.i.l.bf16 %v8109_v58  ;;  %v3479_v58 = vsel %vm12152_vm10, %v8100_v1, %v8105_v22  ;;  %v6756_v48 = vpack.c.bf16 %v3488_v61, %v3487_v41  ;;  %vm12154_vm13 = vmmov %vm12149_vm1 }
 0x4fe   : > { %v8116_v56 = vunpack.i.h.bf16 %v8114_v9  ;;  %v8115_v57 = vunpack.i.l.bf16 %v8114_v9  ;;  %v3480_v9 = vsel %vm12153_vm7, %v8101_v32, %v8106_v27  ;;  %vm12155_vm2 = vmmov %vm12149_vm1 }
 0x4ff   : > { %vm12156_vm10 = vmmov %vm12149_vm1 }
 0x500   : > { %6738 = vmatpush1.bf16.msk.msra.mxu0 %vm9048_vm0, %v6736_v44  ;;  %v8119_v15 = vpop.permute.xlu1 %8118  ;;  %v6754_v44 = vpack.c.bf16 %v3478_v33, %v3477_v26  ;;  %v3489_v31 = vsel %vm12149_vm1, %v8115_v57, %v8110_v42  ;;  %v3481_v37 = vsel %vm12155_vm2, %v8110_v42, %v8115_v57  ;;  %v3482_v8 = vsel %vm12156_vm10, %v8111_v4, %v8116_v56  ;;  %vm12157_vm7 = vmmov %vm12149_vm1 }
 0x501   : > { %v8124_v11 = vpop.permute.xlu0 %8123  ;;  %6741 = vmatprep.subr.msk.bf16.mxu0 %vm9325_vm3, %v6739_v54  ;;  %v3490_v54 = vsel %vm12154_vm13, %v8116_v56, %v8111_v4  ;;  %v8121_v51 = vunpack.i.h.bf16 %v8119_v15  ;;  %v8120_v6 = vunpack.i.l.bf16 %v8119_v15  ;;  %v6764_v27 = vpack.c.bf16 %v3482_v8, %v3481_v37  ;;  %vm12158_vm13 = vmmov %vm12149_vm1 }
 0x502   : > { %v8126_v20 = vunpack.i.h.bf16 %v8124_v11  ;;  %v8125_v18 = vunpack.i.l.bf16 %v8124_v11  ;;  %vm12159_vm2 = vmmov %vm12149_vm1  ;;  %vm12160_vm10 = vcmask 523264  }
 0x504   : > { %6744 = vmatpush1.bf16.msk.msra.mxu0 %vm9048_vm0, %v6742_v53  ;;  %v8129_v46 = vpop.permute.xlu1 %8128  ;;  %v6759_v53 = vpack.c.bf16 %v3480_v9, %v3479_v58  ;;  %v3491_v11 = vsel %vm12157_vm7, %v8125_v18, %v8120_v6  ;;  %v3492_v1 = vsel %vm12149_vm1, %v8126_v20, %v8121_v51  ;;  %v3483_v22 = vsel %vm12158_vm13, %v8120_v6, %v8125_v18  ;;  %vm12161_vm7 = vmmov %vm12160_vm10 }
 0x505   : > { %6747 = vmatprep.subr.msk.bf16.mxu0 %vm9325_vm3, %v6745_v19  ;;  %v8134_v39 = vpop.permute.xlu0 %8133  ;;  %v6761_v19 = vpack.c.bf16 %v3490_v54, %v3489_v31  ;;  %v8131_v3 = vunpack.i.h.bf16 %v8129_v46  ;;  %v8130_v60 = vunpack.i.l.bf16 %v8129_v46  ;;  %v6766_v26 = vpack.c.bf16 %v3492_v1, %v3491_v11  ;;  %vm12162_vm1 = vmmov %vm12161_vm7 }
 0x506   : > { %v8136_v32 = vunpack.i.h.bf16 %v8134_v39  ;;  %v8135_v15 = vunpack.i.l.bf16 %v8134_v39  ;;  %vm12163_vm13 = vmmov %vm12162_vm1 }
 0x508   : > { %6750 = vmatpush1.bf16.msk.msra.mxu0 %vm9048_vm0, %v6748_v25  ;;  %v8139_v50 = vpop.permute.xlu1 %8138  ;;  %v3484_v25 = vsel %vm12159_vm2, %v8121_v51, %v8126_v20  ;;  %v3565_v33 = vsel %vm953_vm15, %v8135_v15, %v8130_v60  ;;  %v3557_v61 = vsel %vm953_vm15, %v8130_v60, %v8135_v15  ;;  %v5633_v20 = vld [vmem:[%s11947_s1 + $0x150] sm:$0xff]  ;;  %vm12164_vm2 = vmmov %vm12162_vm1 }
 0x509   : > { %6753 = vmatprep.subr.msk.bf16.mxu0 %vm9396_vm11, %v6751_v34  ;;  %v8144_v43 = vpop.permute.xlu0 %8143  ;;  %v3566_v34 = vsel %vm953_vm15, %v8136_v32, %v8131_v3  ;;  %v8141_v56 = vunpack.i.h.bf16 %v8139_v50  ;;  %v8140_v57 = vunpack.i.l.bf16 %v8139_v50  ;;  %v6769_v41 = vpack.c.bf16 %v3484_v25, %v3483_v22  ;;  %v5644_v22 = vld [vmem:[%s11947_s1 + $0x1a8] sm:$0xff] }
 0x50a   : > { %v8146_v46 = vunpack.i.h.bf16 %v8144_v43  ;;  %v8145_v39 = vunpack.i.l.bf16 %v8144_v43  ;;  %v6771_v58 = vpack.c.bf16 %v3566_v34, %v3565_v33  ;;  %v5639_v43 = vld [vmem:[%s11947_s1 + $0x180] sm:$0xff] }
 0x50c   : > { %6755 = vmatpush1.bf16.msra.mxu0 %v6754_v44  ;;  %v8149_v4 = vpop.permute.xlu1 %8148  ;;  %v3558_v44 = vsel %vm953_vm15, %v8131_v3, %v8136_v32  ;;  %v3567_v51 = vsel %vm953_vm15, %v8145_v39, %v8140_v57  ;;  %v3568_v6 = vsel %vm953_vm15, %v8146_v46, %v8141_v56  ;;  %v3559_v37 = vsel %vm953_vm15, %v8140_v57, %v8145_v39  ;;  %v5649_v57 = vld [vmem:[%s11947_s1 + $0x1d0] sm:$0xff] }
 0x50d   : > { %6758 = vmatprep.subr.msk.bf16.mxu0 %vm9396_vm11, %v6756_v48  ;;  %v8154_v42 = vpop.permute.xlu0 %8153  ;;  %v8151_v9 = vunpack.i.h.bf16 %v8149_v4  ;;  %v8150_v48 = vunpack.i.l.bf16 %v8149_v4  ;;  %v3560_v8 = vsel %vm953_vm15, %v8141_v56, %v8146_v46  ;;  %v5643_v56 = vld [vmem:[%s11947_s1 + $0x1a0] sm:$0xff] }
 0x50e   : > { %v8156_v31 = vunpack.i.h.bf16 %v8154_v42  ;;  %v8155_v54 = vunpack.i.l.bf16 %v8154_v42  ;;  %v6780_v25 = vpack.c.bf16 %v3560_v8, %v3559_v37  ;;  %v5650_v37 = vld [vmem:[%s11947_s1 + $0x1d8] sm:$0xff]  ;;  %v5655_v8 = vld [vmem:[%s11947_s1 + $0x200] sm:$0xff] }
 0x510   : > { %6760 = vmatpush1.bf16.msra.mxu0 %v6759_v53  ;;  %v8159_v18 = vpop.permute.xlu1 %8158  ;;  %v6774_v53 = vpack.c.bf16 %v3558_v44, %v3557_v61  ;;  %v3569_v3 = vsel %vm953_vm15, %v8155_v54, %v8150_v48  ;;  %v3570_v60 = vsel %vm953_vm15, %v8156_v31, %v8151_v9  ;;  %v3562_v33 = vsel %vm953_vm15, %v8151_v9, %v8156_v31  ;;  %v5648_v44 = vld [vmem:[%s11947_s1 + $0x1c8] sm:$0xff]  ;;  %v5659_v31 = vld [vmem:[%s11947_s1 + $0x220] sm:$0xff] }
 0x511   : > { %6763 = vmatprep.subr.msk.bf16.mxu0 %vm9396_vm11, %v6761_v19  ;;  %v8164_v50 = vpop.permute.xlu0 %8163  ;;  %v6777_v19 = vpack.c.bf16 %v3568_v6, %v3567_v51  ;;  %v8161_v32 = vunpack.i.h.bf16 %v8159_v18  ;;  %v8160_v15 = vunpack.i.l.bf16 %v8159_v18  ;;  %v6783_v34 = vpack.c.bf16 %v3570_v60, %v3569_v3  ;;  %v5664_v51 = vld [vmem:[%s11947_s1 + $0x248] sm:$0xff]  ;;  %v5663_v6 = vld [vmem:[%s11947_s1 + $0x240] sm:$0xff]  ;;  %v5665_v3 = vld [vmem:[%s11947_s1 + $0x250] sm:$0xff] }
 0x512   : > { %v8166_v11 = vunpack.i.h.bf16 %v8164_v50  ;;  %v8165_v1 = vunpack.i.l.bf16 %v8164_v50  ;;  %v5668_v18 = vld [vmem:[%s11947_s1 + $0x268] sm:$0xff]  ;;  %v5635_v50 = vld [vmem:[%s11947_s1 + $0x160] sm:$0xff]  ;;  %v5670_v60 = vld [vmem:[%s11947_s1 + $0x278] sm:$0xff] }
 0x514   : > { %6765 = vmatpush1.bf16.msra.mxu0 %v6764_v27  ;;  %v5638_v27 = vld [vmem:[%s11947_s1 + $0x178] sm:$0xff]  ;;  %v3571_v4 = vsel %vm953_vm15, %v8165_v1, %v8160_v15  ;;  %v3572_v42 = vsel %vm953_vm15, %v8166_v11, %v8161_v32  ;;  %v3563_v39 = vsel %vm953_vm15, %v8160_v15, %v8165_v1 }
 0x515   : > { %6768 = vmatprep.subr.msk.bf16.mxu0 %vm9396_vm11, %v6766_v26  ;;  %v3561_v26 = vsel %vm953_vm15, %v8150_v48, %v8155_v54  ;;  %v6789_v61 = vpack.c.bf16 %v3572_v42, %v3571_v4  ;;  %v5653_v48 = vld [vmem:[%s11947_s1 + $0x1f0] sm:$0xff]  ;;  %v5658_v54 = vld [vmem:[%s11947_s1 + $0x218] sm:$0xff] }
 0x516   : > { %v6786_v46 = vpack.c.bf16 %v3562_v33, %v3561_v26 }
 0x518   : > { %6770 = vmatpush1.bf16.msra.mxu0 %v6769_v41  ;;  %v3564_v41 = vsel %vm953_vm15, %v8161_v32, %v8166_v11 }
 0x519   : > { %6773 = vmatprep.subr.msk.bf16.mxu0 %vm9443_vm9, %v6771_v58  ;;  %v5654_v58 = vld [vmem:[%s11947_s1 + $0x1f8] sm:$0xff]  ;;  %v6792_v9 = vpack.c.bf16 %v3564_v41, %v3563_v39 }
 0x51b   : > { %4041 = vmatmul.mubr.f32.vlgmr.msra.gmra.mrb[16].mxu0 %v5633_v20  ;;  %v5669_v20 = vld [vmem:[%s11947_s1 + $0x270] sm:$0xff] }
 0x51c   : > { %6776 = vmatpush1.bf16.msk.msra.mxu0 %vm9218_vm4, %v6774_v53  ;;  %4046 = vmatprep.mubr.f32.mxu0 %v5639_v43  ;;  %v5640_v43 = vld [vmem:[%s11947_s1 + $0x188] sm:$0xff]  ;;  %v5645_v53 = vld [vmem:[%s11947_s1 + $0x1b0] sm:$0xff] }
 0x51d   : > { %6779 = vmatprep.subr.msk.bf16.mxu0 %vm9443_vm9, %v6777_v19  ;;  %v5660_v19 = vld [vmem:[%s11947_s1 + $0x228] sm:$0xff] }
 0x51f   : > { %4047 = vmatmul.mubr.f32.gmra.mrb[18].mxu0 %v5638_v27 }
 0x520   : > { %6782 = vmatpush1.bf16.msk.msra.mxu0 %vm9218_vm4, %v6780_v25  ;;  %4052 = vmatprep.mubr.f32.mxu0 %v5644_v22 }
 0x521   : > { %6785 = vmatprep.subr.msk.bf16.mxu0 %vm9443_vm9, %v6783_v34  ;;  %v3802_v11 = vpop.permute.xlu1 %3801 }
 0x522   : > { %v3807_v27 = vpop.permute.xlu0 %3806 }
 0x523   : > { %4053 = vmatmul.mubr.f32.gmra.mrb[20].mxu0 %v5643_v56 }
 0x524   : > { %6788 = vmatpush1.bf16.msk.msra.mxu0 %vm9218_vm4, %v6786_v46  ;;  %4058 = vmatprep.mubr.f32.mxu0 %v5649_v57 }
 0x525   : > { %6791 = vmatprep.subr.msk.bf16.mxu0 %vm9443_vm9, %v6789_v61  ;;  %v3812_v61 = vpop.permute.xlu1 %3811 }
 0x527   : > { %4059 = vmatmul.mubr.f32.gmra.mrb[22].mxu0 %v5648_v44 }
 0x528   : > { %6794 = vmatpush1.bf16.msk.msra.mxu0 %vm9218_vm4, %v6792_v9  ;;  %4064 = vmatprep.mubr.f32.mxu0 %v5654_v58  ;;  %v3817_v9 = vpop.permute.xlu0 %3816 }
 0x52b   : > { %4065 = vmatmul.mubr.f32.gmra.mrb[24].mxu0 %v5653_v48 }
 0x52c   : > { %4070 = vmatprep.mubr.f32.mxu0 %v5659_v31 }
 0x52f   : > { %4071 = vmatmul.mubr.f32.gmra.mrb[26].mxu0 %v5658_v54 }
 0x530   : > { %4076 = vmatprep.mubr.f32.mxu0 %v5664_v51 }
 0x533   : > { %4077 = vmatmul.mubr.f32.gmra.mrb[28].mxu0 %v5663_v6 }
 0x534   : > { %4082 = vmatprep.mubr.f32.mxu0 %v5669_v20 }
 0x537   : > { %4083 = vmatmul.mubr.f32.gmra.mrb[30].mxu0 %v5668_v18 }
 0x538   : > { %4153 = vmatprep.mubr.f32.mxu0 %v8520_v21 }
 0x53b   : > { %5679 = vmatmul.mubr.msk.f32.vlgmr.msra.gmra.mrb[16].mxu0 %vm12160_vm10, %v5635_v50  ;;  %vm12165_vm10 = vmmov %vm12162_vm1 }
 0x53c   : > { %4159 = vmatprep.mubr.f32.mxu0 %v8520_v21 }
 0x53f   : > { %5680 = vmatmul.mubr.msk.f32.gmra.mrb[18].mxu0 %vm12161_vm7, %v5640_v43  ;;  %vm12166_vm7 = vmmov %vm12162_vm1 }
 0x540   : > { %4165 = vmatprep.mubr.f32.mxu0 %v8520_v21 }
 0x543   : > { %5681 = vmatmul.mubr.msk.f32.gmra.mrb[20].mxu0 %vm12162_vm1, %v5645_v53 }
 0x544   : > { %4171 = vmatprep.mubr.f32.mxu0 %v8520_v21 }
 0x547   : > { %5682 = vmatmul.mubr.msk.f32.gmra.mrb[22].mxu0 %vm12163_vm13, %v5650_v37  ;;  %vm12167_vm13 = vcmp.lt.s32.totalorder %v8802_v45, 17 }
 0x548   : > { %4177 = vmatprep.mubr.f32.mxu0 %v8520_v21 }
 0x54b   : > { %5683 = vmatmul.mubr.msk.f32.gmra.mrb[24].mxu0 %vm12164_vm2, %v5655_v8  ;;  %vm12168_vm2 = vmmov %vm12167_vm13 }
 0x54c   : > { %4183 = vmatprep.mubr.f32.mxu0 %v8520_v21 }
 0x54f   : > { %5684 = vmatmul.mubr.msk.f32.gmra.mrb[26].mxu0 %vm12165_vm10, %v5660_v19  ;;  %vm12169_vm10 = vmmov %vm12168_vm2 }
 0x550   : > { %4189 = vmatprep.mubr.f32.mxu0 %v8520_v21 }
 0x553   : > { %5685 = vmatmul.mubr.msk.f32.gmra.mrb[28].mxu0 %vm12166_vm7, %v5665_v3  ;;  %vm12170_vm7 = vmmov %vm12168_vm2 }
 0x554   : > { %4195 = vmatprep.mubr.f32.mxu0 %v8520_v21 }
 0x557   : > { %5686 = vmatmul.mubr.msk.f32.gmra.mrb[30].mxu0 %vm12162_vm1, %v5670_v60  ;;  %v3822_v60 = vpop.permute.xlu1 %3821  ;;  %vm12171_vm1 = vmmov %vm12168_vm2 }
 0x60e   : > { %v4155_v32 = vpop.f32.mrb[16].mxu0 }
 0x60f   : > { %v4157_v15 = vpop.f32.mrb[17].mxu0  ;;  %v7027_v1 = vadd.f32 %v4155_v32, %v3802_v11 }
 0x610   : > { %v7028_v22 = vadd.f32 %v4157_v15, %v3802_v11  ;;  %v3827_v11 = vpop.permute.xlu0 %3826 }
 0x611   : > { %v4202_v4 = vmax.f32 %v7027_v1, 0.0 }
 0x612   : > { %v4161_v25 = vpop.f32.mrb[18].mxu0  ;;  %v4203_v56 = vmax.f32 %v7028_v22, 0.0 }
 0x613   : > { %v7029_v26 = vadd.f32 %v4161_v25, %v3807_v27  ;;  %v4163_v33 = vpop.f32.mrb[19].mxu0 }
 0x614   : > { %v7030_v34 = vadd.f32 %v4163_v33, %v3807_v27 }
 0x615   : > { %v4204_v42 = vmax.f32 %v7029_v26, 0.0 }
 0x616   : > { %v4205_v57 = vmax.f32 %v7030_v34, 0.0  ;;  %v4167_v46 = vpop.f32.mrb[20].mxu0 }
 0x617   : > { %v4169_v39 = vpop.f32.mrb[21].mxu0  ;;  %v11148_v41 = vpack.i.bf16 %v4204_v42, %v4202_v4  ;;  %v7031_v58 = vadd.f32 %v4167_v46, %v3812_v61  ;;  %v11158_v18 = vpack.c.bf16 %v4204_v42, %v4202_v4 }
 0x618   : > { %v11150_v44 = vpack.i.bf16 %v4205_v57, %v4203_v56  ;;  %v7032_v48 = vadd.f32 %v4169_v39, %v3812_v61  ;;  %v11156_v20 = vpack.c.bf16 %v4205_v57, %v4203_v56 }
 0x619   : > { %8168 = vrot.lane.b32.xlu1 %v11148_v41, %s8511_s24  ;;  %v4206_v50 = vmax.f32 %v7031_v58, 0.0  ;;  %v3832_v58 = vpop.permute.xlu1 %3831 }
 0x61a   : > { %v4173_v31 = vpop.f32.mrb[22].mxu0  ;;  %8173 = vrot.lane.b32.xlu0 %v11150_v44, %s8511_s24  ;;  %v4207_v53 = vmax.f32 %v7032_v48, 0.0 }
 0x61b   : > { %v7033_v54 = vadd.f32 %v4173_v31, %v3817_v9  ;;  %v4175_v51 = vpop.f32.mrb[23].mxu0  ;;  %v3837_v31 = vpop.permute.xlu0 %3836 }
 0x61c   : > { %v7034_v6 = vadd.f32 %v4175_v51, %v3817_v9 }
 0x61d   : > { %v4208_v43 = vmax.f32 %v7033_v54, 0.0 }
 0x61e   : > { %v4209_v37 = vmax.f32 %v7034_v6, 0.0  ;;  %v4179_v8 = vpop.f32.mrb[24].mxu0 }
 0x61f   : > { %v4181_v19 = vpop.f32.mrb[25].mxu0  ;;  %v11160_v3 = vpack.i.bf16 %v4208_v43, %v4206_v50  ;;  %v7035_v15 = vadd.f32 %v4179_v8, %v3822_v60  ;;  %v11170_v34 = vpack.c.bf16 %v4208_v43, %v4206_v50 }
 0x620   : > { %v11162_v32 = vpack.i.bf16 %v4209_v37, %v4207_v53  ;;  %v7036_v1 = vadd.f32 %v4181_v19, %v3822_v60  ;;  %v11168_v33 = vpack.c.bf16 %v4209_v37, %v4207_v53 }
 0x621   : > { %8178 = vrot.lane.b32.xlu1 %v11160_v3, %s8511_s24  ;;  %v4210_v4 = vmax.f32 %v7035_v15, 0.0 }
 0x622   : > { %v4185_v27 = vpop.f32.mrb[26].mxu0  ;;  %8183 = vrot.lane.b32.xlu0 %v11162_v32, %s8511_s24  ;;  %v4211_v56 = vmax.f32 %v7036_v1, 0.0 }
 0x623   : > { %v7037_v22 = vadd.f32 %v4185_v27, %v3827_v11  ;;  %v4187_v25 = vpop.f32.mrb[27].mxu0 }
 0x624   : > { %v7038_v26 = vadd.f32 %v4187_v25, %v3827_v11  ;;  %v5688_v25 = vld [vmem:[%s11949_s3 + $0x148] sm:$0xff] }
 0x625   : > { %v4212_v42 = vmax.f32 %v7037_v22, 0.0  ;;  %5212 = vmatprep.mubr.f32.mxu1 %v5688_v25 }
 0x626   : > { %v4213_v57 = vmax.f32 %v7038_v26, 0.0  ;;  %v4191_v46 = vpop.f32.mrb[28].mxu0 }
 0x627   : > { %v4193_v39 = vpop.f32.mrb[29].mxu0  ;;  %v11172_v61 = vpack.i.bf16 %v4212_v42, %v4210_v4  ;;  %v7039_v48 = vadd.f32 %v4191_v46, %v3832_v58  ;;  %v11182_v37 = vpack.c.bf16 %v4212_v42, %v4210_v4 }
 0x628   : > { %v11174_v9 = vpack.i.bf16 %v4213_v57, %v4211_v56  ;;  %v7040_v54 = vadd.f32 %v4193_v39, %v3832_v58  ;;  %v11180_v53 = vpack.c.bf16 %v4213_v57, %v4211_v56 }
 0x629   : > { %8188 = vrot.lane.b32.xlu1 %v11172_v61, %s8511_s24  ;;  %v4214_v8 = vmax.f32 %v7039_v48, 0.0 }
 0x62a   : > { %v4197_v51 = vpop.f32.mrb[30].mxu0  ;;  %8193 = vrot.lane.b32.xlu0 %v11174_v9, %s8511_s24  ;;  %v4215_v60 = vmax.f32 %v7040_v54, 0.0 }
 0x62b   : > { %v7041_v6 = vadd.f32 %v4197_v51, %v3837_v31  ;;  %v4199_v50 = vpop.f32.mrb[31].mxu0 }
 0x62c   : > { %v7042_v43 = vadd.f32 %v4199_v50, %v3837_v31 }
 0x62d   : > { %v4216_v19 = vmax.f32 %v7041_v6, 0.0 }
 0x62e   : > { %v4217_v15 = vmax.f32 %v7042_v43, 0.0 }
 0x62f   : > { %v11184_v11 = vpack.i.bf16 %v4216_v19, %v4214_v8  ;;  %v11194_v22 = vpack.c.bf16 %v4216_v19, %v4214_v8 }
 0x630   : > { %v11186_v1 = vpack.i.bf16 %v4217_v15, %v4215_v60  ;;  %v11192_v27 = vpack.c.bf16 %v4217_v15, %v4215_v60 }
 0x631   : > { %8198 = vrot.lane.b32.xlu1 %v11184_v11, %s8511_s24 }
 0x632   : > { %8208 = vrot.lane.b32.xlu0 %v11186_v1, %s8511_s24 }
 0x635   : > { %8203 = vrot.lane.b32.xlu1 %v11148_v41, %s8512_s25 }
 0x636   : > { %8213 = vrot.lane.b32.xlu0 %v11150_v44, %s8512_s25 }
 0x639   : > { %8218 = vrot.lane.b32.xlu1 %v11160_v3, %s8512_s25 }
 0x63a   : > { %8223 = vrot.lane.b32.xlu0 %v11162_v32, %s8512_s25 }
 0x63d   : > { %8228 = vrot.lane.b32.xlu1 %v11172_v61, %s8512_s25 }
 0x63e   : > { %8233 = vrot.lane.b32.xlu0 %v11174_v9, %s8512_s25 }
 0x641   : > { %8238 = vrot.lane.b32.xlu1 %v11184_v11, %s8512_s25 }
 0x642   : > { %8248 = vrot.lane.b32.xlu0 %v11186_v1, %s8512_s25 }
 0x645   : > { %8243 = vrot.lane.b32.xlu1 %v11148_v41, %s8513_s26 }
 0x646   : > { %8253 = vrot.lane.b32.xlu0 %v11150_v44, %s8513_s26 }
 0x649   : > { %8258 = vrot.lane.b32.xlu1 %v11160_v3, %s8513_s26 }
 0x64a   : > { %8263 = vrot.lane.b32.xlu0 %v11162_v32, %s8513_s26 }
 0x64d   : > { %8268 = vrot.lane.b32.xlu1 %v11172_v61, %s8513_s26 }
 0x64e   : > { %8273 = vrot.lane.b32.xlu0 %v11174_v9, %s8513_s26 }
 0x651   : > { %8278 = vrot.lane.b32.xlu1 %v11184_v11, %s8513_s26 }
 0x652   : > { %8288 = vrot.lane.b32.xlu0 %v11186_v1, %s8513_s26 }
 0x655   : > { %8283 = vrot.lane.b32.xlu1 %v11148_v41, %s8514_s27 }
 0x656   : > { %8293 = vrot.lane.b32.xlu0 %v11150_v44, %s8514_s27 }
 0x659   : > { %8298 = vrot.lane.b32.xlu1 %v11160_v3, %s8514_s27 }
 0x65a   : > { %8303 = vrot.lane.b32.xlu0 %v11162_v32, %s8514_s27 }
 0x65d   : > { %8308 = vrot.lane.b32.xlu1 %v11172_v61, %s8514_s27 }
 0x65e   : > { %8313 = vrot.lane.b32.xlu0 %v11174_v9, %s8514_s27 }
 0x661   : > { %8318 = vrot.lane.b32.xlu1 %v11184_v11, %s8514_s27 }
 0x662   : > { %8323 = vrot.lane.b32.xlu0 %v11186_v1, %s8514_s27 }
 0x665   : > { %8328 = vrot.lane.b32.xlu1 %v11148_v41, %s8515_s30 }
 0x666   : > { %8333 = vrot.lane.b32.xlu0 %v11150_v44, %s8515_s30 }
 0x669   : > { %8338 = vrot.lane.b32.xlu1 %v11160_v3, %s8515_s30 }
 0x66a   : > { %8343 = vrot.lane.b32.xlu0 %v11162_v32, %s8515_s30 }
 0x66d   : > { %8348 = vrot.lane.b32.xlu1 %v11172_v61, %s8515_s30 }
 0x66e   : > { %8353 = vrot.lane.b32.xlu0 %v11174_v9, %s8515_s30 }
 0x671   : > { %8358 = vrot.lane.b32.xlu1 %v11184_v11, %s8515_s30 }
 0x672   : > { %8368 = vrot.lane.b32.xlu0 %v11186_v1, %s8515_s30 }
 0x675   : > { %8363 = vrot.lane.b32.xlu1 %v11148_v41, %s8516_s6 }
 0x676   : > { %8373 = vrot.lane.b32.xlu0 %v11150_v44, %s8516_s6 }
 0x679   : > { %8378 = vrot.lane.b32.xlu1 %v11160_v3, %s8516_s6 }
 0x67a   : > { %8383 = vrot.lane.b32.xlu0 %v11162_v32, %s8516_s6 }
 0x67d   : > { %8388 = vrot.lane.b32.xlu1 %v11172_v61, %s8516_s6 }
 0x67e   : > { %8393 = vrot.lane.b32.xlu0 %v11174_v9, %s8516_s6 }
 0x681   : > { %8398 = vrot.lane.b32.xlu1 %v11184_v11, %s8516_s6 }
 0x682   : > { %8408 = vrot.lane.b32.xlu0 %v11186_v1, %s8516_s6 }
 0x685   : > { %8403 = vrot.lane.b32.xlu1 %v11148_v41, %s8517_s7 }
 0x686   : > { %8413 = vrot.lane.b32.xlu0 %v11150_v44, %s8517_s7 }
 0x689   : > { %8418 = vrot.lane.b32.xlu1 %v11160_v3, %s8517_s7 }
 0x68a   : > { %8423 = vrot.lane.b32.xlu0 %v11162_v32, %s8517_s7 }
 0x68b   : > { %v8169_v26 = vpop.permute.xlu1 %8168 }
 0x68c   : > { %v8171_v4 = vunpack.i.h.bf16 %v8169_v26  ;;  %v8170_v42 = vunpack.i.l.bf16 %v8169_v26  ;;  %v8174_v56 = vpop.permute.xlu0 %8173 }
 0x68d   : > { %v8176_v57 = vunpack.i.h.bf16 %v8174_v56  ;;  %v8175_v46 = vunpack.i.l.bf16 %v8174_v56  ;;  %8428 = vrot.lane.b32.xlu1 %v11172_v61, %s8517_s7 }
 0x68e   : > { %8433 = vrot.lane.b32.xlu0 %v11174_v9, %s8517_s7 }
 0x68f   : > { %v4250_v39 = vsel %vm12167_vm13, %v8170_v42, %v8175_v46  ;;  %v4251_v58 = vsel %vm12168_vm2, %v8171_v4, %v8176_v57  ;;  %v4258_v48 = vsel %vm12169_vm10, %v8175_v46, %v8170_v42  ;;  %v4259_v31 = vsel %vm12170_vm7, %v8176_v57, %v8171_v4  ;;  %vm12172_vm13 = vmmov %vm12171_vm1 }
 0x690   : > { %v6795_v54 = vpack.c.bf16 %v4251_v58, %v4250_v39  ;;  %v6798_v51 = vpack.c.bf16 %v4259_v31, %v4258_v48  ;;  %vm12173_vm2 = vmmov %vm12171_vm1 }
 0x691   : > { %8438 = vrot.lane.b32.xlu1 %v11184_v11, %s8517_s7  ;;  %vm12174_vm10 = vmmov %vm12171_vm1 }
 0x692   : > { %8443 = vrot.lane.b32.xlu0 %v11186_v1, %s8517_s7  ;;  %6797 = vmatprep.subr.msk.bf16.mxu1 %vm8854_vm5, %v6795_v54  ;;  %vm12175_vm7 = vmmov %vm12171_vm1 }
 0x693   : > { %v8179_v6 = vpop.permute.xlu1 %8178  ;;  %6800 = vmatpush1.bf16.msk.msra.mxu1 %vm8862_vm6, %v6798_v51 }
 0x694   : > { %v8181_v50 = vunpack.i.h.bf16 %v8179_v6  ;;  %v8180_v43 = vunpack.i.l.bf16 %v8179_v6  ;;  %v8184_v8 = vpop.permute.xlu0 %8183  ;;  %v5728_v6 = vld [vmem:[%s11950_s4 + $0x48] sm:$0xff] }
 0x695   : > { %v8186_v19 = vunpack.i.h.bf16 %v8184_v8  ;;  %v8185_v60 = vunpack.i.l.bf16 %v8184_v8  ;;  %8448 = vrot.lane.b32.xlu1 %v11148_v41, %s8518_s8 }
 0x696   : > { %8453 = vrot.lane.b32.xlu0 %v11150_v44, %s8518_s8 }
 0x697   : > { %v4252_v15 = vsel %vm12171_vm1, %v8180_v43, %v8185_v60  ;;  %v4253_v25 = vsel %vm12172_vm13, %v8181_v50, %v8186_v19  ;;  %v4260_v26 = vsel %vm12173_vm2, %v8185_v60, %v8180_v43  ;;  %v4261_v4 = vsel %vm12174_vm10, %v8186_v19, %v8181_v50  ;;  %vm12176_vm13 = vmmov %vm12171_vm1  ;;  %v5729_v19 = vld [vmem:[%s11950_s4 + $0x50] sm:$0xff] }
 0x698   : > { %v6801_v42 = vpack.c.bf16 %v4253_v25, %v4252_v15  ;;  %v6804_v56 = vpack.c.bf16 %v4261_v4, %v4260_v26  ;;  %vm12177_vm2 = vmmov %vm12171_vm1 }
 0x699   : > { %8458 = vrot.lane.b32.xlu1 %v11160_v3, %s8518_s8  ;;  %vm12178_vm10 = vmmov %vm12171_vm1 }
 0x69a   : > { %8463 = vrot.lane.b32.xlu0 %v11162_v32, %s8518_s8  ;;  %6803 = vmatprep.subr.msk.bf16.mxu1 %vm8854_vm5, %v6801_v42  ;;  %v5730_v42 = vld [vmem:[%s11950_s4 + $0x58] sm:$0xff] }
 0x69b   : > { %v8189_v41 = vpop.permute.xlu1 %8188  ;;  %6806 = vmatpush1.bf16.msk.msra.mxu1 %vm8862_vm6, %v6804_v56 }
 0x69c   : > { %v8191_v44 = vunpack.i.h.bf16 %v8189_v41  ;;  %v8190_v57 = vunpack.i.l.bf16 %v8189_v41  ;;  %v8194_v46 = vpop.permute.xlu0 %8193 }
 0x69d   : > { %v8196_v39 = vunpack.i.h.bf16 %v8194_v46  ;;  %v8195_v58 = vunpack.i.l.bf16 %v8194_v46  ;;  %8468 = vrot.lane.b32.xlu1 %v11172_v61, %s8518_s8  ;;  %v5727_v61 = vld [vmem:[%s11950_s4 + $0x40] sm:$0xff] }
 0x69e   : > { %8473 = vrot.lane.b32.xlu0 %v11174_v9, %s8518_s8 }
 0x69f   : > { %v4254_v3 = vsel %vm12175_vm7, %v8190_v57, %v8195_v58  ;;  %v4255_v32 = vsel %vm12171_vm1, %v8191_v44, %v8196_v39  ;;  %v4262_v48 = vsel %vm12176_vm13, %v8195_v58, %v8190_v57  ;;  %v4263_v31 = vsel %vm12177_vm2, %v8196_v39, %v8191_v44  ;;  %vm12179_vm7 = vmmov %vm12171_vm1 }
 0x6a0   : > { %v6807_v54 = vpack.c.bf16 %v4255_v32, %v4254_v3  ;;  %v6810_v51 = vpack.c.bf16 %v4263_v31, %v4262_v48  ;;  %vm12180_vm13 = vmmov %vm12171_vm1  ;;  %v5731_v3 = vld [vmem:[%s11950_s4 + $0x60] sm:$0xff]  ;;  %vm12181_vm2 = vcmp.lt.s32.totalorder %v8802_v45, 16 }
 0x6a1   : > { %8478 = vrot.lane.b32.xlu1 %v11184_v11, %s8518_s8 }
 0x6a2   : > { %8483 = vrot.lane.b32.xlu0 %v11186_v1, %s8518_s8  ;;  %6809 = vmatprep.subr.msk.bf16.mxu1 %vm8854_vm5, %v6807_v54  ;;  %v5732_v54 = vld [vmem:[%s11950_s4 + $0x68] sm:$0xff] }
 0x6a3   : > { %v8199_v9 = vpop.permute.xlu1 %8198  ;;  %6812 = vmatpush1.bf16.msk.msra.mxu1 %vm8862_vm6, %v6810_v51 }
 0x6a4   : > { %v8201_v50 = vunpack.i.h.bf16 %v8199_v9  ;;  %v8200_v11 = vunpack.i.l.bf16 %v8199_v9  ;;  %v8209_v43 = vpop.permute.xlu0 %8208 }
 0x6a5   : > { %v8211_v8 = vunpack.i.h.bf16 %v8209_v43  ;;  %v8210_v1 = vunpack.i.l.bf16 %v8209_v43  ;;  %5086 = vperm.xlu1 %7526, %v5727_v61  }
 0x6a6   : > { %5091 = vperm.xlu0 %7525, %v5728_v6  }
 0x6a7   : > { %v4256_v60 = vsel %vm12178_vm10, %v8200_v11, %v8210_v1  ;;  %v4257_v15 = vsel %vm12179_vm7, %v8201_v50, %v8211_v8  ;;  %v4264_v25 = vsel %vm12171_vm1, %v8210_v1, %v8200_v11  ;;  %v4265_v26 = vsel %vm12180_vm13, %v8211_v8, %v8201_v50  ;;  %v8204_v4 = vpop.permute.xlu1 %8203  ;;  %vm12182_vm10 = vmmov %vm12181_vm2 }
 0x6a8   : > { %v6813_v56 = vpack.c.bf16 %v4257_v15, %v4256_v60  ;;  %v6816_v41 = vpack.c.bf16 %v4265_v26, %v4264_v25  ;;  %v8206_v44 = vunpack.i.h.bf16 %v8204_v4  ;;  %v8205_v57 = vunpack.i.l.bf16 %v8204_v4  ;;  %v8214_v46 = vpop.permute.xlu0 %8213  ;;  %vm12183_vm7 = vmmov %vm12181_vm2  ;;  %v5734_v25 = vld [vmem:[%s11950_s4 + $0x78] sm:$0xff] }
 0x6a9   : > { %v8216_v39 = vunpack.i.h.bf16 %v8214_v46  ;;  %v8215_v58 = vunpack.i.l.bf16 %v8214_v46  ;;  %5096 = vperm.xlu1 %7526, %v5729_v19   ;;  %vm12184_vm1 = vmmov %vm12181_vm2 }
 0x6aa   : > { %5101 = vperm.xlu0 %7525, %v5730_v42   ;;  %6815 = vmatprep.subr.msk.bf16.mxu1 %vm8854_vm5, %v6813_v56  ;;  %vm12186_vm13 = vmmov %vm12184_vm1 }
 0x6ab   : > { %v4338_v32 = vsel %vm12181_vm2, %v8215_v58, %v8205_v57  ;;  %v4339_v48 = vsel %vm12182_vm10, %v8216_v39, %v8206_v44  ;;  %v8219_v31 = vpop.permute.xlu1 %8218  ;;  %6818 = vmatpush1.bf16.msk.msra.mxu1 %vm8862_vm6, %v6816_v41  ;;  %v4330_v51 = vsel %vm12183_vm7, %v8205_v57, %v8215_v58  ;;  %v4331_v61 = vsel %vm12184_vm1, %v8206_v44, %v8216_v39  ;;  %vm12185_vm6 = vmmov %vm12184_vm1 }
 0x6ac   : > { %v6821_v9 = vpack.c.bf16 %v4339_v48, %v4338_v32  ;;  %v8221_v6 = vunpack.i.h.bf16 %v8219_v31  ;;  %v8220_v50 = vunpack.i.l.bf16 %v8219_v31  ;;  %v8224_v11 = vpop.permute.xlu0 %8223  ;;  %v6819_v43 = vpack.c.bf16 %v4331_v61, %v4330_v51  ;;  %vm12187_vm2 = vmmov %vm12184_vm1 }
 0x6ad   : > { %v8226_v8 = vunpack.i.h.bf16 %v8224_v11  ;;  %v8225_v1 = vunpack.i.l.bf16 %v8224_v11  ;;  %5106 = vperm.xlu1 %7526, %v5731_v3   ;;  %vm12188_vm10 = vmmov %vm12184_vm1 }
 0x6ae   : > { %5111 = vperm.xlu0 %7525, %v5732_v54   ;;  %6820 = vmatprep.subr.bf16.mxu1 %v6819_v43  ;;  %vm12189_vm7 = vmmov %vm12184_vm1 }
 0x6af   : > { %v4340_v19 = vsel %vm12185_vm6, %v8225_v1, %v8220_v50  ;;  %v4341_v60 = vsel %vm12186_vm13, %v8226_v8, %v8221_v6  ;;  %v8229_v15 = vpop.permute.xlu1 %8228  ;;  %6823 = vmatpush1.bf16.msk.msra.mxu1 %vm8926_vm8, %v6821_v9  ;;  %v4332_v26 = vsel %vm12187_vm2, %v8220_v50, %v8225_v1  ;;  %v4333_v4 = vsel %vm12188_vm10, %v8221_v6, %v8226_v8  ;;  %vm12190_vm6 = vmmov %vm12184_vm1 }
 0x6b0   : > { %v6826_v42 = vpack.c.bf16 %v4341_v60, %v4340_v19  ;;  %v8231_v56 = vunpack.i.h.bf16 %v8229_v15  ;;  %v8230_v41 = vunpack.i.l.bf16 %v8229_v15  ;;  %v8234_v44 = vpop.permute.xlu0 %8233  ;;  %v6824_v57 = vpack.c.bf16 %v4333_v4, %v4332_v26  ;;  %vm12191_vm13 = vmmov %vm12184_vm1 }
 0x6b1   : > { %v8236_v46 = vunpack.i.h.bf16 %v8234_v44  ;;  %v8235_v39 = vunpack.i.l.bf16 %v8234_v44  ;;  %5116 = vperm.xlu1 %7526, %v5733_v13   ;;  %vm12192_vm2 = vmmov %vm12184_vm1 }
 0x6b2   : > { %5121 = vperm.xlu0 %7525, %v5734_v25   ;;  %6825 = vmatprep.subr.bf16.mxu1 %v6824_v57  ;;  %vm12193_vm10 = vmmov %vm12184_vm1 }
 0x6b3   : > { %v4342_v58 = vsel %vm12189_vm7, %v8235_v39, %v8230_v41  ;;  %v4343_v3 = vsel %vm12184_vm1, %v8236_v46, %v8231_v56  ;;  %v8239_v32 = vpop.permute.xlu1 %8238  ;;  %6828 = vmatpush1.bf16.msk.msra.mxu1 %vm8926_vm8, %v6826_v42  ;;  %v4334_v48 = vsel %vm12190_vm6, %v8230_v41, %v8235_v39  ;;  %v4335_v31 = vsel %vm12191_vm13, %v8231_v56, %v8236_v46  ;;  %vm12194_vm7 = vmmov %vm12184_vm1 }
 0x6b4   : > { %v6831_v54 = vpack.c.bf16 %v4343_v3, %v4342_v58  ;;  %v8241_v51 = vunpack.i.h.bf16 %v8239_v32  ;;  %v8240_v61 = vunpack.i.l.bf16 %v8239_v32  ;;  %v8249_v9 = vpop.permute.xlu0 %8248  ;;  %v6829_v6 = vpack.c.bf16 %v4335_v31, %v4334_v48 }
 0x6b5   : > { %v8251_v50 = vunpack.i.h.bf16 %v8249_v9  ;;  %v8250_v11 = vunpack.i.l.bf16 %v8249_v9  ;;  %vm12195_vm6 = vcmp.lt.s32.totalorder %v8802_v45, 15 }
 0x6b6   : > { %6830 = vmatprep.subr.bf16.mxu1 %v6829_v6  ;;  %vm12196_vm13 = vmmov %vm12195_vm6 }
 0x6b7   : > { %v4344_v43 = vsel %vm12192_vm2, %v8250_v11, %v8240_v61  ;;  %v4345_v8 = vsel %vm12193_vm10, %v8251_v50, %v8241_v51  ;;  %v8244_v1 = vpop.permute.xlu1 %8243  ;;  %6833 = vmatpush1.bf16.msk.msra.mxu1 %vm8926_vm8, %v6831_v54  ;;  %v4336_v13 = vsel %vm12194_vm7, %v8240_v61, %v8250_v11  ;;  %v4337_v19 = vsel %vm12184_vm1, %v8241_v51, %v8251_v50  ;;  %vm12197_vm2 = vmmov %vm12195_vm6 }
 0x6b8   : > { %v6836_v60 = vpack.c.bf16 %v4345_v8, %v4344_v43  ;;  %v8246_v15 = vunpack.i.h.bf16 %v8244_v1  ;;  %v8245_v25 = vunpack.i.l.bf16 %v8244_v1  ;;  %v8254_v26 = vpop.permute.xlu0 %8253  ;;  %v6834_v4 = vpack.c.bf16 %v4337_v19, %v4336_v13  ;;  %vm12198_vm10 = vmmov %vm12197_vm2 }
 0x6b9   : > { %v8256_v42 = vunpack.i.h.bf16 %v8254_v26  ;;  %v8255_v56 = vunpack.i.l.bf16 %v8254_v26  ;;  %vm12199_vm7 = vmmov %vm12197_vm2 }
 0x6ba   : > { %6835 = vmatprep.subr.bf16.mxu1 %v6834_v4  ;;  %vm12200_vm1 = vmmov %vm12197_vm2 }
 0x6bb   : > { %v4410_v41 = vsel %vm12195_vm6, %v8245_v25, %v8255_v56  ;;  %v4411_v44 = vsel %vm12196_vm13, %v8246_v15, %v8256_v42  ;;  %v4418_v57 = vsel %vm12197_vm2, %v8255_v56, %v8245_v25  ;;  %v4419_v46 = vsel %vm12198_vm10, %v8256_v42, %v8246_v15  ;;  %v8259_v39 = vpop.permute.xlu1 %8258  ;;  %6838 = vmatpush1.bf16.msk.msra.mxu1 %vm8926_vm8, %v6836_v60  ;;  %vm12201_vm6 = vmmov %vm12200_vm1 }
 0x6bc   : > { %v6839_v58 = vpack.c.bf16 %v4411_v44, %v4410_v41  ;;  %v6842_v3 = vpack.c.bf16 %v4419_v46, %v4418_v57  ;;  %v8261_v32 = vunpack.i.h.bf16 %v8259_v39  ;;  %v8260_v48 = vunpack.i.l.bf16 %v8259_v39  ;;  %v8264_v31 = vpop.permute.xlu0 %8263  ;;  %vm12202_vm8 = vmmov %vm12200_vm1 }
 0x6bd   : > { %v8266_v54 = vunpack.i.h.bf16 %v8264_v31  ;;  %v8265_v51 = vunpack.i.l.bf16 %v8264_v31  ;;  %vm12203_vm13 = vmmov %vm12200_vm1 }
 0x6be   : > { %6841 = vmatprep.subr.msk.bf16.mxu1 %vm8976_vm12, %v6839_v58  ;;  %vm12204_vm2 = vmmov %vm12200_vm1 }
 0x6bf   : > { %v4412_v61 = vsel %vm12199_vm7, %v8260_v48, %v8265_v51  ;;  %v4413_v9 = vsel %vm12200_vm1, %v8261_v32, %v8266_v54  ;;  %v4420_v55 = vsel %vm12201_vm6, %v8265_v51, %v8260_v48  ;;  %v4421_v6 = vsel %vm12202_vm8, %v8266_v54, %v8261_v32  ;;  %v8269_v50 = vpop.permute.xlu1 %8268  ;;  %6844 = vmatpush1.bf16.msk.msra.mxu1 %vm8996_vm14, %v6842_v3  ;;  %vm12205_vm10 = vmmov %vm12200_vm1 }
 0x6c0   : > { %v6845_v11 = vpack.c.bf16 %v4413_v9, %v4412_v61  ;;  %v6848_v43 = vpack.c.bf16 %v4421_v6, %v4420_v55  ;;  %v8271_v8 = vunpack.i.h.bf16 %v8269_v50  ;;  %v8270_v1 = vunpack.i.l.bf16 %v8269_v50  ;;  %v8274_v13 = vpop.permute.xlu0 %8273  ;;  %vm12206_vm7 = vmmov %vm12200_vm1 }
 0x6c1   : > { %v8276_v19 = vunpack.i.h.bf16 %v8274_v13  ;;  %v8275_v60 = vunpack.i.l.bf16 %v8274_v13  ;;  %vm12207_vm6 = vmmov %vm12200_vm1 }
 0x6c2   : > { %6847 = vmatprep.subr.msk.bf16.mxu1 %vm8976_vm12, %v6845_v11  ;;  %vm12208_vm8 = vmmov %vm12200_vm1 }
 0x6c3   : > { %v4414_v15 = vsel %vm12203_vm13, %v8270_v1, %v8275_v60  ;;  %v4415_v25 = vsel %vm12204_vm2, %v8271_v8, %v8276_v19  ;;  %v4422_v26 = vsel %vm12205_vm10, %v8275_v60, %v8270_v1  ;;  %v4423_v4 = vsel %vm12206_vm7, %v8276_v19, %v8271_v8  ;;  %v8279_v42 = vpop.permute.xlu1 %8278  ;;  %6850 = vmatpush1.bf16.msk.msra.mxu1 %vm8996_vm14, %v6848_v43  ;;  %vm12209_vm13 = vmmov %vm12200_vm1 }
 0x6c4   : > { %v6851_v56 = vpack.c.bf16 %v4415_v25, %v4414_v15  ;;  %v6854_v41 = vpack.c.bf16 %v4423_v4, %v4422_v26  ;;  %v8281_v44 = vunpack.i.h.bf16 %v8279_v42  ;;  %v8280_v57 = vunpack.i.l.bf16 %v8279_v42  ;;  %v8289_v46 = vpop.permute.xlu0 %8288 }
 0x6c5   : > { %v8291_v39 = vunpack.i.h.bf16 %v8289_v46  ;;  %v8290_v58 = vunpack.i.l.bf16 %v8289_v46  ;;  %vm12210_vm2 = vcmp.lt.s32.totalorder %v8802_v45, 1 }
 0x6c6   : > { %6853 = vmatprep.subr.msk.bf16.mxu1 %vm8976_vm12, %v6851_v56  ;;  %vm12211_vm10 = vmmov %vm12210_vm2 }
 0x6c7   : > { %v4416_v3 = vsel %vm12200_vm1, %v8280_v57, %v8290_v58  ;;  %v4417_v32 = vsel %vm12207_vm6, %v8281_v44, %v8291_v39  ;;  %v4424_v48 = vsel %vm12208_vm8, %v8290_v58, %v8280_v57  ;;  %v4425_v31 = vsel %vm12209_vm13, %v8291_v39, %v8281_v44  ;;  %v8284_v54 = vpop.permute.xlu1 %8283  ;;  %6856 = vmatpush1.bf16.msk.msra.mxu1 %vm8996_vm14, %v6854_v41  ;;  %vm12212_vm7 = vmmov %vm12210_vm2 }
 0x6c8   : > { %v6857_v51 = vpack.c.bf16 %v4417_v32, %v4416_v3  ;;  %v6860_v61 = vpack.c.bf16 %v4425_v31, %v4424_v48  ;;  %v8286_v9 = vunpack.i.h.bf16 %v8284_v54  ;;  %v8285_v55 = vunpack.i.l.bf16 %v8284_v54  ;;  %v8294_v6 = vpop.permute.xlu0 %8293  ;;  %vm12213_vm1 = vmmov %vm12210_vm2 }
 0x6c9   : > { %v8296_v50 = vunpack.i.h.bf16 %v8294_v6  ;;  %v8295_v11 = vunpack.i.l.bf16 %v8294_v6  ;;  %vm12214_vm6 = vmmov %vm12213_vm1 }
 0x6ca   : > { %6859 = vmatprep.subr.msk.bf16.mxu1 %vm8976_vm12, %v6857_v51  ;;  %vm12215_vm8 = vmmov %vm12213_vm1 }
 0x6cb   : > { %v4490_v43 = vsel %vm12210_vm2, %v8285_v55, %v8295_v11  ;;  %v4491_v8 = vsel %vm12211_vm10, %v8286_v9, %v8296_v50  ;;  %v4498_v1 = vsel %vm12212_vm7, %v8295_v11, %v8285_v55  ;;  %v4499_v13 = vsel %vm12213_vm1, %v8296_v50, %v8286_v9  ;;  %v8299_v19 = vpop.permute.xlu1 %8298  ;;  %6862 = vmatpush1.bf16.msk.msra.mxu1 %vm8996_vm14, %v6860_v61  ;;  %vm12216_vm13 = vmmov %vm12213_vm1 }
 0x6cc   : > { %v6863_v60 = vpack.c.bf16 %v4491_v8, %v4490_v43  ;;  %v6866_v15 = vpack.c.bf16 %v4499_v13, %v4498_v1  ;;  %v8301_v25 = vunpack.i.h.bf16 %v8299_v19  ;;  %v8300_v26 = vunpack.i.l.bf16 %v8299_v19  ;;  %v8304_v4 = vpop.permute.xlu0 %8303  ;;  %vm12217_vm14 = vmmov %vm12213_vm1 }
 0x6cd   : > { %v8306_v42 = vunpack.i.h.bf16 %v8304_v4  ;;  %v8305_v56 = vunpack.i.l.bf16 %v8304_v4  ;;  %vm12218_vm2 = vmmov %vm12213_vm1 }
 0x6ce   : > { %6865 = vmatprep.subr.msk.bf16.mxu1 %vm8854_vm5, %v6863_v60  ;;  %vm12219_vm10 = vmmov %vm12213_vm1 }
 0x6cf   : > { %v4492_v41 = vsel %vm12214_vm6, %v8300_v26, %v8305_v56  ;;  %v4493_v44 = vsel %vm12215_vm8, %v8301_v25, %v8306_v42  ;;  %v4500_v17 = vsel %vm12216_vm13, %v8305_v56, %v8300_v26  ;;  %v4501_v57 = vsel %vm12217_vm14, %v8306_v42, %v8301_v25  ;;  %v8309_v46 = vpop.permute.xlu1 %8308  ;;  %6868 = vmatpush1.bf16.msk.msra.mxu1 %vm9048_vm0, %v6866_v15  ;;  %vm12220_vm7 = vmmov %vm12213_vm1 }
 0x6d0   : > { %v6869_v39 = vpack.c.bf16 %v4493_v44, %v4492_v41  ;;  %v6872_v58 = vpack.c.bf16 %v4501_v57, %v4500_v17  ;;  %v8311_v3 = vunpack.i.h.bf16 %v8309_v46  ;;  %v8310_v32 = vunpack.i.l.bf16 %v8309_v46  ;;  %v8314_v48 = vpop.permute.xlu0 %8313  ;;  %vm12221_vm6 = vmmov %vm12213_vm1  ;;  %v5687_v17 = vld [vmem:[%s11949_s3 + $0x140] sm:$0xff]  ;;  %v5693_v46 = vld [vmem:[%s11949_s3 + $0x170] sm:$0xff] }
 0x6d1   : > { %v8316_v31 = vunpack.i.h.bf16 %v8314_v48  ;;  %v8315_v54 = vunpack.i.l.bf16 %v8314_v48  ;;  %vm12222_vm8 = vmmov %vm12213_vm1 }
 0x6d2   : > { %6871 = vmatprep.subr.msk.bf16.mxu1 %vm8854_vm5, %v6869_v39  ;;  %vm12223_vm13 = vmmov %vm12213_vm1 }
 0x6d3   : > { %v4494_v51 = vsel %vm12218_vm2, %v8310_v32, %v8315_v54  ;;  %v4495_v61 = vsel %vm12219_vm10, %v8311_v3, %v8316_v31  ;;  %v4502_v9 = vsel %vm12220_vm7, %v8315_v54, %v8310_v32  ;;  %v4503_v55 = vsel %vm12213_vm1, %v8316_v31, %v8311_v3  ;;  %v8319_v6 = vpop.permute.xlu1 %8318  ;;  %6874 = vmatpush1.bf16.msk.msra.mxu1 %vm9048_vm0, %v6872_v58  ;;  %vm12224_vm14 = vmmov %vm12213_vm1 }
 0x6d4   : > { %v6875_v50 = vpack.c.bf16 %v4495_v61, %v4494_v51  ;;  %v6878_v11 = vpack.c.bf16 %v4503_v55, %v4502_v9  ;;  %v8321_v43 = vunpack.i.h.bf16 %v8319_v6  ;;  %v8320_v8 = vunpack.i.l.bf16 %v8319_v6  ;;  %v8324_v1 = vpop.permute.xlu0 %8323 }
 0x6d5   : > { %v8326_v13 = vunpack.i.h.bf16 %v8324_v1  ;;  %v8325_v19 = vunpack.i.l.bf16 %v8324_v1 }
 0x6d6   : > { %6877 = vmatprep.subr.msk.bf16.mxu1 %vm8854_vm5, %v6875_v50 }
 0x6d7   : > { %v4496_v60 = vsel %vm12221_vm6, %v8320_v8, %v8325_v19  ;;  %v4497_v15 = vsel %vm12222_vm8, %v8321_v43, %v8326_v13  ;;  %v4504_v25 = vsel %vm12223_vm13, %v8325_v19, %v8320_v8  ;;  %v4505_v26 = vsel %vm12224_vm14, %v8326_v13, %v8321_v43  ;;  %v8329_v4 = vpop.permute.xlu1 %8328  ;;  %6880 = vmatpush1.bf16.msk.msra.mxu1 %vm9048_vm0, %v6878_v11 }
 0x6d8   : > { %v6881_v42 = vpack.c.bf16 %v4497_v15, %v4496_v60  ;;  %v6884_v56 = vpack.c.bf16 %v4505_v26, %v4504_v25  ;;  %v8334_v41 = vpop.permute.xlu0 %8333  ;;  %v8331_v3 = vunpack.i.h.bf16 %v8329_v4  ;;  %v8330_v32 = vunpack.i.l.bf16 %v8329_v4 }
 0x6d9   : > { %v8336_v48 = vunpack.i.h.bf16 %v8334_v41  ;;  %v8335_v31 = vunpack.i.l.bf16 %v8334_v41 }
 0x6da   : > { %6883 = vmatprep.subr.msk.bf16.mxu1 %vm8854_vm5, %v6881_v42  ;;  %vm12225_vm5 = vcmp.lt.s32.totalorder %v8802_v45, 127  ;;  %v5707_v42 = vld [vmem:[%s11949_s3 + $0x1e0] sm:$0xff] }
 0x6db   : > { %v8339_v44 = vpop.permute.xlu1 %8338  ;;  %6886 = vmatpush1.bf16.msk.msra.mxu1 %vm9048_vm0, %v6884_v56  ;;  %v4594_v61 = vsel %vm12225_vm5, %v8335_v31, %v8330_v32  ;;  %vm12226_vm2 = vmmov %vm12225_vm5 }
 0x6dc   : > { %v8344_v57 = vpop.permute.xlu0 %8343  ;;  %6888 = vmatprep.subr.bf16.mxu1 %v11156_v20  ;;  %v5698_v20 = vld [vmem:[%s11949_s3 + $0x198] sm:$0xff]  ;;  %v4595_v9 = vsel %vm12226_vm2, %v8336_v48, %v8331_v3  ;;  %v8340_v55 = vunpack.i.l.bf16 %v8339_v44  ;;  %vm12227_vm10 = vmmov %vm12226_vm2 }
 0x6dd   : > { %v8346_v6 = vunpack.i.h.bf16 %v8344_v57  ;;  %v8345_v50 = vunpack.i.l.bf16 %v8344_v57  ;;  %v4586_v8 = vsel %vm12227_vm10, %v8330_v32, %v8335_v31  ;;  %vm12228_vm7 = vmmov %vm12226_vm2  ;;  %v6903_v13 = vpack.c.bf16 %v4595_v9, %v4594_v61  ;;  %v5718_v61 = vld [vmem:[%s11949_s3 + $0x238] sm:$0xff] }
 0x6de   : > { %5213 = vmatmul.mubr.f32.vlgmr.msra.gmra.mrb[16].mxu1 %v5687_v17  ;;  %v4587_v1 = vsel %vm12228_vm7, %v8331_v3, %v8336_v48  ;;  %vm12229_vm1 = vmmov %vm12226_vm2  ;;  %v5713_v17 = vld [vmem:[%s11949_s3 + $0x210] sm:$0xff]  ;;  %v5712_v48 = vld [vmem:[%s11949_s3 + $0x208] sm:$0xff] }
 0x6df   : > { %v11526_v39 = vpop.permute.xlu1 %8348  ;;  %6890 = vmatpush1.bf16.msra.mxu1 %v11158_v18  ;;  %5218 = vmatprep.mubr.f32.mxu1 %v5693_v46  ;;  %v5697_v18 = vld [vmem:[%s11949_s3 + $0x190] sm:$0xff]  ;;  %v4596_v25 = vsel %vm12229_vm1, %v8345_v50, %v8340_v55  ;;  %vm12230_vm6 = vmmov %vm12229_vm1  ;;  %v6906_v41 = vpack.c.bf16 %v4587_v1, %v4586_v8 }
 0x6e0   : > { %v11532_v58 = vpop.permute.xlu0 %8353  ;;  %6892 = vmatprep.subr.bf16.mxu1 %v11168_v33  ;;  %v5703_v33 = vld [vmem:[%s11949_s3 + $0x1c0] sm:$0xff]  ;;  %v8351_v19 = vunpack.i.h.bf16 %v11526_v39  ;;  %v8350_v60 = vunpack.i.l.bf16 %v11526_v39  ;;  %vm12231_vm8 = vmmov %vm12229_vm1 }
 0x6e1   : > { %v8356_v15 = vunpack.i.h.bf16 %v11532_v58  ;;  %vm12232_vm13 = vmmov %vm12229_vm1 }
 0x6e2   : > { %5219 = vmatmul.mubr.f32.gmra.mrb[18].mxu1 %v5692_v7  ;;  %vm12233_vm14 = vmmov %vm12229_vm1 }
 0x6e3   : > { %v11538_v54 = vpop.permute.xlu1 %8358  ;;  %6894 = vmatpush1.bf16.msra.mxu1 %v11170_v34  ;;  %5224 = vmatprep.mubr.f32.mxu1 %v5698_v20  ;;  %v8341_v34 = vunpack.i.h.bf16 %v8339_v44  ;;  %v4588_v44 = vsel %vm12231_vm8, %v8340_v55, %v8345_v50  ;;  %vm12234_vm5 = vmmov %vm12229_vm1 }
 0x6e4   : > { %v11544_v51 = vpop.permute.xlu0 %8368  ;;  %6896 = vmatprep.subr.bf16.mxu1 %v11180_v53  ;;  %v5702_v53 = vld [vmem:[%s11949_s3 + $0x1b8] sm:$0xff]  ;;  %v4599_v39 = vsel %vm12234_vm5, %v8356_v15, %v8351_v19  ;;  %v8361_v7 = vunpack.i.h.bf16 %v11538_v54  ;;  %vm12235_vm2 = vmmov %vm12229_vm1 }
 0x6e5   : > { %v4597_v26 = vsel %vm12230_vm6, %v8346_v6, %v8341_v34  ;;  %v8371_v20 = vunpack.i.h.bf16 %v11544_v51  ;;  %v8370_v3 = vunpack.i.l.bf16 %v11544_v51  ;;  %vm12236_vm10 = vmmov %vm12229_vm1 }
 0x6e6   : > { %5225 = vmatmul.mubr.f32.gmra.mrb[20].mxu1 %v5697_v18  ;;  %v6909_v57 = vpack.c.bf16 %v4597_v26, %v4596_v25  ;;  %v4591_v51 = vsel %vm12236_vm10, %v8351_v19, %v8356_v15  ;;  %vm12237_vm7 = vmmov %vm12229_vm1 }
 0x6e7   : > { %v11554_v11 = vpop.permute.xlu1 %8363  ;;  %6898 = vmatpush1.bf16.msra.mxu1 %v11182_v37  ;;  %5230 = vmatprep.mubr.f32.mxu1 %v5703_v33  ;;  %v5708_v37 = vld [vmem:[%s11949_s3 + $0x1e8] sm:$0xff]  ;;  %vm12238_vm6 = vmmov %vm12229_vm1 }
 0x6e8   : > { %v11560_v43 = vpop.permute.xlu0 %8373  ;;  %6900 = vmatprep.subr.bf16.mxu1 %v11192_v27  ;;  %v8355_v27 = vunpack.i.l.bf16 %v11532_v58  ;;  %v8360_v58 = vunpack.i.l.bf16 %v11538_v54  ;;  %v8366_v9 = vunpack.i.h.bf16 %v11554_v11  ;;  %vm12239_vm8 = vmmov %vm12229_vm1 }
 0x6e9   : > { %v8376_v55 = vunpack.i.h.bf16 %v11560_v43  ;;  %v4593_v19 = vsel %vm12239_vm8, %v8361_v7, %v8371_v20 }
 0x6ea   : > { %5231 = vmatmul.mubr.f32.gmra.mrb[22].mxu1 %v5702_v53  ;;  %v4598_v46 = vsel %vm12233_vm14, %v8355_v27, %v8350_v60  ;;  %v4590_v18 = vsel %vm12235_vm2, %v8350_v60, %v8355_v27  ;;  %v4600_v50 = vsel %vm12237_vm7, %v8370_v3, %v8360_v58  ;;  %v4601_v53 = vsel %vm12229_vm1, %v8371_v20, %v8361_v7 }
 0x6eb   : > { %v11578_v4 = vpop.permute.xlu1 %8378  ;;  %6902 = vmatpush1.bf16.msra.mxu1 %v11194_v22  ;;  %5236 = vmatprep.mubr.f32.mxu1 %v5708_v37  ;;  %v4589_v22 = vsel %vm12232_vm13, %v8341_v34, %v8346_v6  ;;  %v6915_v33 = vpack.c.bf16 %v4599_v39, %v4598_v46  ;;  %v8365_v34 = vunpack.i.l.bf16 %v11554_v11  ;;  %v8375_v6 = vunpack.i.l.bf16 %v11560_v43  ;;  %v5717_v11 = vld [vmem:[%s11949_s3 + $0x230] sm:$0xff]  ;;  %v5723_v37 = vld [vmem:[%s11949_s3 + $0x260] sm:$0xff]  ;;  %v5690_v39 = vld [vmem:[%s11949_s3 + $0x158] sm:$0xff] }
 0x6ec   : > { %v11584_v56 = vpop.permute.xlu0 %8383  ;;  %6905 = vmatprep.subr.msk.bf16.mxu1 %vm8976_vm12, %v6903_v13  ;;  %v6912_v54 = vpack.c.bf16 %v4589_v22, %v4588_v44  ;;  %v6918_v43 = vpack.c.bf16 %v4591_v51, %v4590_v18  ;;  %v4592_v13 = vsel %vm12238_vm6, %v8360_v58, %v8370_v3  ;;  %v6921_v60 = vpack.c.bf16 %v4601_v53, %v4600_v50 }
 0x6ed   : > { %vm12240_vm13 = vcmp.lt.s32.totalorder %v8802_v45, 113  ;;  %v8381_v25 = vunpack.i.h.bf16 %v11578_v4  ;;  %v8380_v26 = vunpack.i.l.bf16 %v11578_v4  ;;  %v6924_v4 = vpack.c.bf16 %v4593_v19, %v4592_v13 }
 0x6ee   : > { %5237 = vmatmul.mubr.f32.gmra.mrb[24].mxu1 %v5707_v42  ;;  %v4674_v15 = vsel %vm12240_vm13, %v8375_v6, %v8365_v34  ;;  %vm12241_vm14 = vmmov %vm12240_vm13  ;;  %v8386_v42 = vunpack.i.h.bf16 %v11584_v56 }
 0x6ef   : > { %v11603_v32 = vpop.permute.xlu1 %8388  ;;  %6908 = vmatpush1.bf16.msk.msra.mxu1 %vm9218_vm4, %v6906_v41  ;;  %5242 = vmatprep.mubr.f32.mxu1 %v5713_v17  ;;  %v4675_v27 = vsel %vm12241_vm14, %v8376_v55, %v8366_v9  ;;  %v8385_v41 = vunpack.i.l.bf16 %v11584_v56  ;;  %v5722_v17 = vld [vmem:[%s11949_s3 + $0x258] sm:$0xff]  ;;  %vm12242_vm5 = vmmov %vm12240_vm13 }
 0x6f0   : > { %v11610_v31 = vpop.permute.xlu0 %8393  ;;  %6911 = vmatprep.subr.msk.bf16.mxu1 %vm8976_vm12, %v6909_v57  ;;  %v4666_v57 = vsel %vm12242_vm5, %v8365_v34, %v8375_v6  ;;  %vm12243_vm2 = vmmov %vm12242_vm5  ;;  %v6927_v46 = vpack.c.bf16 %v4675_v27, %v4674_v15  ;;  %v8391_v7 = vunpack.i.h.bf16 %v11603_v32  ;;  %v8390_v58 = vunpack.i.l.bf16 %v11603_v32 }
 0x6f1   : > { %v4667_v56 = vsel %vm12243_vm2, %v8366_v9, %v8376_v55  ;;  %v8396_v5 = vunpack.i.h.bf16 %v11610_v31  ;;  %v8395_v20 = vunpack.i.l.bf16 %v11610_v31  ;;  %vm12245_vm10 = vmmov %vm12243_vm2 }
 0x6f2   : > { %5243 = vmatmul.mubr.f32.gmra.mrb[26].mxu1 %v5712_v48  ;;  %v4677_v48 = vsel %vm12245_vm10, %v8386_v42, %v8381_v25  ;;  %v6930_v32 = vpack.c.bf16 %v4667_v56, %v4666_v57  ;;  %vm12246_vm7 = vmmov %vm12243_vm2 }
 0x6f3   : > { %v11629_v8 = vpop.permute.xlu1 %8398  ;;  %6914 = vmatpush1.bf16.msk.msra.mxu1 %vm9218_vm4, %v6912_v54  ;;  %5248 = vmatprep.mubr.f32.mxu1 %v5718_v61  ;;  %v4668_v31 = vsel %vm12246_vm7, %v8380_v26, %v8385_v41  ;;  %vm12247_vm1 = vmmov %vm12243_vm2  ;;  %vm12256_vm7 = vcmp.lt.s32.totalorder %v8802_v45, 112  ;;  %v5709_v45 = vld [vmem:[%s11949_s3 + $0x1f0] sm:$0xff] }
 0x6f4   : > { %v11636_v1 = vpop.permute.xlu0 %8408  ;;  %6917 = vmatprep.subr.msk.bf16.mxu1 %vm8976_vm12, %v6915_v33  ;;  %v4669_v51 = vsel %vm12247_vm1, %v8381_v25, %v8386_v42  ;;  %vm12248_vm6 = vmmov %vm12247_vm1  ;;  %v8401_v34 = vunpack.i.h.bf16 %v11629_v8  ;;  %v8400_v55 = vunpack.i.l.bf16 %v11629_v8 }
 0x6f5   : > { %v4678_v61 = vsel %vm12248_vm6, %v8395_v20, %v8390_v58  ;;  %vm12249_vm8 = vmmov %vm12247_vm1  ;;  %v8411_v6 = vunpack.i.h.bf16 %v11636_v1  ;;  %v8410_v50 = vunpack.i.l.bf16 %v11636_v1 }
 0x6f6   : > { %5249 = vmatmul.mubr.f32.gmra.mrb[28].mxu1 %v5717_v11  ;;  %v4679_v9 = vsel %vm12249_vm8, %v8396_v5, %v8391_v7  ;;  %vm12250_vm13 = vmmov %vm12247_vm1 }
 0x6f7   : > { %v11655_v44 = vpop.permute.xlu1 %8403  ;;  %6920 = vmatpush1.bf16.msk.msra.mxu1 %vm9218_vm4, %v6918_v43  ;;  %5254 = vmatprep.mubr.f32.mxu1 %v5723_v37  ;;  %v6936_v43 = vpack.c.bf16 %v4669_v51, %v4668_v31  ;;  %v4670_v13 = vsel %vm12250_vm13, %v8390_v58, %v8395_v20  ;;  %vm12251_vm14 = vmmov %vm12247_vm1  ;;  %v6939_v8 = vpack.c.bf16 %v4679_v9, %v4678_v61 }
 0x6f8   : > { %v11662_v22 = vpop.permute.xlu0 %8413  ;;  %6923 = vmatprep.subr.msk.bf16.mxu1 %vm8976_vm12, %v6921_v60  ;;  %vm12244_vm12 = vmmov %vm12243_vm2  ;;  %v4671_v37 = vsel %vm12251_vm14, %v8391_v7, %v8396_v5  ;;  %v8406_v19 = vunpack.i.h.bf16 %v11655_v44  ;;  %v8405_v1 = vunpack.i.l.bf16 %v11655_v44 }
 0x6f9   : > { %v4676_v3 = vsel %vm12244_vm12, %v8385_v41, %v8380_v26  ;;  %v8416_v60 = vunpack.i.h.bf16 %v11662_v22  ;;  %v8415_v15 = vunpack.i.l.bf16 %v11662_v22  ;;  %vm12252_vm5 = vmmov %vm12247_vm1  ;;  %v6942_v41 = vpack.c.bf16 %v4671_v37, %v4670_v13 }
 0x6fa   : > { %5255 = vmatmul.mubr.f32.gmra.mrb[30].mxu1 %v5722_v17  ;;  %v6933_v33 = vpack.c.bf16 %v4677_v48, %v4676_v3  ;;  %v4680_v27 = vsel %vm12252_vm5, %v8410_v50, %v8400_v55  ;;  %vm12253_vm2 = vmmov %vm12247_vm1 }
 0x6fb   : > { %v11681_v54 = vpop.permute.xlu1 %8418  ;;  %6926 = vmatpush1.bf16.msk.msra.mxu1 %vm9218_vm4, %v6924_v4  ;;  %5325 = vmatprep.mubr.f32.mxu1 %v5690_v39  ;;  %v4681_v25 = vsel %vm12253_vm2, %v8411_v6, %v8401_v34  ;;  %vm12254_vm12 = vmmov %vm12247_vm1  ;;  %v4754_v4 = vsel %vm12256_vm7, %v8415_v15, %v8405_v1 }
 0x6fc   : > { %v8424_v18 = vpop.permute.xlu0 %8423  ;;  %6929 = vmatprep.subr.msk.bf16.mxu1 %vm9325_vm3, %v6927_v46  ;;  %v4672_v44 = vsel %vm12254_vm12, %v8400_v55, %v8410_v50  ;;  %vm12255_vm10 = vmmov %vm12247_vm1  ;;  %v6945_v22 = vpack.c.bf16 %v4681_v25, %v4680_v27  ;;  %v8421_v56 = vunpack.i.h.bf16 %v11681_v54  ;;  %v8420_v46 = vunpack.i.l.bf16 %v11681_v54 }
 0x6fd   : > { %v4673_v17 = vsel %vm12255_vm10, %v8401_v34, %v8411_v6  ;;  %vm12257_vm1 = vmmov %vm12256_vm7  ;;  %v8426_v39 = vunpack.i.h.bf16 %v8424_v18  ;;  %v8425_v7 = vunpack.i.l.bf16 %v8424_v18 }
 0x6fe   : > { %v4755_v57 = vsel %vm12257_vm1, %v8416_v60, %v8406_v19  ;;  %v6948_v58 = vpack.c.bf16 %v4673_v17, %v4672_v44  ;;  %vm12258_vm6 = vmmov %vm12257_vm1 }
 0x6ff   : > { %v8429_v53 = vpop.permute.xlu1 %8428  ;;  %6932 = vmatpush1.bf16.msk.msra.mxu1 %vm9048_vm0, %v6930_v32  ;;  %v4746_v5 = vsel %vm12258_vm6, %v8405_v1, %v8415_v15  ;;  %vm12259_vm8 = vmmov %vm12257_vm1  ;;  %v6951_v3 = vpack.c.bf16 %v4755_v57, %v4754_v4 }
 0x700   : > { %v8434_v11 = vpop.permute.xlu0 %8433  ;;  %6935 = vmatprep.subr.msk.bf16.mxu1 %vm9325_vm3, %v6933_v33  ;;  %v4747_v20 = vsel %vm12259_vm8, %v8406_v19, %v8416_v60  ;;  %v8431_v48 = vunpack.i.h.bf16 %v8429_v53  ;;  %v8430_v32 = vunpack.i.l.bf16 %v8429_v53  ;;  %vm12260_vm13 = vmmov %vm12257_vm1 }
 0x701   : > { %v8436_v31 = vunpack.i.h.bf16 %v8434_v11  ;;  %v8435_v54 = vunpack.i.l.bf16 %v8434_v11  ;;  %v4756_v33 = vsel %vm12260_vm13, %v8425_v7, %v8420_v46  ;;  %vm12261_vm14 = vmmov %vm12257_vm1  ;;  %v6954_v61 = vpack.c.bf16 %v4747_v20, %v4746_v5 }
 0x702   : > { %v4757_v59 = vsel %vm12261_vm14, %v8426_v39, %v8421_v56  ;;  %vm12263_vm5 = vmmov %vm12257_vm1 }
 0x703   : > { %6938 = vmatpush1.bf16.msk.msra.mxu1 %vm9048_vm0, %v6936_v43  ;;  %v8439_v26 = vpop.permute.xlu1 %8438  ;;  %v4749_v34 = vsel %vm12263_vm5, %v8421_v56, %v8426_v39  ;;  %v6956_v55 = vpack.c.bf16 %v4757_v59, %v4756_v33  ;;  %vm12264_vm2 = vmmov %vm12257_vm1 }
 0x704   : > { %v8444_v42 = vpop.permute.xlu0 %8443  ;;  %6941 = vmatprep.subr.msk.bf16.mxu1 %vm9325_vm3, %v6939_v8  ;;  %v4758_v6 = vsel %vm12264_vm2, %v8435_v54, %v8430_v32  ;;  %vm12265_vm12 = vmmov %vm12257_vm1  ;;  %v8441_v53 = vunpack.i.h.bf16 %v8439_v26  ;;  %v8440_v47 = vunpack.i.l.bf16 %v8439_v26 }
 0x705   : > { %v4759_v50 = vsel %vm12265_vm12, %v8436_v31, %v8431_v48  ;;  %v8446_v11 = vunpack.i.h.bf16 %v8444_v42  ;;  %v8445_v43 = vunpack.i.l.bf16 %v8444_v42 }
 0x706   : > { %v6961_v60 = vpack.c.bf16 %v4759_v50, %v4758_v6 }
 0x707   : > { %6944 = vmatpush1.bf16.msk.msra.mxu1 %vm9048_vm0, %v6942_v41  ;;  %v8449_v51 = vpop.permute.xlu1 %8448 }
 0x708   : > { %6947 = vmatprep.subr.msk.bf16.mxu1 %vm9325_vm3, %v6945_v22  ;;  %v8454_v18 = vpop.permute.xlu0 %8453  ;;  %vm12262_vm3 = vmmov %vm12257_vm1  ;;  %v8451_v15 = vunpack.i.h.bf16 %v8449_v51  ;;  %v8450_v27 = vunpack.i.l.bf16 %v8449_v51 }
 0x709   : > { %v4748_v9 = vsel %vm12262_vm3, %v8420_v46, %v8425_v7  ;;  %v8456_v25 = vunpack.i.h.bf16 %v8454_v18  ;;  %v8455_v26 = vunpack.i.l.bf16 %v8454_v18 }
 0x70a   : > { %v6959_v8 = vpack.c.bf16 %v4749_v34, %v4748_v9 }
 0x70b   : > { %6950 = vmatpush1.bf16.msk.msra.mxu1 %vm9048_vm0, %v6948_v58  ;;  %v8459_v13 = vpop.permute.xlu1 %8458  ;;  %vm12266_vm0 = vmmov %vm12257_vm1  ;;  %v4834_v57 = vsel %vm953_vm15, %v8455_v26, %v8450_v27  ;;  %v4835_v56 = vsel %vm953_vm15, %v8456_v25, %v8451_v15 }
 0x70c   : > { %6953 = vmatprep.subr.msk.bf16.mxu1 %vm9396_vm11, %v6951_v3  ;;  %v8464_v37 = vpop.permute.xlu0 %8463  ;;  %v4750_v19 = vsel %vm12266_vm0, %v8430_v32, %v8435_v54  ;;  %vm12267_vm10 = vmmov %vm12266_vm0  ;;  %v8461_v7 = vunpack.i.h.bf16 %v8459_v13  ;;  %v8460_v58 = vunpack.i.l.bf16 %v8459_v13  ;;  %v4827_v32 = vsel %vm953_vm15, %v8451_v15, %v8456_v25 }
 0x70d   : > { %v4751_v1 = vsel %vm12267_vm10, %v8431_v48, %v8436_v31  ;;  %vm12268_vm7 = vmmov %vm12266_vm0  ;;  %v8466_v5 = vunpack.i.h.bf16 %v8464_v37  ;;  %v8465_v20 = vunpack.i.l.bf16 %v8464_v37  ;;  %v4826_v48 = vsel %vm953_vm15, %v8450_v27, %v8455_v26 }
 0x70e   : > { %v4760_v42 = vsel %vm12268_vm7, %v8445_v43, %v8440_v47  ;;  %vm12269_vm1 = vmmov %vm12266_vm0  ;;  %v6964_v44 = vpack.c.bf16 %v4751_v1, %v4750_v19  ;;  %v6971_v31 = vpack.c.bf16 %v4835_v56, %v4834_v57  ;;  %v6974_v6 = vpack.c.bf16 %v4827_v32, %v4826_v48  ;;  %v5694_v1 = vld [vmem:[%s11949_s3 + $0x178] sm:$0xff]  ;;  %v5691_v48 = vld [vmem:[%s11949_s3 + $0x160] sm:$0xff] }
 0x70f   : > { %6955 = vmatpush1.bf16.msra.mxu1 %v6954_v61  ;;  %v4761_v41 = vsel %vm12269_vm1, %v8446_v11, %v8441_v53  ;;  %vm12270_vm6 = vmmov %vm12266_vm0  ;;  %v8469_v46 = vpop.permute.xlu1 %8468  ;;  %v4836_v59 = vsel %vm953_vm15, %v8465_v20, %v8460_v58  ;;  %v4837_v61 = vsel %vm953_vm15, %v8466_v5, %v8461_v7  ;;  %v4828_v50 = vsel %vm953_vm15, %v8460_v58, %v8465_v20  ;;  %v5715_v58 = vld [vmem:[%s11949_s3 + $0x220] sm:$0xff]  ;;  %v5725_v20 = vld [vmem:[%s11949_s3 + $0x270] sm:$0xff] }
 0x710   : > { %6958 = vmatprep.subr.msk.bf16.mxu1 %vm9396_vm11, %v6956_v55  ;;  %v4752_v17 = vsel %vm12270_vm6, %v8440_v47, %v8445_v43  ;;  %vm12271_vm8 = vmmov %vm12266_vm0  ;;  %v6966_v4 = vpack.c.bf16 %v4761_v41, %v4760_v42  ;;  %v8474_v39 = vpop.permute.xlu0 %8473  ;;  %v8471_v54 = vunpack.i.h.bf16 %v8469_v46  ;;  %v8470_v51 = vunpack.i.l.bf16 %v8469_v46  ;;  %v5695_v55 = vld [vmem:[%s11949_s3 + $0x180] sm:$0xff]  ;;  %v5704_v46 = vld [vmem:[%s11949_s3 + $0x1c8] sm:$0xff] }
 0x711   : > { %v4753_v22 = vsel %vm12271_vm8, %v8441_v53, %v8446_v11  ;;  %v8476_v18 = vunpack.i.h.bf16 %v8474_v39  ;;  %v8475_v33 = vunpack.i.l.bf16 %v8474_v39  ;;  %v4829_v53 = vsel %vm953_vm15, %v8461_v7, %v8466_v5  ;;  %v5710_v39 = vld [vmem:[%s11949_s3 + $0x1f8] sm:$0xff]  ;;  %v5719_v5 = vld [vmem:[%s11949_s3 + $0x240] sm:$0xff]  ;;  %v5696_v32 = vld [vmem:[%s11949_s3 + $0x188] sm:$0xff] }
 0x712   : > { %v6969_v3 = vpack.c.bf16 %v4753_v22, %v4752_v17  ;;  %v6977_v47 = vpack.c.bf16 %v4837_v61, %v4836_v59  ;;  %v6980_v15 = vpack.c.bf16 %v4829_v53, %v4828_v50  ;;  %v5705_v17 = vld [vmem:[%s11949_s3 + $0x1d0] sm:$0xff]  ;;  %v5726_v59 = vld [vmem:[%s11949_s3 + $0x278] sm:$0xff] }
 0x713   : > { %6960 = vmatpush1.bf16.msra.mxu1 %v6959_v8  ;;  %v8479_v9 = vpop.permute.xlu1 %8478  ;;  %v4838_v11 = vsel %vm953_vm15, %v8475_v33, %v8470_v51  ;;  %v4839_v43 = vsel %vm953_vm15, %v8476_v18, %v8471_v54  ;;  %v4830_v27 = vsel %vm953_vm15, %v8470_v51, %v8475_v33  ;;  %v4831_v25 = vsel %vm953_vm15, %v8471_v54, %v8476_v18  ;;  %v5706_v54 = vld [vmem:[%s11949_s3 + $0x1d8] sm:$0xff]  ;;  %v5711_v51 = vld [vmem:[%s11949_s3 + $0x200] sm:$0xff]  ;;  %v5716_v18 = vld [vmem:[%s11949_s3 + $0x228] sm:$0xff] }
 0x714   : > { %6963 = vmatprep.subr.msk.bf16.mxu1 %vm9396_vm11, %v6961_v60  ;;  %v8484_v34 = vpop.permute.xlu0 %8483  ;;  %v8481_v13 = vunpack.i.h.bf16 %v8479_v9  ;;  %v8480_v37 = vunpack.i.l.bf16 %v8479_v9  ;;  %v5700_v60 = vld [vmem:[%s11949_s3 + $0x1a8] sm:$0xff]  ;;  %v6983_v26 = vpack.c.bf16 %v4839_v43, %v4838_v11  ;;  %v6986_v22 = vpack.c.bf16 %v4831_v25, %v4830_v27  ;;  %v5721_v33 = vld [vmem:[%s11949_s3 + $0x250] sm:$0xff] }
 0x715   : > { %v8486_v8 = vunpack.i.h.bf16 %v8484_v34  ;;  %v8485_v19 = vunpack.i.l.bf16 %v8484_v34 }
 0x717   : > { %6965 = vmatpush1.bf16.msra.mxu1 %v6964_v44  ;;  %v4840_v42 = vsel %vm953_vm15, %v8485_v19, %v8480_v37  ;;  %v4841_v41 = vsel %vm953_vm15, %v8486_v8, %v8481_v13  ;;  %v5699_v44 = vld [vmem:[%s11949_s3 + $0x1a0] sm:$0xff]  ;;  %v4833_v57 = vsel %vm953_vm15, %v8481_v13, %v8486_v8 }
 0x718   : > { %6968 = vmatprep.subr.msk.bf16.mxu1 %vm9396_vm11, %v6966_v4  ;;  %v4832_v4 = vsel %vm953_vm15, %v8480_v37, %v8485_v19  ;;  %v6989_v56 = vpack.c.bf16 %v4841_v41, %v4840_v42 }
 0x719   : > { %v6992_v7 = vpack.c.bf16 %v4833_v57, %v4832_v4 }
 0x71b   : > { %6970 = vmatpush1.bf16.msra.mxu1 %v6969_v3  ;;  %v5724_v3 = vld [vmem:[%s11949_s3 + $0x268] sm:$0xff] }
 0x71c   : > { %6973 = vmatprep.subr.msk.bf16.mxu1 %vm9443_vm9, %v6971_v31  ;;  %v5701_v31 = vld [vmem:[%s11949_s3 + $0x1b0] sm:$0xff] }
 0x71e   : > { %5326 = vmatmul.mubr.f32.vlgmr.msra.gmra.mrb[16].mxu1 %v5689_v36 }
 0x71f   : > { %6976 = vmatpush1.bf16.msk.msra.mxu1 %vm9218_vm4, %v6974_v6  ;;  %5331 = vmatprep.mubr.f32.mxu1 %v5695_v55 }
 0x720   : > { %6979 = vmatprep.subr.msk.bf16.mxu1 %vm9443_vm9, %v6977_v47 }
 0x722   : > { %5332 = vmatmul.mubr.f32.gmra.mrb[18].mxu1 %v5694_v1 }
 0x723   : > { %6982 = vmatpush1.bf16.msk.msra.mxu1 %vm9218_vm4, %v6980_v15  ;;  %5337 = vmatprep.mubr.f32.mxu1 %v5700_v60 }
 0x724   : > { %6985 = vmatprep.subr.msk.bf16.mxu1 %vm9443_vm9, %v6983_v26  ;;  %v5087_v61 = vpop.permute.xlu1 %5086 }
 0x725   : > { %v5092_v6 = vpop.permute.xlu0 %5091 }
 0x726   : > { %5338 = vmatmul.mubr.f32.gmra.mrb[20].mxu1 %v5699_v44 }
 0x727   : > { %6988 = vmatpush1.bf16.msk.msra.mxu1 %vm9218_vm4, %v6986_v22  ;;  %5343 = vmatprep.mubr.f32.mxu1 %v5705_v17 }
 0x728   : > { %6991 = vmatprep.subr.msk.bf16.mxu1 %vm9443_vm9, %v6989_v56  ;;  %vm12272_vm9 = vcmask 523264   ;;  %v5097_v37 = vpop.permute.xlu1 %5096 }
 0x729   : > { %vm12273_vm15 = vmmov %vm12272_vm9  ;;  %v5102_v15 = vpop.permute.xlu0 %5101 }
 0x72a   : > { %5344 = vmatmul.mubr.f32.gmra.mrb[22].mxu1 %v5704_v46 }
 0x72b   : > { %6994 = vmatpush1.bf16.msk.msra.mxu1 %vm9218_vm4, %v6992_v7  ;;  %5349 = vmatprep.mubr.f32.mxu1 %v5710_v39  ;;  %vm12274_vm4 = vmmov %vm12272_vm9 }
 0x72c   : > { %vm12275_vm11 = vmmov %vm12274_vm4  ;;  %v5107_v41 = vpop.permute.xlu1 %5106 }
 0x72d   : > { %vm12276_vm13 = vmmov %vm12274_vm4  ;;  %v5112_v57 = vpop.permute.xlu0 %5111 }
 0x72e   : > { %5350 = vmatmul.mubr.f32.gmra.mrb[24].mxu1 %v5709_v45  ;;  %vm12277_vm14 = vmmov %vm12274_vm4 }
 0x72f   : > { %5355 = vmatprep.mubr.f32.mxu1 %v5715_v58  ;;  %vm12278_vm3 = vmmov %vm12274_vm4 }
 0x730   : > { %vm12279_vm5 = vmmov %vm12278_vm3  ;;  %v5117_v45 = vpop.permute.xlu1 %5116 }
 0x732   : > { %5356 = vmatmul.mubr.f32.gmra.mrb[26].mxu1 %v5714_v52 }
 0x733   : > { %5361 = vmatprep.mubr.f32.mxu1 %v5720_v62 }
 0x736   : > { %5362 = vmatmul.mubr.f32.gmra.mrb[28].mxu1 %v5719_v5 }
 0x737   : > { %5367 = vmatprep.mubr.f32.mxu1 %v5725_v20  ;;  %v5122_v20 = vpop.permute.xlu0 %5121 }
 0x73a   : > { %5368 = vmatmul.mubr.f32.gmra.mrb[30].mxu1 %v5724_v3 }
 0x73b   : > { %5438 = vmatprep.mubr.f32.mxu1 %v8520_v21 }
 0x73e   : > { %5735 = vmatmul.mubr.msk.f32.vlgmr.msra.gmra.mrb[16].mxu1 %vm12272_vm9, %v5691_v48 }
 0x73f   : > { %5444 = vmatprep.mubr.f32.mxu1 %v8520_v21 }
 0x742   : > { %5736 = vmatmul.mubr.msk.f32.gmra.mrb[18].mxu1 %vm12273_vm15, %v5696_v32 }
 0x743   : > { %5450 = vmatprep.mubr.f32.mxu1 %v8520_v21 }
 0x746   : > { %5737 = vmatmul.mubr.msk.f32.gmra.mrb[20].mxu1 %vm12274_vm4, %v5701_v31 }
 0x747   : > { %5456 = vmatprep.mubr.f32.mxu1 %v8520_v21 }
 0x74a   : > { %5738 = vmatmul.mubr.msk.f32.gmra.mrb[22].mxu1 %vm12275_vm11, %v5706_v54 }
 0x74b   : > { %5462 = vmatprep.mubr.f32.mxu1 %v8520_v21 }
 0x74e   : > { %5739 = vmatmul.mubr.msk.f32.gmra.mrb[24].mxu1 %vm12276_vm13, %v5711_v51 }
 0x74f   : > { %5468 = vmatprep.mubr.f32.mxu1 %v8520_v21 }
 0x752   : > { %5740 = vmatmul.mubr.msk.f32.gmra.mrb[26].mxu1 %vm12277_vm14, %v5716_v18 }
 0x753   : > { %5474 = vmatprep.mubr.f32.mxu1 %v8520_v21 }
 0x756   : > { %5741 = vmatmul.mubr.msk.f32.gmra.mrb[28].mxu1 %vm12278_vm3, %v5721_v33 }
 0x757   : > { %5480 = vmatprep.mubr.f32.mxu1 %v8520_v21 }
 0x75a   : > { %5742 = vmatmul.mubr.msk.f32.gmra.mrb[30].mxu1 %vm12279_vm5, %v5726_v59 }
 0x811   : > { %v5440_v36 = vpop.f32.mrb[16].mxu1 }
 0x812   : > { %v7043_v9 = vadd.f32 %v5440_v36, %v5087_v61  ;;  %v5442_v34 = vpop.f32.mrb[17].mxu1 }
 0x813   : > { %v7044_v21 = vadd.f32 %v5442_v34, %v5087_v61 }
 0x814   : > { %v5487_v55 = vadd.f32 %v7043_v9, %v10329_v10 }
 0x815   : > { %v5488_v50 = vadd.f32 %v7044_v21, %v10332_v0  ;;  %v5446_v53 = vpop.f32.mrb[18].mxu1 }
 0x816   : > { %5535 = vst [vmem:[%s11909_s23] sm:$0xff] %v5487_v55  ;;  %v7045_v47 = vadd.f32 %v5446_v53, %v5092_v6  ;;  %v5448_v11 = vpop.f32.mrb[19].mxu1 }
 0x817   : > { %5536 = vst [vmem:[%s11909_s23 + $0x8] sm:$0xff] %v5488_v50  ;;  %v7046_v43 = vadd.f32 %v5448_v11, %v5092_v6 }
 0x818   : > { %v5489_v13 = vadd.f32 %v7045_v47, %v10335_v14 }
 0x819   : > { %v5490_v8 = vadd.f32 %v7046_v43, %v10338_v24  ;;  %v5452_v19 = vpop.f32.mrb[20].mxu1 }
 0x81a   : > { %5537 = vst [vmem:[%s11909_s23 + $0x10] sm:$0xff] %v5489_v13  ;;  %v7047_v10 = vadd.f32 %v5452_v19, %v5097_v37  ;;  %v5454_v1 = vpop.f32.mrb[21].mxu1 }
 0x81b   : > { %5538 = vst [vmem:[%s11909_s23 + $0x18] sm:$0xff] %v5490_v8  ;;  %v7048_v0 = vadd.f32 %v5454_v1, %v5097_v37 }
 0x81c   : > { %v5491_v60 = vadd.f32 %v7047_v10, %v10345_v28 }
 0x81d   : > { %v5492_v27 = vadd.f32 %v7048_v0, %v10352_v40  ;;  %v5458_v25 = vpop.f32.mrb[22].mxu1 }
 0x81e   : > { %5539 = vst [vmem:[%s11909_s23 + $0x20] sm:$0xff] %v5491_v60  ;;  %v7049_v14 = vadd.f32 %v5458_v25, %v5102_v15  ;;  %v5460_v26 = vpop.f32.mrb[23].mxu1 }
 0x81f   : > { %5540 = vst [vmem:[%s11909_s23 + $0x28] sm:$0xff] %v5492_v27  ;;  %v7050_v24 = vadd.f32 %v5460_v26, %v5102_v15 }
 0x820   : > { %v5493_v42 = vadd.f32 %v7049_v14, %v10360_v38 }
 0x821   : > { %v5494_v44 = vadd.f32 %v7050_v24, %v10363_v29  ;;  %v5464_v17 = vpop.f32.mrb[24].mxu1 }
 0x822   : > { %5541 = vst [vmem:[%s11909_s23 + $0x30] sm:$0xff] %v5493_v42  ;;  %v7051_v28 = vadd.f32 %v5464_v17, %v5107_v41  ;;  %v5466_v22 = vpop.f32.mrb[25].mxu1 }
 0x823   : > { %5542 = vst [vmem:[%s11909_s23 + $0x38] sm:$0xff] %v5494_v44  ;;  %v7052_v40 = vadd.f32 %v5466_v22, %v5107_v41 }
 0x824   : > { %v5495_v4 = vadd.f32 %v7051_v28, %v10373_v49 }
 0x825   : > { %v5496_v56 = vadd.f32 %v7052_v40, %v10380_v12  ;;  %v5470_v46 = vpop.f32.mrb[26].mxu1 }
 0x826   : > { %5543 = vst [vmem:[%s11909_s23 + $0x40] sm:$0xff] %v5495_v4  ;;  %v7053_v38 = vadd.f32 %v5470_v46, %v5112_v57  ;;  %v5472_v39 = vpop.f32.mrb[27].mxu1 }
 0x827   : > { %5544 = vst [vmem:[%s11909_s23 + $0x48] sm:$0xff] %v5496_v56  ;;  %v7054_v29 = vadd.f32 %v5472_v39, %v5112_v57 }
 0x828   : > { %v5497_v7 = vadd.f32 %v7053_v38, %v10388_v23 }
 0x829   : > { %v5498_v58 = vadd.f32 %v7054_v29, %v10391_v16  ;;  %v5476_v52 = vpop.f32.mrb[28].mxu1 }
 0x82a   : > { %5545 = vst [vmem:[%s11909_s23 + $0x50] sm:$0xff] %v5497_v7  ;;  %v7055_v49 = vadd.f32 %v5476_v52, %v5117_v45  ;;  %v5478_v62 = vpop.f32.mrb[29].mxu1 }
 0x82b   : > { %5546 = vst [vmem:[%s11909_s23 + $0x58] sm:$0xff] %v5498_v58  ;;  %v7056_v12 = vadd.f32 %v5478_v62, %v5117_v45 }
 0x82c   : > { %v5499_v5 = vadd.f32 %v7055_v49, %v10405_v35 }
 0x82d   : > { %v5500_v3 = vadd.f32 %v7056_v12, %v10410_v30  ;;  %v5482_v48 = vpop.f32.mrb[30].mxu1 }
 0x82e   : > { %5547 = vst [vmem:[%s11909_s23 + $0x60] sm:$0xff] %v5499_v5  ;;  %v7057_v23 = vadd.f32 %v5482_v48, %v5122_v20  ;;  %v5484_v32 = vpop.f32.mrb[31].mxu1 }
 0x82f   : > { %5548 = vst [vmem:[%s11909_s23 + $0x68] sm:$0xff] %v5500_v3  ;;  %v7058_v31 = vadd.f32 %v5484_v32, %v5122_v20 }
 0x830   : > { %v5501_v16 = vadd.f32 %v7057_v23, %v10415_v63 }
 0x831   : > { %v5502_v54 = vadd.f32 %v7058_v31, %v10418_v2 }
 0x832   : > { %5549 = vst [vmem:[%s11909_s23 + $0x70] sm:$0xff] %v5501_v16 }
 0x833   : > { %5550 = vst [vmem:[%s11909_s23 + $0x78] sm:$0xff] %v5502_v54 }
 0x834 PF: > { %s15_s18 = sadd.s32 1, %s8509_s18  }
 0x835   : > { %p12_p4 = scmp.ge.s32.totalorder %s15_s18, 4  }
 0x837   :  { %14 = sbr.rel (!%p12_p4) target bundleno = 1 (0x1), region = 74 }

</bundles_post_ra>
